<compile_context>
chip_gen: v6e
topology: v6e:2x2x1
jax: 0.10.0
libtpu: 0.0.40
codegen_flags: <defaults>
</compile_context>

<pallas_src>
import functools
import math
import numpy as np
import jax
import jax.numpy as jnp
from jax.experimental import pallas as pl
from jax.experimental.pallas import tpu as pltpu

# ----------------------------- config (cfg dict of the module) -----------------------------
CFG = dict(
    fs=8000, win_len=256, hop_len=128, n_fft=256, n_mels=32,
    n_frames=8, overlap=0.5, arch="grafp",
    gain=6.0, pitch_shift=2, min_rate=0.9, max_rate=1.1,
)

AMIN = 1e-10                       # torchaudio AmplitudeToDB (power), ref=1.0 -> db_multiplier = 0
_TEN_OVER_LN10 = 10.0 / math.log(10.0)
_LANE = 128
_TILE_R_MAX = 2048                 # ~8.5 MiB footprint -> safe under v5e's 16 MiB scoped default.
                                   # For long audio on v6e/v7x, raise together with
                                   # pltpu.CompilerParams(vmem_limit_bytes=...).


def _round_up(x, m):
    return ((x + m - 1) // m) * m


def _cdiv(a, b):
    return -(-a // b)


# ----------------------------- deterministic "parameters" (buffers) -----------------------------
def hann_window(n):
    # torch.hann_window(n, periodic=True)
    k = np.arange(n, dtype=np.float64)
    return 0.5 * (1.0 - np.cos(2.0 * np.pi * k / n))


def dft_matrices(n_fft):
    # real/imag parts of rfft as matmuls: X[k] = sum_n x[n] * exp(-2*pi*i*n*k/n_fft)
    n_bins = n_fft // 2 + 1
    n = np.arange(n_fft, dtype=np.float64)[:, None]
    k = np.arange(n_bins, dtype=np.float64)[None, :]
    ang = 2.0 * np.pi * n * k / n_fft
    return np.cos(ang), -np.sin(ang)               # (n_fft, n_bins) each, float64


def mel_filterbank(sr, n_fft, n_mels):
    # torchaudio.functional.melscale_fbanks, htk scale, norm=None, f_min=0, f_max=sr/2
    n_freqs = n_fft // 2 + 1
    all_freqs = np.linspace(0.0, sr / 2.0, n_freqs)
    hz_to_mel = lambda f: 2595.0 * np.log10(1.0 + f / 700.0)
    mel_to_hz = lambda m: 700.0 * (10.0 ** (m / 2595.0) - 1.0)
    m_pts = np.linspace(hz_to_mel(0.0), hz_to_mel(sr / 2.0), n_mels + 2)
    f_pts = mel_to_hz(m_pts)
    f_diff = f_pts[1:] - f_pts[:-1]
    slopes = f_pts[None, :] - all_freqs[:, None]
    down = -slopes[:, :-2] / f_diff[:-1]
    up = slopes[:, 2:] / f_diff[1:]
    return np.maximum(0.0, np.minimum(down, up))   # (n_freqs, n_mels), float64


@functools.lru_cache(maxsize=None)
def _make_weights(sr, n_fft, n_mels):
    """Window-folded, transposed [cos; sin] DFT weights (bins 1..n_fft/2) + transposed fbank."""
    n_bins = n_fft // 2 + 1                        # 129
    nb = n_fft // 2                                # 128 kept bins (DC dropped)
    fb_full = mel_filterbank(sr, n_fft, n_mels)    # (n_bins, n_mels)
    # Exactness guard for the 128-bin repack: DC and Nyquist must carry zero mel weight
    # (true for f_min=0, f_max=sr/2, norm=None); a cfg change cannot silently break this.
    assert np.all(fb_full[0, :] == 0.0), "DC mel weight must be zero for the 128-bin repack"
    assert np.all(fb_full[n_bins - 1, :] == 0.0), "Nyquist mel weight must be zero for the 128-bin repack"
    win = hann_window(n_fft)[:, None]              # (n_fft, 1)
    cos_m, sin_m = dft_matrices(n_fft)             # (n_fft, n_bins) each
    w_cos_t = (win * cos_m)[:, 1:n_bins].T         # (nb, n_fft), bins 1..nb
    w_sin_t = (win * sin_m)[:, 1:n_bins].T
    w_t = np.concatenate([w_cos_t, w_sin_t], axis=0).astype(np.float32)      # (2*nb, n_fft)
    fb_t = np.ascontiguousarray(fb_full[1:n_bins, :].T).astype(np.float32)   # (n_mels, nb)
    return w_t, fb_t, nb


# ----------------------------- Pallas kernel -----------------------------
def _melspec_db_kernel(frames_ref, w_ref, fb_ref, out_ref, *, nb):
    # frames: (n_fft, tile_r)    raw frames as columns (window already folded into w)
    # w:      (2*nb, n_fft)      [win*cos ; win*sin], bins 1..nb as rows
    # fb:     (n_mels, nb)       transposed mel filterbank (no padding)
    # out:    (n_mels, tile_r)   lane-dense dB output
    hi = jax.lax.Precision.HIGHEST   # keep the f32 DFT-as-matmul exact on every generation
    spec = jnp.dot(w_ref[...], frames_ref[...],
                   preferred_element_type=jnp.float32, precision=hi)   # (2*nb, tile_r), MXU
    re = spec[:nb, :]
    im = spec[nb:, :]
    power = re * re + im * im                                          # |rfft|^2 (power=2.0), VPU
    mel = jnp.dot(fb_ref[...], power,
                  preferred_element_type=jnp.float32, precision=hi)    # (n_mels, tile_r), MXU
    # AmplitudeToDB (stype='power', top_db=None, ref=1.0): 10*log10(max(x, amin))
    out_ref[...] = _TEN_OVER_LN10 * jnp.log(jnp.maximum(mel, AMIN))


# ----------------------------- wrapper -----------------------------
def log_mel_spectrogram(x, *, cfg=CFG):
    """x: (B, T) float32 audio -> (B, n_mels, F) float32 log-mel spectrogram (dB)."""
    n_fft, hop, win_len = cfg["n_fft"], cfg["hop_len"], cfg["win_len"]
    n_mels, sr = cfg["n_mels"], cfg["fs"]
    assert win_len == n_fft, "demo uses win_len == n_fft (window is not zero-padded)"
    assert 2 * hop == n_fft, "chunked (gather-free) framing below assumes 50% frame overlap"
    B, T = x.shape
    F = 1 + T // hop                                  # torch.stft(center=True) frame count

    # --- framing without an XLA gather (hop == n_fft/2) ---------------------------------
    # reflect-pad, split into non-overlapped hop-sized chunks; frame f = [chunk f | chunk f+1].
    # Chunks are transposed once (~1x audio traffic) so the kernel input is (n_fft, rows):
    # n_fft on sublanes, frames on lanes -> the kernel's log()/store touch only n_mels rows.
    # TODO(synk): fully in-kernel framing (non-overlapped chunk array + two hop-wide MXU
    # passes) would also skip materializing the 2x-overlapped frame matrix, but needs
    # element-offset BlockSpecs / manual DMA because of batch boundaries; not worth it here.
    pad = n_fft // 2
    xp = jnp.pad(x.astype(jnp.float32), ((0, 0), (pad, pad)), mode="reflect")
    chunks = xp[:, :(F + 1) * hop].reshape(B, F + 1, hop)
    chunks_t = jnp.transpose(chunks, (2, 0, 1))                         # (hop, B, F+1)
    frames_t = jnp.concatenate([chunks_t[:, :, :F], chunks_t[:, :, 1:]], axis=0)
    frames_t = frames_t.reshape(n_fft, B * F)                           # (n_fft, rows)

    rows = B * F
    rows_pad = _round_up(rows, _LANE)                                   # lane-dense columns
    if rows_pad != rows:
        frames_t = jnp.pad(frames_t, ((0, 0), (0, rows_pad - rows)))

    # Row tile: multiple of 128, at least two grid steps when possible (keeps both v7x
    # TensorCores busy via the "parallel" axis), capped for VMEM. A partial last block is
    # fine: Pallas masks its out-of-bounds writes and its garbage columns are never re-read.
    tile_r = min(_TILE_R_MAX, max(_LANE, _round_up(_cdiv(rows, 2), _LANE)))
    grid = (_cdiv(rows_pad, tile_r),)

    w_t_np, fb_t_np, nb = _make_weights(sr, n_fft, n_mels)
    w_t = jnp.asarray(w_t_np)        # (256, 256) f32, 256 KiB
    fb_t = jnp.asarray(fb_t_np)      # (32, 128)  f32,  16 KiB

    out = pl.pallas_call(
        functools.partial(_melspec_db_kernel, nb=nb),
        out_shape=jax.ShapeDtypeStruct((n_mels, rows_pad), jnp.float32),
        grid=grid,
        in_specs=[
            pl.BlockSpec((n_fft, tile_r), lambda i: (0, i)),   # frames (column-tiled)
            # w/fb are grid-invariant; at ~272 KiB total their double-buffering cost is
            # negligible VMEM -- single-buffering them only matters once tile_r is pushed up.
            pl.BlockSpec((2 * nb, n_fft), lambda i: (0, 0)),   # window-folded [cos; sin]
            pl.BlockSpec((n_mels, nb), lambda i: (0, 0)),      # transposed mel filterbank
        ],
        out_specs=pl.BlockSpec((n_mels, tile_r), lambda i: (0, i)),
        compiler_params=pltpu.CompilerParams(dimension_semantics=("parallel",)),
    )(frames_t, w_t, fb_t)

    mel_db = out[:, :rows].reshape(n_mels, B, F)               # drop column padding
    return jnp.transpose(mel_db, (1, 0, 2))                    # (B, n_mels, F), tiny transpose


def gpu_transform_sample_id_forward(x_i, x_j, *, cfg=CFG):
    """Equivalent of GPUTransformSampleID.forward with train=True, cpu=False, arch='grafp'."""
    # TODO(synk): cpu-path random waveform augmentations (Gain/PitchShift/TimeStretch), the
    # CQT branch, and the eval-path unfold are not part of this train-mode forward.
    x = jnp.concatenate([x_i, x_j], axis=0)        # fuse both views into a single pallas_call
    X = log_mel_spectrogram(x, cfg=cfg)
    B = x_i.shape[0]
    return X[:B], X[B:]


# ----------------------------- pure-JAX reference for sanity check -----------------------------
def _reference(x, cfg=CFG):
    n_fft, hop, n_mels, sr = cfg["n_fft"], cfg["hop_len"], cfg["n_mels"], cfg["fs"]
    pad = n_fft // 2
    xp = jnp.pad(x, ((0, 0), (pad, pad)), mode="reflect")
    F = 1 + x.shape[1] // hop
    idx = hop * jnp.arange(F)[:, None] + jnp.arange(n_fft)[None, :]
    win = jnp.asarray(hann_window(n_fft).astype(np.float32))
    frames = xp[:, idx] * win[None, None, :]
    spec = jnp.abs(jnp.fft.rfft(frames, n=n_fft, axis=-1)) ** 2            # (B, F, n_bins)
    mel = spec @ jnp.asarray(mel_filterbank(sr, n_fft, n_mels).astype(np.float32))
    db = 10.0 * jnp.log10(jnp.maximum(mel, AMIN))
    return jnp.transpose(db, (0, 2, 1))                                     # (B, n_mels, F)


if __name__ == "__main__":
    key = jax.random.PRNGKey(0)
    k1, k2 = jax.random.split(key)
    B, T = 2, 4096
    x_i = jax.random.normal(k1, (B, T), dtype=jnp.float32)
    x_j = jax.random.normal(k2, (B, T), dtype=jnp.float32)

    fwd = jax.jit(gpu_transform_sample_id_forward)
    X_i, X_j = fwd(x_i, x_j)
    jax.block_until_ready((X_i, X_j))

    n_mels = CFG["n_mels"]
    F = 1 + T // CFG["hop_len"]
    assert X_i.shape == (B, n_mels, F) and X_j.shape == (B, n_mels, F)

    # correctness check against pure-JAX reference (tolerance for DFT-as-matmul in f32)
    np.testing.assert_allclose(np.asarray(X_i), np.asarray(_reference(x_i)), rtol=1e-3, atol=1e-3)
    np.testing.assert_allclose(np.asarray(X_j), np.asarray(_reference(x_j)), rtol=1e-3, atol=1e-3)

    print("KERNEL_OK")
</pallas_src>

<mosaic_0001>
module attributes {stable_mosaic.version = 11 : i64} {
  func.func @_melspec_db_kernel(%arg0: i32, %arg1: memref<256x128xf32, #tpu.memory_space<vmem>>, %arg2: memref<256x256xf32, #tpu.memory_space<vmem>>, %arg3: memref<32x128xf32, #tpu.memory_space<vmem>>, %arg4: memref<32x128xf32, #tpu.memory_space<vmem>>) attributes {dimension_semantics = [#tpu.dimension_semantics<parallel>], iteration_bounds = array<i64: 2>, scalar_prefetch = 0 : i64, scratch_operands = 0 : i64, tpu.core_type = #tpu.core_type<tc>, window_params = [{transform_indices = @transform_0, window_bounds = array<i64: 256, 128>}, {pipeline_mode = #tpu.pipeline_mode<synchronous>, transform_indices = @transform_1, window_bounds = array<i64: 256, 256>}, {pipeline_mode = #tpu.pipeline_mode<synchronous>, transform_indices = @transform_2, window_bounds = array<i64: 32, 128>}, {transform_indices = @transform_3, window_bounds = array<i64: 32, 128>}]} {
    %c0 = arith.constant 0 : index
    %c0_0 = arith.constant 0 : index
    %0 = vector.load %arg2[%c0, %c0_0] : memref<256x256xf32, #tpu.memory_space<vmem>>, vector<256x256xf32>
    %c0_1 = arith.constant 0 : index
    %c0_2 = arith.constant 0 : index
    %1 = vector.load %arg1[%c0_1, %c0_2] : memref<256x128xf32, #tpu.memory_space<vmem>>, vector<256x128xf32>
    %cst = arith.constant dense<0.000000e+00> : vector<256x128xf32>
    %2 = tpu.matmul %0, %1, %cst {dimension_numbers = #tpu.dot_dimension_numbers<[1], [0], [0], [1], [0, 0, 1, 1], [], []>, precision = #tpu.contract_precision<fp32>} : vector<256x256xf32>, vector<256x128xf32>, vector<256x128xf32> -> vector<256x128xf32>
    %3 = vector.extract_strided_slice %2 {offsets = [0, 0], sizes = [128, 128], strides = [1, 1]} : vector<256x128xf32> to vector<128x128xf32>
    %4 = vector.extract_strided_slice %2 {offsets = [128, 0], sizes = [128, 128], strides = [1, 1]} : vector<256x128xf32> to vector<128x128xf32>
    %5 = arith.mulf %3, %3 : vector<128x128xf32>
    %6 = arith.mulf %4, %4 : vector<128x128xf32>
    %7 = arith.addf %5, %6 : vector<128x128xf32>
    %c0_3 = arith.constant 0 : index
    %c0_4 = arith.constant 0 : index
    %8 = vector.load %arg3[%c0_3, %c0_4] : memref<32x128xf32, #tpu.memory_space<vmem>>, vector<32x128xf32>
    %cst_5 = arith.constant dense<0.000000e+00> : vector<32x128xf32>
    %9 = tpu.matmul %8, %7, %cst_5 {dimension_numbers = #tpu.dot_dimension_numbers<[1], [0], [0], [1], [0, 0, 1, 1], [], []>, precision = #tpu.contract_precision<fp32>} : vector<32x128xf32>, vector<128x128xf32>, vector<32x128xf32> -> vector<32x128xf32>
    %cst_6 = arith.constant 1.000000e-10 : f32
    %10 = vector.broadcast %cst_6 : f32 to vector<32x128xf32>
    %11 = arith.maximumf %9, %10 : vector<32x128xf32>
    %12 = math.log %11 : vector<32x128xf32>
    %cst_7 = arith.constant 4.34294462 : f32
    %13 = vector.broadcast %cst_7 : f32 to vector<32x128xf32>
    %14 = arith.mulf %13, %12 : vector<32x128xf32>
    %c0_8 = arith.constant 0 : index
    %c0_9 = arith.constant 0 : index
    %15 = vector.load %arg4[%c0_8, %c0_9] : memref<32x128xf32, #tpu.memory_space<vmem>>, vector<32x128xf32>
    tpu.vector_store %arg4[%c0_8, %c0_9], %14 {strides = array<i32>} : memref<32x128xf32, #tpu.memory_space<vmem>>, vector<32x128xf32>,
    return
  }
  func.func @transform_0(%arg0: i32) -> (i32, i32) {
    %c0_i32 = arith.constant 0 : i32
    %c0_i32_0 = arith.constant 0 : i32
    return %c0_i32, %arg0 : i32, i32
  }
  func.func @transform_1(%arg0: i32) -> (i32, i32) {
    %c0_i32 = arith.constant 0 : i32
    %c0_i32_0 = arith.constant 0 : i32
    %c0_i32_1 = arith.constant 0 : i32
    return %c0_i32, %c0_i32_0 : i32, i32
  }
  func.func @transform_2(%arg0: i32) -> (i32, i32) {
    %c0_i32 = arith.constant 0 : i32
    %c0_i32_0 = arith.constant 0 : i32
    %c0_i32_1 = arith.constant 0 : i32
    return %c0_i32, %c0_i32_0 : i32, i32
  }
  func.func @transform_3(%arg0: i32) -> (i32, i32) {
    %c0_i32 = arith.constant 0 : i32
    %c0_i32_0 = arith.constant 0 : i32
    return %c0_i32, %arg0 : i32, i32
  }
}

</mosaic_0001>

<bundles_post_ra>
// kernel: gpu_transform_sample_id_forward.1
= control target key start
LH: loop header
LB: loop body
LE: loop exit
PB: predicated region body
PF: predicated region fallthrough
CT: control target
= control target key end

     0   :  { %s4409_s12 = smov 0   ;;  %s4411_s13 = smov 0   ;;  %s7091_s0 = inlined_call_operand.vmem [shape: f32[256,256], index: 0, kind: input, shape index: {}]   ;;  %s7092_s1 = inlined_call_operand.vmem [shape: f32[256,256], index: 1, kind: input, shape index: {}]   ;;  %s7093_s2 = inlined_call_operand.vmem [shape: f32[32,128], index: 2, kind: input, shape index: {}]   ;;  %s7094_s3 = inlined_call_operand.vmem [shape: f32[32,256], index: 3, kind: output, shape index: {}]  }
   0x1   :  { %s4413_s14 = smov 0  }
   0x2 LB: > { %s3970_s15 = sadd.s32 4294967295, %s4386_s14   ;;  %s4426_s16 = sadd.s32 1, %s4386_s14   ;;  %s4386_s14 = sphi %s4413_s14, %s7927_s14   ;;  %s4382_s13 = sphi %s4411_s13, %s7926_s13   ;;  %s4378_s12 = sphi %s4409_s12, %s7925_s12  }
   0x3   : > { %s17_s17 = ssub.s32 %s4386_s14, %s4426_s16  ;;  %s20_s18 = sadd.s32 1, %s4382_s13 }
   0x4   : > { %p18_p0 = scmp.eq.s32.totalorder %s17_s17, 0  ;;  %p27_p1 = scmp.ne.s32.totalorder %s4382_s13, %s4378_s12 }
   0x5   : > { %p28_p2 = scmp.eq.s32.totalorder %s4386_s14, 0  ;;  %p99_p3 = scmp.eq.s32.totalorder %s3970_s15, 1 }
   0x6   : > { %s4437_s19 = scalar_select %p18_p0, %s4382_s13, %s20_s18  }
   0x7   : > { %p29_p4 = por %p28_p2, %p27_p1  ;;  %p4439_p5 = por %p99_p3, %p27_p1 }
   0x8   : > { %p3973_p6 = scmp.ge.s32.totalorder %s4386_s14, 2 }
   0xa   : > { %127 = sbr.rel (%p3973_p6) target bundleno = 35 (0x23), region = 24 }
   0xf   : > { %130 = sbr.rel (!%p29_p4) target bundleno = 35 (0x23), region = 28  ;;  %s132_s21 = sand.u32 (%p29_p4), 1, %s4382_s13  }
  0x10   : > { %s3975_s22 = sshll.u32 (%p29_p4), %s4386_s14, 3  ;;  %s3974_s23 = sshll.u32 (%p29_p4), %s132_s21, 8 }
  0x11   : > { %s4449_s26 = scalar_lea.vmem (%p29_p4), %s7091_s0, %s3975_s22  ;;  %s4454_s27 = scalar_lea.vmem (%p29_p4), [#allocation2], %s3974_s23 }
  0x12   : > { %v227_v0 = vld [vmem:[%s4449_s26] sm:$0xff] (%p29_p4)  ;;  %v229_v1 = vld [vmem:[%s4449_s26 + $0x10] sm:$0xff] (%p29_p4) }
  0x13   : > { %v231_v2 = vld [vmem:[%s4449_s26 + $0x20] sm:$0xff] (%p29_p4)  ;;  %228 = vst [vmem:[%s4454_s27] sm:$0xff] (%p29_p4), %v227_v0  ;;  %230 = vst [vmem:[%s4454_s27 + $0x8] sm:$0xff] (%p29_p4), %v229_v1  ;;  %v233_v3 = vld [vmem:[%s4449_s26 + $0x30] sm:$0xff] (%p29_p4) }
  0x14   : > { %232 = vst [vmem:[%s4454_s27 + $0x10] sm:$0xff] %v231_v2  ;;  %v235_v4 = vld [vmem:[%s4449_s26 + $0x40] sm:$0xff]  ;;  %v237_v5 = vld [vmem:[%s4449_s26 + $0x50] sm:$0xff]  ;;  %234 = vst [vmem:[%s4454_s27 + $0x18] sm:$0xff] %v233_v3 }
  0x15   : > { %236 = vst [vmem:[%s4454_s27 + $0x20] sm:$0xff] %v235_v4  ;;  %238 = vst [vmem:[%s4454_s27 + $0x28] sm:$0xff] %v237_v5  ;;  %v239_v6 = vld [vmem:[%s4449_s26 + $0x60] sm:$0xff]  ;;  %v241_v7 = vld [vmem:[%s4449_s26 + $0x70] sm:$0xff] }
  0x16   : > { %v243_v8 = vld [vmem:[%s4449_s26 + $0x80] sm:$0xff]  ;;  %240 = vst [vmem:[%s4454_s27 + $0x30] sm:$0xff] %v239_v6  ;;  %242 = vst [vmem:[%s4454_s27 + $0x38] sm:$0xff] %v241_v7  ;;  %v245_v9 = vld [vmem:[%s4449_s26 + $0x90] sm:$0xff] }
  0x17   : > { %244 = vst [vmem:[%s4454_s27 + $0x40] sm:$0xff] %v243_v8  ;;  %v247_v10 = vld [vmem:[%s4449_s26 + $0xa0] sm:$0xff]  ;;  %v249_v11 = vld [vmem:[%s4449_s26 + $0xb0] sm:$0xff]  ;;  %246 = vst [vmem:[%s4454_s27 + $0x48] sm:$0xff] %v245_v9 }
  0x18   : > { %248 = vst [vmem:[%s4454_s27 + $0x50] sm:$0xff] %v247_v10  ;;  %250 = vst [vmem:[%s4454_s27 + $0x58] sm:$0xff] %v249_v11  ;;  %v251_v12 = vld [vmem:[%s4449_s26 + $0xc0] sm:$0xff]  ;;  %v253_v13 = vld [vmem:[%s4449_s26 + $0xd0] sm:$0xff] }
  0x19   : > { %v255_v14 = vld [vmem:[%s4449_s26 + $0xe0] sm:$0xff]  ;;  %252 = vst [vmem:[%s4454_s27 + $0x60] sm:$0xff] %v251_v12  ;;  %254 = vst [vmem:[%s4454_s27 + $0x68] sm:$0xff] %v253_v13  ;;  %v257_v15 = vld [vmem:[%s4449_s26 + $0xf0] sm:$0xff] }
  0x1a   : > { %256 = vst [vmem:[%s4454_s27 + $0x70] sm:$0xff] %v255_v14  ;;  %v259_v16 = vld [vmem:[%s4449_s26 + $0x100] sm:$0xff]  ;;  %v261_v17 = vld [vmem:[%s4449_s26 + $0x110] sm:$0xff]  ;;  %258 = vst [vmem:[%s4454_s27 + $0x78] sm:$0xff] %v257_v15 }
  0x1b   : > { %260 = vst [vmem:[%s4454_s27 + $0x80] sm:$0xff] %v259_v16  ;;  %262 = vst [vmem:[%s4454_s27 + $0x88] sm:$0xff] %v261_v17  ;;  %v263_v18 = vld [vmem:[%s4449_s26 + $0x120] sm:$0xff]  ;;  %v265_v19 = vld [vmem:[%s4449_s26 + $0x130] sm:$0xff] }
  0x1c   : > { %v267_v20 = vld [vmem:[%s4449_s26 + $0x140] sm:$0xff]  ;;  %264 = vst [vmem:[%s4454_s27 + $0x90] sm:$0xff] %v263_v18  ;;  %266 = vst [vmem:[%s4454_s27 + $0x98] sm:$0xff] %v265_v19  ;;  %v269_v21 = vld [vmem:[%s4449_s26 + $0x150] sm:$0xff] }
  0x1d   : > { %268 = vst [vmem:[%s4454_s27 + $0xa0] sm:$0xff] %v267_v20  ;;  %v271_v22 = vld [vmem:[%s4449_s26 + $0x160] sm:$0xff]  ;;  %v273_v23 = vld [vmem:[%s4449_s26 + $0x170] sm:$0xff]  ;;  %270 = vst [vmem:[%s4454_s27 + $0xa8] sm:$0xff] %v269_v21 }
  0x1e   : > { %272 = vst [vmem:[%s4454_s27 + $0xb0] sm:$0xff] %v271_v22  ;;  %274 = vst [vmem:[%s4454_s27 + $0xb8] sm:$0xff] %v273_v23  ;;  %v275_v24 = vld [vmem:[%s4449_s26 + $0x180] sm:$0xff]  ;;  %v277_v25 = vld [vmem:[%s4449_s26 + $0x190] sm:$0xff] }
  0x1f   : > { %v279_v26 = vld [vmem:[%s4449_s26 + $0x1a0] sm:$0xff]  ;;  %276 = vst [vmem:[%s4454_s27 + $0xc0] sm:$0xff] %v275_v24  ;;  %278 = vst [vmem:[%s4454_s27 + $0xc8] sm:$0xff] %v277_v25  ;;  %v281_v27 = vld [vmem:[%s4449_s26 + $0x1b0] sm:$0xff] }
  0x20   : > { %280 = vst [vmem:[%s4454_s27 + $0xd0] sm:$0xff] %v279_v26  ;;  %v283_v28 = vld [vmem:[%s4449_s26 + $0x1c0] sm:$0xff]  ;;  %v285_v29 = vld [vmem:[%s4449_s26 + $0x1d0] sm:$0xff]  ;;  %282 = vst [vmem:[%s4454_s27 + $0xd8] sm:$0xff] %v281_v27 }
  0x21   : > { %284 = vst [vmem:[%s4454_s27 + $0xe0] sm:$0xff] %v283_v28  ;;  %286 = vst [vmem:[%s4454_s27 + $0xe8] sm:$0xff] %v285_v29  ;;  %v287_v30 = vld [vmem:[%s4449_s26 + $0x1e0] sm:$0xff]  ;;  %v289_v31 = vld [vmem:[%s4449_s26 + $0x1f0] sm:$0xff] }
  0x22   : > { %288 = vst [vmem:[%s4454_s27 + $0xf0] sm:$0xff] %v287_v30  ;;  %290 = vst [vmem:[%s4454_s27 + $0xf8] sm:$0xff] %v289_v31 }
  0x23 PF: > { %p3976_p7 = scmp.ge.s32.totalorder %s4386_s14, 1  ;;  %p295_p8 = scmp.lt.s32.totalorder %s4386_s14, 3 }
  0x25   : > { %p296_p9 = pnand %p3976_p7, %p295_p8 }
  0x27   : > { %299 = sbr.rel (%p296_p9) target bundleno = 1042 (0x412), region = 66 }
  0x2c   : > { %s302_s28 = sand.u32 1, %s4378_s12   ;;  %v4523_v32 = vld [vmem:[%s7092_s1 + $0x8] sm:$0xff]  ;;  %v7122_v33 = vmov 0.0   ;;  %s3980_s12 = sshll.u32 (%p4439_p5), %s3970_s15, 3 }
  0x2d   : > { %420 = vmatprep.subr.mxu0 %v7122_v33  ;;  %s3977_s4 = sshll.u32 %s302_s28, 8  ;;  %997 = vmatprep.subr.mxu1 %v7122_v33  ;;  %v4530_v34 = vand.u32 4294901760, %v4523_v32  ;;  %s3978_s7 = sshll.u32 %s302_s28, 5 }
  0x2e   : > { %s4532_s5 = scalar_lea.vmem [#allocation2], %s3977_s4  ;;  %s323_s8 = scalar_lea.vmem [#allocation3], %s3978_s7 }
  0x2f   : > { %7428 = vst [vmem:[#allocation4_spill] sm:$0xff] %v4530_v34  ;;  %v403_v35 = vld [vmem:[%s4532_s5 + $0x78] sm:$0xff]  ;;  %v402_v36 = vld [vmem:[%s4532_s5 + $0x70] sm:$0xff]  ;;  %v401_v37 = vld [vmem:[%s4532_s5 + $0x68] sm:$0xff]  ;;  %1222 = vmatprep.mubr.f32.mxu1 %v4530_v34  ;;  %s3868_s10 = scalar_lea.vmem (%p4439_p5), %s7094_s3, %s3980_s12 }
  0x30   : > { %v4538_v38 = vand.u32 4294901760, %v403_v35  ;;  %v4540_v39 = vand.u32 4294901760, %v402_v36  ;;  %v4542_v40 = vand.u32 4294901760, %v401_v37  ;;  %v400_v41 = vld [vmem:[%s4532_s5 + $0x60] sm:$0xff]  ;;  %v399_v42 = vld [vmem:[%s4532_s5 + $0x58] sm:$0xff]  ;;  %v398_v43 = vld [vmem:[%s4532_s5 + $0x50] sm:$0xff] }
  0x31   : > { %v4547_v44 = vand.u32 4294901760, %v400_v41  ;;  %v4549_v45 = vand.u32 4294901760, %v399_v42  ;;  %v4551_v46 = vand.u32 4294901760, %v398_v43  ;;  %v397_v47 = vld [vmem:[%s4532_s5 + $0x48] sm:$0xff]  ;;  %v396_v48 = vld [vmem:[%s4532_s5 + $0x40] sm:$0xff]  ;;  %v395_v53 = vld [vmem:[%s4532_s5 + $0x38] sm:$0xff] }
  0x32   : > { %422 = vmatpush1.msra.mxu0 %v4538_v38  ;;  %v4557_v49 = vsub.f32 %v403_v35, %v4538_v38  ;;  %v4560_v50 = vsub.f32 %v402_v36, %v4540_v39  ;;  %v4562_v51 = vand.u32 4294901760, %v397_v47  ;;  %v4565_v52 = vsub.f32 %v401_v37, %v4542_v40  ;;  %v394_v60 = vld [vmem:[%s4532_s5 + $0x30] sm:$0xff]  ;;  %v393_v6 = vld [vmem:[%s4532_s5 + $0x28] sm:$0xff]  ;;  %v392_v11 = vld [vmem:[%s4532_s5 + $0x20] sm:$0xff] }
  0x33   : > { %423 = vmatprep.subr.mxu0 %v7122_v33  ;;  %v4570_v54 = vsub.f32 %v400_v41, %v4547_v44  ;;  %v4573_v55 = vsub.f32 %v399_v42, %v4549_v45  ;;  %v4579_v59 = vand.u32 4294901760, %v396_v48  ;;  %v4584_v62 = vand.u32 4294901760, %v395_v53  ;;  %v391_v19 = vld [vmem:[%s4532_s5 + $0x18] sm:$0xff]  ;;  %v390_v23 = vld [vmem:[%s4532_s5 + $0x10] sm:$0xff]  ;;  %v389_v29 = vld [vmem:[%s4532_s5 + $0x8] sm:$0xff] }
  0x34   : > { %425 = vmatpush1.msra.mxu0 %v4540_v39  ;;  %v7111_v56 = vand.u32 4294901760, %v4557_v49  ;;  %v7110_v57 = vand.u32 4294901760, %v4560_v50  ;;  %v7108_v58 = vand.u32 4294901760, %v4565_v52  ;;  %v4588_v0 = vsub.f32 %v398_v43, %v4551_v46  ;;  %v388_v41 = vld [vmem:[%s4532_s5] sm:$0xff] }
  0x35   : > { %7429 = vst [vmem:[#allocation5_spill] sm:$0xff] %v4573_v55  ;;  %426 = vmatprep.subr.mxu0 %v7122_v33  ;;  %v7107_v61 = vand.u32 4294901760, %v4570_v54  ;;  %v7105_v63 = vand.u32 4294901760, %v4573_v55  ;;  %v4601_v4 = vsub.f32 %v397_v47, %v4562_v51  ;;  %v4604_v5 = vand.u32 4294901760, %v394_v60 }
  0x36   : > { %428 = vmatpush1.msra.mxu0 %v4542_v40  ;;  %v1001_v1 = vsub.f32 %v4557_v49, %v7111_v56  ;;  %v1008_v2 = vsub.f32 %v4560_v50, %v7110_v57  ;;  %v1015_v3 = vsub.f32 %v4565_v52, %v7108_v58  ;;  %v7104_v10 = vand.u32 4294901760, %v4588_v0  ;;  %v410_v57 = vld [vmem:[%s4532_s5 + $0xb0] sm:$0xff] }
  0x37   : > { %429 = vmatprep.subr.mxu0 %v7122_v33  ;;  %v1022_v9 = vsub.f32 %v4570_v54, %v7107_v61  ;;  %v1029_v12 = vsub.f32 %v4573_v55, %v7105_v63  ;;  %v4618_v13 = vsub.f32 %v396_v48, %v4579_v59  ;;  %v4621_v15 = vand.u32 4294901760, %v393_v6  ;;  %v411_v61 = vld [vmem:[%s4532_s5 + $0xb8] sm:$0xff] }
  0x38   : > { %431 = vmatpush1.msra.mxu0 %v4547_v44  ;;  %v1002_v7 = vand.u32 4294901760, %v1001_v1  ;;  %v1009_v8 = vand.u32 4294901760, %v1008_v2  ;;  %v1016_v14 = vand.u32 4294901760, %v1015_v3  ;;  %v7102_v16 = vand.u32 4294901760, %v4601_v4 }
  0x39   : > { %432 = vmatprep.subr.mxu0 %v7122_v33  ;;  %7430 = vst [vmem:[#allocation6_spill] sm:$0xff] %v4621_v15  ;;  %v4625_v17 = vsub.f32 %v395_v53, %v4584_v62  ;;  %v4629_v18 = vand.u32 4294901760, %v392_v11  ;;  %v1023_v20 = vand.u32 4294901760, %v1022_v9  ;;  %v1036_v21 = vsub.f32 %v4588_v0, %v7104_v10  ;;  %v412_v10 = vld [vmem:[%s4532_s5 + $0xc0] sm:$0xff] }
  0x3a   : > { %434 = vmatpush1.msra.mxu0 %v4549_v45  ;;  %1003 = vmatpush1.msra.mxu1 %v1002_v7  ;;  %v7101_v22 = vand.u32 4294901760, %v4618_v13  ;;  %v4639_v24 = vsub.f32 %v394_v60, %v4604_v5  ;;  %v1030_v25 = vand.u32 4294901760, %v1029_v12  ;;  %v1043_v26 = vsub.f32 %v4601_v4, %v7102_v16  ;;  %v419_v60 = vld [vmem:[%s4532_s5 + $0xf8] sm:$0xff] }
  0x3b   : > { %7431 = vst [vmem:[#allocation7_spill] sm:$0xff] %v4625_v17  ;;  %435 = vmatprep.subr.mxu0 %v7122_v33  ;;  %1004 = vmatprep.subr.mxu1 %v7122_v33  ;;  %7432 = vst [vmem:[#allocation8_spill] sm:$0xff] %v4629_v18  ;;  %v4647_v27 = vand.u32 4294901760, %v391_v19  ;;  %v7099_v28 = vand.u32 4294901760, %v4625_v17  ;;  %v4652_v30 = vsub.f32 %v393_v6, %v4621_v15  ;;  %v4656_v31 = vand.u32 4294901760, %v390_v23 }
  0x3c   : > { %437 = vmatpush1.msra.mxu0 %v4551_v46  ;;  %1010 = vmatpush1.msra.mxu1 %v1009_v8  ;;  %v1037_v35 = vand.u32 4294901760, %v1036_v21  ;;  %v1050_v36 = vsub.f32 %v4618_v13, %v7101_v22  ;;  %v7098_v37 = vand.u32 4294901760, %v4639_v24  ;;  %v4665_v42 = vsub.f32 %v392_v11, %v4629_v18  ;;  %v418_v8 = vld [vmem:[%s4532_s5 + $0xf0] sm:$0xff]  ;;  %v413_v22 = vld [vmem:[%s4532_s5 + $0xc8] sm:$0xff] }
  0x3d   : > { %438 = vmatprep.subr.mxu0 %v7122_v33  ;;  %1011 = vmatprep.subr.mxu1 %v7122_v33  ;;  %7433 = vst [vmem:[#allocation9_spill] sm:$0xff] %v4647_v27  ;;  %7434 = vst [vmem:[#allocation10_spill] sm:$0xff] %v4656_v31  ;;  %v4669_v43 = vand.u32 4294901760, %v389_v29  ;;  %v1044_v47 = vand.u32 4294901760, %v1043_v26  ;;  %v1057_v48 = vsub.f32 %v4625_v17, %v7099_v28  ;;  %v7096_v53 = vand.u32 4294901760, %v4652_v30 }
  0x3e   : > { %440 = vmatpush1.msra.mxu0 %v4562_v51  ;;  %1017 = vmatpush1.msra.mxu1 %v1016_v14  ;;  %v4678_v1 = vsub.f32 %v391_v19, %v4647_v27  ;;  %v4682_v2 = vand.u32 4294901760, %v388_v41  ;;  %v1051_v3 = vand.u32 4294901760, %v1050_v36  ;;  %v1064_v6 = vsub.f32 %v4639_v24, %v7098_v37  ;;  %v416_v36 = vld [vmem:[%s4532_s5 + $0xe0] sm:$0xff]  ;;  %v414_v37 = vld [vmem:[%s4532_s5 + $0xd0] sm:$0xff] }
  0x3f   : > { %441 = vmatprep.subr.mxu0 %v7122_v33  ;;  %1018 = vmatprep.subr.mxu1 %v7122_v33  ;;  %7435 = vst [vmem:[#allocation11_spill] sm:$0xff] %v4669_v43  ;;  %v7095_v7 = vand.u32 4294901760, %v4665_v42  ;;  %v4691_v9 = vsub.f32 %v390_v23, %v4656_v31  ;;  %v4695_v11 = vand.u32 4294901760, %v419_v60  ;;  %v1058_v12 = vand.u32 4294901760, %v1057_v48 }
  0x40   : > { %443 = vmatpush1.msra.mxu0 %v4579_v59  ;;  %1024 = vmatpush1.msra.mxu1 %v1023_v20  ;;  %7436 = vst [vmem:[#allocation12_spill] sm:$0xff] %v4678_v1  ;;  %7437 = vst [vmem:[#allocation13_spill] sm:$0xff] %v4682_v2  ;;  %v1071_v14 = vsub.f32 %v4652_v30, %v7096_v53  ;;  %v7097_v19 = vand.u32 4294901760, %v4678_v1  ;;  %v417_v20 = vld [vmem:[%s4532_s5 + $0xe8] sm:$0xff]  ;;  %v4704_v21 = vsub.f32 %v389_v29, %v4669_v43 }
  0x41   : > { %444 = vmatprep.subr.mxu0 %v7122_v33  ;;  %1025 = vmatprep.subr.mxu1 %v7122_v33  ;;  %7438 = vst [vmem:[#allocation14_spill] sm:$0xff] %v4691_v9  ;;  %7439 = vst [vmem:[#allocation15_spill] sm:$0xff] %v4695_v11  ;;  %v4708_v23 = vand.u32 4294901760, %v418_v8  ;;  %v1078_v26 = vsub.f32 %v4665_v42, %v7095_v7  ;;  %v4717_v29 = vsub.f32 %v388_v41, %v4682_v2  ;;  %v415_v7 = vld [vmem:[%s4532_s5 + $0xd8] sm:$0xff] }
  0x42   : > { %446 = vmatpush1.msra.mxu0 %v4584_v62  ;;  %1031 = vmatpush1.msra.mxu1 %v1030_v25  ;;  %7440 = vst [vmem:[#allocation16_spill] sm:$0xff] %v4704_v21  ;;  %v1065_v25 = vand.u32 4294901760, %v1064_v6  ;;  %v1072_v48 = vand.u32 4294901760, %v1071_v14  ;;  %v7103_v6 = vand.u32 4294901760, %v4704_v21  ;;  %v4730_v41 = vsub.f32 %v419_v60, %v4695_v11 }
  0x43   : > { %447 = vmatprep.subr.mxu0 %v7122_v33  ;;  %1032 = vmatprep.subr.mxu1 %v7122_v33  ;;  %7441 = vst [vmem:[#allocation17_spill] sm:$0xff] %v4708_v23  ;;  %7442 = vst [vmem:[#allocation18_spill] sm:$0xff] %v4717_v29  ;;  %v4734_v53 = vand.u32 4294901760, %v416_v36  ;;  %v4743_v60 = vsub.f32 %v418_v8, %v4708_v23  ;;  %v4747_v28 = vand.u32 4294901760, %v415_v7  ;;  %v4760_v16 = vand.u32 4294901760, %v414_v37 }
  0x44   : > { %449 = vmatpush1.msra.mxu0 %v4604_v5  ;;  %1038 = vmatpush1.msra.mxu1 %v1037_v35  ;;  %v7100_v35 = vand.u32 4294901760, %v4691_v9  ;;  %7444 = vst [vmem:[#allocation20_spill] sm:$0xff] %v4730_v41  ;;  %v4773_v63 = vand.u32 4294901760, %v413_v22  ;;  %v4786_v58 = vand.u32 4294901760, %v412_v10  ;;  %v4799_v56 = vand.u32 4294901760, %v411_v61 }
  0x45   : > { %450 = vmatprep.subr.mxu0 %v7122_v33  ;;  %1039 = vmatprep.subr.mxu1 %v7122_v33  ;;  %7445 = vst [vmem:[#allocation21_spill] sm:$0xff] %v4734_v53  ;;  %7446 = vst [vmem:[#allocation22_spill] sm:$0xff] %v4743_v60 }
  0x46   : > { %452 = vmatpush1.msra.mxu0 %v4621_v15  ;;  %1045 = vmatpush1.msra.mxu1 %v1044_v47  ;;  %v4721_v47 = vand.u32 4294901760, %v417_v20  ;;  %v1092_v14 = vsub.f32 %v4691_v9, %v7100_v35  ;;  %7447 = vst [vmem:[#allocation23_spill] sm:$0xff] %v4747_v28  ;;  %v7109_v35 = vand.u32 4294901760, %v4730_v41  ;;  %7449 = vst [vmem:[#allocation25_spill] sm:$0xff] %v4760_v16 }
  0x47   : > { %453 = vmatprep.subr.mxu0 %v7122_v33  ;;  %1046 = vmatprep.subr.mxu1 %v7122_v33  ;;  %7451 = vst [vmem:[#allocation27_spill] sm:$0xff] %v4773_v63  ;;  %7453 = vst [vmem:[#allocation29_spill] sm:$0xff] %v4786_v58 }
  0x48   : > { %455 = vmatpush1.msra.mxu0 %v4629_v18  ;;  %1052 = vmatpush1.msra.mxu1 %v1051_v3  ;;  %7443 = vst [vmem:[#allocation19_spill] sm:$0xff] %v4721_v47  ;;  %v1085_v3 = vsub.f32 %v4678_v1, %v7097_v19  ;;  %v7106_v19 = vand.u32 4294901760, %v4717_v29  ;;  %v4756_v8 = vsub.f32 %v417_v20, %v4721_v47  ;;  %7455 = vst [vmem:[#allocation31_spill] sm:$0xff] %v4799_v56 }
  0x49   : > { %456 = vmatprep.subr.mxu0 %v7122_v33  ;;  %1053 = vmatprep.subr.mxu1 %v7122_v33  ;;  %v4769_v20 = vsub.f32 %v416_v36, %v4734_v53  ;;  %v4782_v36 = vsub.f32 %v415_v7, %v4747_v28  ;;  %v4795_v7 = vsub.f32 %v414_v37, %v4760_v16 }
  0x4a   : > { %458 = vmatpush1.msra.mxu0 %v4647_v27  ;;  %1059 = vmatpush1.msra.mxu1 %v1058_v12  ;;  %v1079_v12 = vand.u32 4294901760, %v1078_v26  ;;  %v1099_v26 = vsub.f32 %v4704_v21, %v7103_v6  ;;  %7448 = vst [vmem:[#allocation24_spill] sm:$0xff] %v4756_v8  ;;  %v7112_v6 = vand.u32 4294901760, %v4743_v60  ;;  %v4808_v37 = vsub.f32 %v413_v22, %v4773_v63  ;;  %v324_v22 = vld [vmem:[%s7092_s1] sm:$0xff] }
  0x4b   : > { %459 = vmatprep.subr.mxu0 %v7122_v33  ;;  %1060 = vmatprep.subr.mxu1 %v7122_v33  ;;  %7450 = vst [vmem:[#allocation26_spill] sm:$0xff] %v4769_v20  ;;  %7452 = vst [vmem:[#allocation28_spill] sm:$0xff] %v4782_v36 }
  0x4c   : > { %461 = vmatpush1.msra.mxu0 %v4656_v31  ;;  %1066 = vmatpush1.msra.mxu1 %v1065_v25  ;;  %v1086_v25 = vand.u32 4294901760, %v1085_v3  ;;  %v1106_v3 = vsub.f32 %v4717_v29, %v7106_v19  ;;  %v7115_v19 = vand.u32 4294901760, %v4756_v8  ;;  %7454 = vst [vmem:[#allocation30_spill] sm:$0xff] %v4795_v7  ;;  %7456 = vst [vmem:[#allocation32_spill] sm:$0xff] %v4808_v37 }
  0x4d   : > { %462 = vmatprep.subr.mxu0 %v7122_v33  ;;  %1067 = vmatprep.subr.mxu1 %v7122_v33 }
  0x4e   : > { %464 = vmatpush1.msra.mxu0 %v4669_v43  ;;  %1073 = vmatpush1.msra.mxu1 %v1072_v48  ;;  %v1093_v48 = vand.u32 4294901760, %v1092_v14  ;;  %v1113_v14 = vsub.f32 %v4730_v41, %v7109_v35  ;;  %v409_v35 = vld [vmem:[%s4532_s5 + $0xa8] sm:$0xff] }
  0x4f   : > { %465 = vmatprep.subr.mxu0 %v7122_v33  ;;  %1074 = vmatprep.subr.mxu1 %v7122_v33 }
  0x50   : > { %467 = vmatpush1.msra.mxu0 %v4682_v2  ;;  %1080 = vmatpush1.msra.mxu1 %v1079_v12  ;;  %v1100_v12 = vand.u32 4294901760, %v1099_v26  ;;  %v1120_v26 = vsub.f32 %v4743_v60, %v7112_v6  ;;  %v4849_v6 = vand.u32 4294901760, %v324_v22  ;;  %v4876_v60 = vsub.f32 %v4523_v32, %v4530_v34 }
  0x51   : > { %468 = vmatprep.subr.mxu0 %v7122_v33  ;;  %1081 = vmatprep.subr.mxu1 %v7122_v33 }
  0x52   : > { %470 = vmatpush2.msra.mxu0 %v4695_v11  ;;  %1087 = vmatpush1.msra.mxu1 %v1086_v25  ;;  %v1107_v25 = vand.u32 4294901760, %v1106_v3  ;;  %v1127_v3 = vsub.f32 %v4756_v8, %v7115_v19  ;;  %v4836_v11 = vsub.f32 %v411_v61, %v4799_v56  ;;  %7465 = vst [vmem:[#allocation38_spill] sm:$0xff] %v4849_v6  ;;  %v407_v8 = vld [vmem:[%s4532_s5 + $0x98] sm:$0xff]  ;;  %7472 = vst [vmem:[#allocation43_spill] sm:$0xff] %v4876_v60 }
  0x53   : > { %471 = vmatprep.subr.mxu0 %v7122_v33  ;;  %1088 = vmatprep.subr.mxu1 %v7122_v33 }
  0x54   : > { %473 = vmatpush2.msra.mxu0 %v4708_v23  ;;  %1094 = vmatpush1.msra.mxu1 %v1093_v48  ;;  %v1114_v48 = vand.u32 4294901760, %v1113_v14  ;;  %v4812_v23 = vand.u32 4294901760, %v410_v57  ;;  %v7458_v14 = vand.u32 4294901760, %v4769_v20  ;;  %7462 = vst [vmem:[#allocation36_spill] sm:$0xff] %v4836_v11 }
  0x55   : > { %474 = vmatprep.subr.mxu0 %v7122_v33  ;;  %1095 = vmatprep.subr.mxu1 %v7122_v33 }
  0x56   : > { %476 = vmatpush2.msra.mxu0 %v4721_v47  ;;  %1101 = vmatpush1.msra.mxu1 %v1100_v12  ;;  %7457 = vst [vmem:[#allocation33_spill] sm:$0xff] %v4812_v23  ;;  %v1121_v12 = vand.u32 4294901760, %v1120_v26  ;;  %v1134_v19 = vsub.f32 %v4769_v20, %v7458_v14  ;;  %v4820_v47 = vsub.f32 %v412_v10, %v4786_v58  ;;  %v1128_v26 = vand.u32 4294901760, %v1127_v3 }
  0x57   : > { %477 = vmatprep.subr.mxu0 %v7122_v33  ;;  %1102 = vmatprep.subr.mxu1 %v7122_v33  ;;  %v7461_v14 = vand.u32 4294901760, %v4782_v36  ;;  %v7463_v3 = vmov 0.0  }
  0x58   : > { %479 = vmatpush2.msra.mxu0 %v4734_v53  ;;  %1108 = vmatpush1.msra.mxu1 %v1107_v25  ;;  %7459 = vst [vmem:[#allocation34_spill] sm:$0xff] %v4820_v47  ;;  %v4827_v53 = vand.u32 4294901760, %v409_v35  ;;  %v408_v25 = vld [vmem:[%s4532_s5 + $0xa0] sm:$0xff]  ;;  %v1135_v61 = vand.u32 4294901760, %v1134_v19 }
  0x59   : > { %480 = vmatprep.subr.mxu0 %v7122_v33  ;;  %1109 = vmatprep.subr.mxu1 %v7122_v33  ;;  %v1141_v10 = vsub.f32 %v4782_v36, %v7461_v14  ;;  %v327_v33 = vld [vmem:[%s7092_s1 + $0x18] sm:$0xff]  ;;  %v4847_v14 = vsub.f32 %v410_v57, %v4812_v23  ;;  %v4855_v20 = vand.u32 4294901760, %v408_v25  ;;  %v406_v57 = vld [vmem:[%s4532_s5 + $0x90] sm:$0xff] }
  0x5a   : > { %7460 = vst [vmem:[#allocation35_spill] sm:$0xff] %v4827_v53  ;;  %482 = vmatpush2.msra.mxu0 %v4747_v28  ;;  %1115 = vmatpush2.msra.mxu1 %v1114_v48  ;;  %v326_v48 = vld [vmem:[%s7092_s1 + $0x10] sm:$0xff]  ;;  %v7466_v28 = vand.u32 4294901760, %v4795_v7  ;;  %v4863_v43 = vsub.f32 %v409_v35, %v4827_v53  ;;  %v329_v35 = vld [vmem:[%s7092_s1 + $0x28] sm:$0xff] }
  0x5b   : > { %483 = vmatprep.subr.mxu0 %v7463_v3  ;;  %1116 = vmatprep.subr.mxu1 %v7463_v3  ;;  %7464 = vst [vmem:[#allocation37_spill] sm:$0xff] %v4847_v14  ;;  %7467 = vst [vmem:[#allocation39_spill] sm:$0xff] %v4855_v20  ;;  %v4867_v19 = vand.u32 4294901760, %v326_v48  ;;  %v4897_v31 = vsub.f32 %v408_v25, %v4855_v20 }
  0x5c   : > { %485 = vmatpush2.msra.mxu0 %v4760_v16  ;;  %1122 = vmatpush2.msra.mxu1 %v1121_v12  ;;  %v1148_v36 = vsub.f32 %v4795_v7, %v7466_v28  ;;  %7468 = vst [vmem:[#allocation40_spill] sm:$0xff] %v4863_v43  ;;  %v4865_v16 = vand.u32 4294901760, %v327_v33  ;;  %v1142_v28 = vand.u32 4294901760, %v1141_v10  ;;  %v7471_v12 = vand.u32 4294901760, %v4808_v37  ;;  %v404_v10 = vld [vmem:[%s4532_s5 + $0x80] sm:$0xff] }
  0x5d   : > { %486 = vmatprep.subr.mxu0 %v7463_v3  ;;  %1123 = vmatprep.subr.mxu1 %v7463_v3  ;;  %7470 = vst [vmem:[#allocation42_spill] sm:$0xff] %v4867_v19  ;;  %v7475_v7 = vand.u32 4294901760, %v4820_v47  ;;  %7477 = vst [vmem:[#allocation47_spill] sm:$0xff] %v4897_v31  ;;  %v4914_v41 = vsub.f32 %v326_v48, %v4867_v19  ;;  %v331_v48 = vld [vmem:[%s7092_s1 + $0x38] sm:$0xff] }
  0x5e   : > { %7469 = vst [vmem:[#allocation41_spill] sm:$0xff] %v4865_v16  ;;  %488 = vmatpush2.msra.mxu0 %v4773_v63  ;;  %1129 = vmatpush2.msra.mxu1 %v1128_v26  ;;  %v1155_v2 = vsub.f32 %v4808_v37, %v7471_v12  ;;  %v4883_v26 = vand.u32 4294901760, %v407_v8  ;;  %v4887_v12 = vsub.f32 %v324_v22, %v4849_v6  ;;  %v1149_v32 = vand.u32 4294901760, %v1148_v36  ;;  %v405_v37 = vld [vmem:[%s4532_s5 + $0x88] sm:$0xff] }
  0x5f   : > { %489 = vmatprep.subr.mxu0 %v7463_v3  ;;  %1130 = vmatprep.subr.mxu1 %v7463_v3  ;;  %v1162_v34 = vsub.f32 %v4820_v47, %v7475_v7  ;;  %v4893_v63 = vand.u32 4294901760, %v406_v57  ;;  %v4906_v36 = vand.u32 4294901760, %v329_v35  ;;  %7481 = vst [vmem:[#allocation50_spill] sm:$0xff] %v4914_v41  ;;  %v4924_v22 = vand.u32 4294901760, %v405_v37 }
  0x60   : > { %7473 = vst [vmem:[#allocation44_spill] sm:$0xff] %v4883_v26  ;;  %7474 = vst [vmem:[#allocation45_spill] sm:$0xff] %v4887_v12  ;;  %491 = vmatpush2.msra.mxu0 %v4786_v58  ;;  %1136 = vmatpush2.msra.mxu1 %v1135_v61  ;;  %v4904_v61 = vsub.f32 %v327_v33, %v4865_v16  ;;  %v1156_v7 = vand.u32 4294901760, %v1155_v2  ;;  %v7480_v58 = vand.u32 4294901760, %v4836_v11  ;;  %v328_v33 = vld [vmem:[%s7092_s1 + $0x20] sm:$0xff]  ;;  %v4955_v29 = vand.u32 4294901760, %v331_v48 }
  0x61   : > { %7476 = vst [vmem:[#allocation46_spill] sm:$0xff] %v4893_v63  ;;  %492 = vmatprep.subr.mxu0 %v7463_v3  ;;  %1137 = vmatprep.subr.mxu1 %v7463_v3  ;;  %7479 = vst [vmem:[#allocation49_spill] sm:$0xff] %v4906_v36  ;;  %v4928_v47 = vsub.f32 %v407_v8, %v4883_v26  ;;  %v7485_v8 = vand.u32 4294901760, %v4863_v43  ;;  %v7500_v21 = vand.u32 4294901760, %v4914_v41 }
  0x62   : > { %7478 = vst [vmem:[#allocation48_spill] sm:$0xff] %v4904_v61  ;;  %494 = vmatpush2.msra.mxu0 %v4799_v56  ;;  %1143 = vmatpush2.msra.mxu1 %v1142_v28  ;;  %v1169_v25 = vsub.f32 %v4836_v11, %v7480_v58  ;;  %v7482_v28 = vand.u32 4294901760, %v4847_v14  ;;  %7483 = vst [vmem:[#allocation51_spill] sm:$0xff] %v4924_v22  ;;  %v1163_v56 = vand.u32 4294901760, %v1162_v34  ;;  %v4934_v11 = vand.u32 4294901760, %v404_v10 }
  0x63   : > { %495 = vmatprep.subr.mxu0 %v7463_v3  ;;  %1144 = vmatprep.subr.mxu1 %v7463_v3  ;;  %v1183_v58 = vsub.f32 %v4863_v43, %v7485_v8  ;;  %7489 = vst [vmem:[#allocation55_spill] sm:$0xff] %v4955_v29  ;;  %v330_v8 = vld [vmem:[%s7092_s1 + $0x30] sm:$0xff]  ;;  %v4994_v43 = vsub.f32 %v331_v48, %v4955_v29 }
  0x64   : > { %v1176_v2 = vsub.f32 %v4847_v14, %v7482_v28  ;;  %497 = vmatpush2.msra.mxu0 %v4812_v23  ;;  %1150 = vmatpush2.msra.mxu1 %v1149_v32  ;;  %v4938_v28 = vsub.f32 %v406_v57, %v4893_v63  ;;  %v4946_v14 = vsub.f32 %v329_v35, %v4906_v36  ;;  %v4948_v32 = vand.u32 4294901760, %v328_v33  ;;  %v333_v23 = vld [vmem:[%s7092_s1 + $0x48] sm:$0xff] }
  0x65   : > { %498 = vmatprep.subr.mxu0 %v7463_v3  ;;  %1151 = vmatprep.subr.mxu1 %v7463_v3  ;;  %v1170_v34 = vand.u32 4294901760, %v1169_v25  ;;  %v7488_v57 = vand.u32 4294901760, %v4876_v60  ;;  %7496 = vst [vmem:[#allocation59_spill] sm:$0xff] %v4994_v43  ;;  %v540_v15 = vsub.f32 %v4914_v41, %v7500_v21 }
  0x66   : > { %7484 = vst [vmem:[#allocation52_spill] sm:$0xff] %v4938_v28  ;;  %7486 = vst [vmem:[#allocation53_spill] sm:$0xff] %v4946_v14  ;;  %500 = vmatpush2.msra.mxu0 %v4827_v53  ;;  %1157 = vmatpush2.msra.mxu1 %v1156_v7  ;;  %v1177_v35 = vand.u32 4294901760, %v1176_v2  ;;  %v7490_v7 = vand.u32 4294901760, %v4887_v12  ;;  %v4979_v53 = vsub.f32 %v404_v10, %v4934_v11  ;;  %v7498_v10 = vand.u32 4294901760, %v4928_v47 }
  0x67   : > { %7487 = vst [vmem:[#allocation54_spill] sm:$0xff] %v4948_v32  ;;  %v519_v27 = vsub.f32 %v4876_v60, %v7488_v57  ;;  %501 = vmatprep.subr.mxu0 %v7463_v3  ;;  %1158 = vmatprep.subr.mxu1 %v7463_v3  ;;  %v4967_v57 = vsub.f32 %v405_v37, %v4924_v22  ;;  %v7492_v60 = vand.u32 4294901760, %v4897_v31  ;;  %v1184_v37 = vand.u32 4294901760, %v1183_v58  ;;  %v335_v58 = vld [vmem:[%s7092_s1 + $0x58] sm:$0xff] }
  0x68   : > { %v525_v25 = vsub.f32 %v4887_v12, %v7490_v7  ;;  %503 = vmatpush2.msra.mxu0 %v4855_v20  ;;  %1164 = vmatpush2.msra.mxu1 %v1163_v56  ;;  %v4984_v12 = vsub.f32 %v328_v33, %v4948_v32  ;;  %v4986_v56 = vand.u32 4294901760, %v330_v8  ;;  %v4996_v20 = vand.u32 4294901760, %v333_v23  ;;  %v332_v33 = vld [vmem:[%s7092_s1 + $0x40] sm:$0xff] }
  0x69   : > { %7491 = vst [vmem:[#allocation56_spill] sm:$0xff] %v4967_v57  ;;  %v1190_v2 = vsub.f32 %v4897_v31, %v7492_v60  ;;  %504 = vmatprep.subr.mxu0 %v7463_v3  ;;  %1165 = vmatprep.subr.mxu1 %v7463_v3  ;;  %v7495_v60 = vand.u32 4294901760, %v4904_v61  ;;  %v1197_v48 = vsub.f32 %v4928_v47, %v7498_v10  ;;  %v7499_v31 = vand.u32 4294901760, %v4938_v28 }
  0x6a   : > { %7493 = vst [vmem:[#allocation57_spill] sm:$0xff] %v4984_v12  ;;  %7494 = vst [vmem:[#allocation58_spill] sm:$0xff] %v4986_v56  ;;  %506 = vmatpush2.msra.mxu0 %v4883_v26  ;;  %1171 = vmatpush2.msra.mxu1 %v1170_v34  ;;  %v520_v34 = vand.u32 4294901760, %v519_v27  ;;  %v5022_v10 = vsub.f32 %v330_v8, %v4986_v56  ;;  %v7503_v27 = vand.u32 4294901760, %v4946_v14 }
  0x6b   : > { %v534_v7 = vsub.f32 %v4904_v61, %v7495_v60  ;;  %7497 = vst [vmem:[#allocation60_spill] sm:$0xff] %v4996_v20  ;;  %507 = vmatprep.subr.mxu0 %v7463_v3  ;;  %1172 = vmatprep.subr.mxu1 %v7463_v3  ;;  %v526_v60 = vand.u32 4294901760, %v525_v25  ;;  %v1191_v26 = vand.u32 4294901760, %v1190_v2  ;;  %v1204_v18 = vsub.f32 %v4938_v28, %v7499_v31  ;;  %v334_v31 = vld [vmem:[%s7092_s1 + $0x50] sm:$0xff] }
  0x6c   : > { %509 = vmatpush2.msra.mxu0 %v4893_v63  ;;  %1178 = vmatpush2.msra.mxu1 %v1177_v35  ;;  %v5024_v35 = vand.u32 4294901760, %v332_v33  ;;  %v5026_v2 = vand.u32 4294901760, %v335_v58  ;;  %v549_v61 = vsub.f32 %v4946_v14, %v7503_v27  ;;  %v5037_v8 = vsub.f32 %v333_v23, %v4996_v20 }
  0x6d   : > { %510 = vmatprep.subr.mxu0 %v7463_v3  ;;  %1179 = vmatprep.subr.mxu1 %v7463_v3  ;;  %v535_v21 = vand.u32 4294901760, %v534_v7  ;;  %v1198_v41 = vand.u32 4294901760, %v1197_v48  ;;  %v7505_v63 = vand.u32 4294901760, %v4967_v57  ;;  %v337_v7 = vld [vmem:[%s7092_s1 + $0x68] sm:$0xff]  ;;  %v541_v27 = vand.u32 4294901760, %v540_v15  ;;  %v336_v15 = vld [vmem:[%s7092_s1 + $0x60] sm:$0xff] }
  0x6e   : > { %7501 = vst [vmem:[#allocation61_spill] sm:$0xff] %v5024_v35  ;;  %7502 = vst [vmem:[#allocation62_spill] sm:$0xff] %v5026_v2  ;;  %512 = vmatpush2.msra.mxu0 %v4924_v22  ;;  %1185 = vmatpush2.msra.mxu1 %v1184_v37  ;;  %v1205_v37 = vand.u32 4294901760, %v1204_v18  ;;  %v7506_v23 = vand.u32 4294901760, %v4979_v53  ;;  %v5051_v14 = vand.u32 4294901760, %v334_v31  ;;  %v7508_v48 = vand.u32 4294901760, %v4984_v12 }
  0x6f   : > { %7504 = vst [vmem:[#allocation63_spill] sm:$0xff] %v5037_v8  ;;  %513 = vmatprep.subr.mxu0 %v7463_v3  ;;  %1186 = vmatprep.subr.mxu1 %v7463_v3  ;;  %v1211_v22 = vsub.f32 %v4967_v57, %v7505_v63  ;;  %v5058_v28 = vsub.f32 %v332_v33, %v5024_v35  ;;  %v5081_v57 = vand.u32 4294901760, %v336_v15 }
  0x70   : > { %515 = vmatpush2.msra.mxu0 %v4934_v11  ;;  %521 = vmatprep.mubr.f32.mxu0 %v520_v34  ;;  %v1218_v25 = vsub.f32 %v4979_v53, %v7506_v23  ;;  %7507 = vst [vmem:[#allocation64_spill] sm:$0xff] %v5051_v14  ;;  %v555_v63 = vsub.f32 %v4984_v12, %v7508_v48  ;;  %v7510_v34 = vand.u32 4294901760, %v4994_v43  ;;  %v5071_v48 = vand.u32 4294901760, %v337_v7 }
  0x71   : > { %1192 = vmatpush2.msra.mxu1 %v1191_v26  ;;  %527 = vmatmul.mubr.f32.vlgmr.msra.gmra.mxu0 %v526_v60  ;;  %v5061_v18 = vsub.f32 %v335_v58, %v5026_v2  ;;  %v550_v26 = vand.u32 4294901760, %v549_v61  ;;  %v1212_v33 = vand.u32 4294901760, %v1211_v22  ;;  %v339_v58 = vld [vmem:[%s7092_s1 + $0x78] sm:$0xff]  ;;  %v5079_v61 = vsub.f32 %v334_v31, %v5051_v14  ;;  %7513 = vst [vmem:[#allocation68_spill] sm:$0xff] %v5081_v57 }
  0x72   : > { %1193 = vmatprep.subr.mxu1 %v7463_v3  ;;  %536 = vmatprep.mubr.f32.mxu0 %v535_v21  ;;  %v564_v60 = vsub.f32 %v4994_v43, %v7510_v34  ;;  %7511 = vst [vmem:[#allocation66_spill] sm:$0xff] %v5071_v48  ;;  %v1219_v21 = vand.u32 4294901760, %v1218_v25  ;;  %v7514_v22 = vand.u32 4294901760, %v5022_v10  ;;  %v7209_v23 = vand.u32 4294901760, %v5058_v28 }
  0x73   : > { %7509 = vst [vmem:[#allocation65_spill] sm:$0xff] %v5061_v18  ;;  %1199 = vmatpush2.msra.mxu1 %v1198_v41  ;;  %1446 = vmatprep.subr.mxu0 %v7463_v3  ;;  %7512 = vst [vmem:[#allocation67_spill] sm:$0xff] %v5079_v61  ;;  %v556_v41 = vand.u32 4294901760, %v555_v63  ;;  %v7208_v43 = vand.u32 4294901760, %v5061_v18  ;;  %v7515_v31 = vand.u32 4294901760, %v5037_v8  ;;  %v338_v63 = vld [vmem:[%s7092_s1 + $0x70] sm:$0xff] }
  0x74   : > { %1200 = vmatprep.subr.mxu1 %v7463_v3  ;;  %1449 = vmatpush1.msra.mxu0 %v4557_v49  ;;  %v570_v34 = vsub.f32 %v5022_v10, %v7514_v22  ;;  %v565_v25 = vand.u32 4294901760, %v564_v60  ;;  %v341_v22 = vld [vmem:[%s7092_s1 + $0x88] sm:$0xff] }
  0x75   : > { %1206 = vmatpush2.msra.mxu1 %v1205_v37  ;;  %542 = vmatmul.mubr.f32.gmra.mxu0 %v541_v27  ;;  %v579_v12 = vsub.f32 %v5037_v8, %v7515_v31  ;;  %v5094_v37 = vsub.f32 %v337_v7, %v5071_v48  ;;  %v5096_v27 = vand.u32 4294901760, %v339_v58  ;;  %v5108_v7 = vsub.f32 %v336_v15, %v5081_v57 }
  0x76   : > { %1207 = vmatprep.subr.mxu1 %v7463_v3  ;;  %551 = vmatprep.mubr.f32.mxu0 %v550_v26  ;;  %v571_v60 = vand.u32 4294901760, %v570_v34  ;;  %v594_v31 = vsub.f32 %v5061_v18, %v7208_v43  ;;  %v5117_v8 = vand.u32 4294901760, %v338_v63  ;;  %v340_v34 = vld [vmem:[%s7092_s1 + $0x80] sm:$0xff]  ;;  %v343_v43 = vld [vmem:[%s7092_s1 + $0x98] sm:$0xff]  ;;  %v342_v18 = vld [vmem:[%s7092_s1 + $0x90] sm:$0xff] }
  0x77   : > { %7516 = vst [vmem:[#allocation69_spill] sm:$0xff] %v5094_v37  ;;  %7517 = vst [vmem:[#allocation70_spill] sm:$0xff] %v5096_v27  ;;  %1213 = vmatpush2.msra.mxu1 %v1212_v33  ;;  %1450 = vmatprep.subr.mxu0 %v7463_v3  ;;  %v585_v33 = vsub.f32 %v5058_v28, %v7209_v23  ;;  %v580_v15 = vand.u32 4294901760, %v579_v12  ;;  %v7522_v12 = vand.u32 4294901760, %v5079_v61 }
  0x78   : > { %1214 = vmatprep.subr.mxu1 %v7463_v3  ;;  %7518 = vst [vmem:[#allocation71_spill] sm:$0xff] %v5108_v7  ;;  %1453 = vmatpush1.msra.mxu0 %v4560_v50  ;;  %7519 = vst [vmem:[#allocation72_spill] sm:$0xff] %v5117_v8  ;;  %v5141_v26 = vsub.f32 %v338_v63, %v5117_v8 }
  0x79   : > { %1220 = vmatpush2.msra.mxu1 %v1219_v21  ;;  %557 = vmatmul.mubr.f32.gmra.mxu0 %v556_v41  ;;  %v5122_v21 = vsub.f32 %v339_v58, %v5096_v27  ;;  %v5124_v41 = vand.u32 4294901760, %v341_v22  ;;  %v586_v23 = vand.u32 4294901760, %v585_v33 }
  0x7a   : > { %1224 = vmatmul.mubr.f32.vlgmr.msra.gmra.mxu1 %v4849_v6  ;;  %566 = vmatprep.mubr.f32.mxu0 %v565_v25  ;;  %v600_v25 = vsub.f32 %v5079_v61, %v7522_v12  ;;  %v5143_v6 = vand.u32 4294901760, %v340_v34  ;;  %v595_v12 = vand.u32 4294901760, %v594_v31  ;;  %v345_v61 = vld [vmem:[%s7092_s1 + $0xa8] sm:$0xff]  ;;  %v7528_v31 = vand.u32 4294901760, %v5108_v7 }
  0x7b   : > { %7520 = vst [vmem:[#allocation73_spill] sm:$0xff] %v5122_v21  ;;  %7521 = vst [vmem:[#allocation74_spill] sm:$0xff] %v5124_v41  ;;  %1229 = vmatprep.mubr.f32.mxu1 %v4865_v16  ;;  %1454 = vmatprep.subr.mxu0 %v7463_v3  ;;  %v5145_v16 = vand.u32 4294901760, %v343_v43  ;;  %v5157_v58 = vsub.f32 %v341_v22, %v5124_v41 }
  0x7c   : > { %1457 = vmatpush1.msra.mxu0 %v4565_v52  ;;  %1863 = vmatprep.subr.mxu1 %v7463_v3  ;;  %7523 = vst [vmem:[#allocation75_spill] sm:$0xff] %v5143_v6  ;;  %v615_v22 = vsub.f32 %v5108_v7, %v7528_v31  ;;  %v5173_v63 = vsub.f32 %v340_v34, %v5143_v6  ;;  %v7531_v31 = vand.u32 4294901760, %v5122_v21  ;;  %v5187_v7 = vand.u32 4294901760, %v345_v61 }
  0x7d   : > { %572 = vmatmul.mubr.f32.gmra.mxu0 %v571_v60  ;;  %7524 = vst [vmem:[#allocation76_spill] sm:$0xff] %v5145_v16  ;;  %1458 = vmatprep.subr.mxu0 %v7463_v3  ;;  %v7525_v60 = vand.u32 4294901760, %v5094_v37  ;;  %7526 = vst [vmem:[#allocation77_spill] sm:$0xff] %v5157_v58 }
  0x7e   : > { %1231 = vmatmul.mubr.f32.gmra.mxu1 %v4867_v19  ;;  %581 = vmatprep.mubr.f32.mxu0 %v580_v15  ;;  %v601_v19 = vand.u32 4294901760, %v600_v25  ;;  %v5164_v15 = vand.u32 4294901760, %v342_v18  ;;  %7529 = vst [vmem:[#allocation79_spill] sm:$0xff] %v5173_v63  ;;  %v344_v25 = vld [vmem:[%s7092_s1 + $0xa0] sm:$0xff]  ;;  %7532 = vst [vmem:[#allocation81_spill] sm:$0xff] %v5187_v7 }
  0x7f   : > { %v609_v33 = vsub.f32 %v5094_v37, %v7525_v60  ;;  %1236 = vmatprep.mubr.f32.mxu1 %v4906_v36  ;;  %1461 = vmatpush1.msra.mxu0 %v4570_v54  ;;  %v5176_v36 = vsub.f32 %v343_v43, %v5145_v16  ;;  %v624_v60 = vsub.f32 %v5122_v21, %v7531_v31  ;;  %v347_v43 = vld [vmem:[%s7092_s1 + $0xb8] sm:$0xff]  ;;  %v7535_v31 = vand.u32 4294901760, %v5141_v26 }
  0x80   : > { %7527 = vst [vmem:[#allocation78_spill] sm:$0xff] %v5164_v15  ;;  %1462 = vmatprep.subr.mxu0 %v7463_v3  ;;  %1865 = vmatpush1.msra.mxu1 %v4538_v38 }
  0x81   : > { %587 = vmatmul.mubr.f32.gmra.mxu0 %v586_v23  ;;  %7530 = vst [vmem:[#allocation80_spill] sm:$0xff] %v5176_v36  ;;  %1866 = vmatprep.subr.mxu1 %v7463_v3  ;;  %v610_v23 = vand.u32 4294901760, %v609_v33  ;;  %v616_v33 = vand.u32 4294901760, %v615_v22  ;;  %v630_v34 = vsub.f32 %v5141_v26, %v7535_v31  ;;  %v5214_v22 = vand.u32 4294901760, %v347_v43  ;;  %v346_v31 = vld [vmem:[%s7092_s1 + $0xb0] sm:$0xff] }
  0x82   : > { %1238 = vmatmul.mubr.f32.gmra.mxu1 %v4948_v32  ;;  %596 = vmatprep.mubr.f32.mxu0 %v595_v12  ;;  %v5195_v32 = vsub.f32 %v342_v18, %v5164_v15  ;;  %v5197_v12 = vand.u32 4294901760, %v344_v25  ;;  %v625_v18 = vand.u32 4294901760, %v624_v60 }
  0x83   : > { %1243 = vmatprep.mubr.f32.mxu1 %v4955_v29  ;;  %1465 = vmatpush1.msra.mxu0 %v4573_v55  ;;  %v7239_v29 = vand.u32 4294901760, %v5173_v63  ;;  %v7536_v55 = vand.u32 4294901760, %v5157_v58  ;;  %7538 = vst [vmem:[#allocation85_spill] sm:$0xff] %v5214_v22 }
  0x84   : > { %7533 = vst [vmem:[#allocation82_spill] sm:$0xff] %v5195_v32  ;;  %7534 = vst [vmem:[#allocation83_spill] sm:$0xff] %v5197_v12  ;;  %1466 = vmatprep.subr.mxu0 %v7463_v3  ;;  %1868 = vmatpush1.msra.mxu1 %v4540_v39 }
  0x85   : > { %602 = vmatmul.mubr.f32.gmra.mxu0 %v601_v19  ;;  %1869 = vmatprep.subr.mxu1 %v7463_v3  ;;  %v639_v37 = vsub.f32 %v5157_v58, %v7536_v55  ;;  %v5212_v19 = vsub.f32 %v345_v61, %v5187_v7  ;;  %v5226_v55 = vsub.f32 %v344_v25, %v5197_v12  ;;  %v631_v61 = vand.u32 4294901760, %v630_v34 }
  0x86   : > { %1245 = vmatmul.mubr.f32.gmra.mxu1 %v4986_v56  ;;  %611 = vmatprep.mubr.f32.mxu0 %v610_v23  ;;  %v349_v23 = vld [vmem:[%s7092_s1 + $0xc8] sm:$0xff]  ;;  %v645_v21 = vsub.f32 %v5173_v63, %v7239_v29  ;;  %v5236_v58 = vand.u32 4294901760, %v346_v31  ;;  %v5242_v34 = vsub.f32 %v347_v43, %v5214_v22  ;;  %v348_v29 = vld [vmem:[%s7092_s1 + $0xc0] sm:$0xff]  ;;  %v350_v63 = vld [vmem:[%s7092_s1 + $0xd0] sm:$0xff] }
  0x87   : > { %7537 = vst [vmem:[#allocation84_spill] sm:$0xff] %v5212_v19  ;;  %1250 = vmatprep.mubr.f32.mxu1 %v4996_v20  ;;  %1469 = vmatpush1.msra.mxu0 %v4588_v0  ;;  %7539 = vst [vmem:[#allocation86_spill] sm:$0xff] %v5226_v55  ;;  %v7540_v20 = vand.u32 4294901760, %v5176_v36  ;;  %v640_v25 = vand.u32 4294901760, %v639_v37  ;;  %v7544_v37 = vand.u32 4294901760, %v5195_v32 }
  0x88   : > { %1470 = vmatprep.subr.mxu0 %v7463_v3  ;;  %1871 = vmatpush1.msra.mxu1 %v4542_v40  ;;  %7541 = vst [vmem:[#allocation87_spill] sm:$0xff] %v5236_v58  ;;  %7542 = vst [vmem:[#allocation88_spill] sm:$0xff] %v5242_v34  ;;  %v646_v60 = vand.u32 4294901760, %v645_v21 }
  0x89   : > { %617 = vmatmul.mubr.f32.gmra.mxu0 %v616_v33  ;;  %v654_v56 = vsub.f32 %v5176_v36, %v7540_v20  ;;  %1872 = vmatprep.subr.mxu1 %v7463_v3  ;;  %v5244_v33 = vand.u32 4294901760, %v349_v23  ;;  %v351_v20 = vld [vmem:[%s7092_s1 + $0xd8] sm:$0xff]  ;;  %v5263_v36 = vand.u32 4294901760, %v348_v29 }
  0x8a   : > { %1252 = vmatmul.mubr.f32.gmra.mxu1 %v5024_v35  ;;  %626 = vmatprep.mubr.f32.mxu0 %v625_v18  ;;  %v660_v18 = vsub.f32 %v5195_v32, %v7544_v37  ;;  %v5261_v35 = vsub.f32 %v346_v31, %v5236_v58  ;;  %v353_v32 = vld [vmem:[%s7092_s1 + $0xe8] sm:$0xff] }
  0x8b   : > { %7543 = vst [vmem:[#allocation89_spill] sm:$0xff] %v5244_v33  ;;  %1257 = vmatprep.mubr.f32.mxu1 %v5026_v2  ;;  %1473 = vmatpush1.msra.mxu0 %v4601_v4  ;;  %7545 = vst [vmem:[#allocation90_spill] sm:$0xff] %v5263_v36  ;;  %v5265_v2 = vand.u32 4294901760, %v351_v20  ;;  %v655_v37 = vand.u32 4294901760, %v654_v56  ;;  %v5277_v43 = vsub.f32 %v349_v23, %v5244_v33  ;;  %v7550_v56 = vand.u32 4294901760, %v5226_v55 }
  0x8c   : > { %1474 = vmatprep.subr.mxu0 %v7463_v3  ;;  %1874 = vmatpush1.msra.mxu1 %v4547_v44  ;;  %v5293_v31 = vsub.f32 %v348_v29, %v5263_v36 }
  0x8d   : > { %632 = vmatmul.mubr.f32.gmra.mxu0 %v631_v61  ;;  %7546 = vst [vmem:[#allocation91_spill] sm:$0xff] %v5265_v2  ;;  %1875 = vmatprep.subr.mxu1 %v7463_v3  ;;  %v7547_v61 = vand.u32 4294901760, %v5212_v19  ;;  %7548 = vst [vmem:[#allocation92_spill] sm:$0xff] %v5277_v43  ;;  %v675_v23 = vsub.f32 %v5226_v55, %v7550_v56  ;;  %v7553_v56 = vand.u32 4294901760, %v5242_v34  ;;  %v5307_v55 = vand.u32 4294901760, %v353_v32 }
  0x8e   : > { %1259 = vmatmul.mubr.f32.gmra.mxu1 %v5051_v14  ;;  %641 = vmatprep.mubr.f32.mxu0 %v640_v25  ;;  %v661_v14 = vand.u32 4294901760, %v660_v18  ;;  %v5284_v25 = vand.u32 4294901760, %v350_v63  ;;  %7551 = vst [vmem:[#allocation94_spill] sm:$0xff] %v5293_v31  ;;  %v352_v18 = vld [vmem:[%s7092_s1 + $0xe0] sm:$0xff] }
  0x8f   : > { %v669_v21 = vsub.f32 %v5212_v19, %v7547_v61  ;;  %1264 = vmatprep.mubr.f32.mxu1 %v5071_v48  ;;  %1477 = vmatpush1.msra.mxu0 %v4618_v13  ;;  %v5296_v48 = vsub.f32 %v351_v20, %v5265_v2  ;;  %v684_v61 = vsub.f32 %v5242_v34, %v7553_v56  ;;  %v355_v20 = vld [vmem:[%s7092_s1 + $0xf8] sm:$0xff]  ;;  %v7557_v56 = vand.u32 4294901760, %v5261_v35 }
  0x90   : > { %7549 = vst [vmem:[#allocation93_spill] sm:$0xff] %v5284_v25  ;;  %1478 = vmatprep.subr.mxu0 %v7463_v3  ;;  %1877 = vmatpush1.msra.mxu1 %v4549_v45  ;;  %7554 = vst [vmem:[#allocation96_spill] sm:$0xff] %v5307_v55 }
  0x91   : > { %647 = vmatmul.mubr.f32.gmra.mxu0 %v646_v60  ;;  %7552 = vst [vmem:[#allocation95_spill] sm:$0xff] %v5296_v48  ;;  %1878 = vmatprep.subr.mxu1 %v7463_v3  ;;  %v670_v60 = vand.u32 4294901760, %v669_v21  ;;  %v676_v21 = vand.u32 4294901760, %v675_v23  ;;  %v690_v29 = vsub.f32 %v5261_v35, %v7557_v56  ;;  %v5334_v23 = vand.u32 4294901760, %v355_v20  ;;  %v354_v56 = vld [vmem:[%s7092_s1 + $0xf0] sm:$0xff] }
  0x92   : > { %1266 = vmatmul.mubr.f32.gmra.mxu1 %v5081_v57  ;;  %656 = vmatprep.mubr.f32.mxu0 %v655_v37  ;;  %v5315_v57 = vsub.f32 %v350_v63, %v5284_v25  ;;  %v5317_v37 = vand.u32 4294901760, %v352_v18  ;;  %v685_v63 = vand.u32 4294901760, %v684_v61 }
  0x93   : > { %1271 = vmatprep.mubr.f32.mxu1 %v5096_v27  ;;  %1481 = vmatpush1.msra.mxu0 %v4625_v17  ;;  %v7271_v27 = vand.u32 4294901760, %v5293_v31  ;;  %v7558_v17 = vand.u32 4294901760, %v5277_v43  ;;  %7560 = vst [vmem:[#allocation100_spill] sm:$0xff] %v5334_v23 }
  0x94   : > { %7555 = vst [vmem:[#allocation97_spill] sm:$0xff] %v5315_v57  ;;  %7556 = vst [vmem:[#allocation98_spill] sm:$0xff] %v5317_v37  ;;  %1482 = vmatprep.subr.mxu0 %v7463_v3  ;;  %1880 = vmatpush1.msra.mxu1 %v4551_v46 }
  0x95   : > { %662 = vmatmul.mubr.f32.gmra.mxu0 %v661_v14  ;;  %1881 = vmatprep.subr.mxu1 %v7463_v3  ;;  %v699_v19 = vsub.f32 %v5277_v43, %v7558_v17  ;;  %v5332_v14 = vsub.f32 %v353_v32, %v5307_v55  ;;  %v5346_v17 = vsub.f32 %v352_v18, %v5317_v37  ;;  %v691_v32 = vand.u32 4294901760, %v690_v29 }
  0x96   : > { %1273 = vmatmul.mubr.f32.gmra.mxu1 %v5117_v8  ;;  %671 = vmatprep.mubr.f32.mxu0 %v670_v60  ;;  %v357_v60 = vld [vmem:[%s7092_s1 + $0x108] sm:$0xff]  ;;  %v705_v34 = vsub.f32 %v5293_v31, %v7271_v27  ;;  %v5356_v43 = vand.u32 4294901760, %v354_v56  ;;  %v5362_v29 = vsub.f32 %v355_v20, %v5334_v23  ;;  %v356_v27 = vld [vmem:[%s7092_s1 + $0x100] sm:$0xff]  ;;  %v358_v31 = vld [vmem:[%s7092_s1 + $0x110] sm:$0xff] }
  0x97   : > { %7559 = vst [vmem:[#allocation99_spill] sm:$0xff] %v5332_v14  ;;  %1278 = vmatprep.mubr.f32.mxu1 %v5124_v41  ;;  %1485 = vmatpush1.msra.mxu0 %v4639_v24  ;;  %7561 = vst [vmem:[#allocation101_spill] sm:$0xff] %v5346_v17  ;;  %v7562_v41 = vand.u32 4294901760, %v5296_v48  ;;  %v700_v18 = vand.u32 4294901760, %v699_v19  ;;  %v7566_v19 = vand.u32 4294901760, %v5315_v57 }
  0x98   : > { %1486 = vmatprep.subr.mxu0 %v7463_v3  ;;  %1883 = vmatpush1.msra.mxu1 %v4562_v51  ;;  %7563 = vst [vmem:[#allocation102_spill] sm:$0xff] %v5356_v43  ;;  %7564 = vst [vmem:[#allocation103_spill] sm:$0xff] %v5362_v29  ;;  %v706_v61 = vand.u32 4294901760, %v705_v34 }
  0x99   : > { %677 = vmatmul.mubr.f32.gmra.mxu0 %v676_v21  ;;  %v714_v8 = vsub.f32 %v5296_v48, %v7562_v41  ;;  %1884 = vmatprep.subr.mxu1 %v7463_v3  ;;  %v5364_v21 = vand.u32 4294901760, %v357_v60  ;;  %v359_v41 = vld [vmem:[%s7092_s1 + $0x118] sm:$0xff]  ;;  %v5383_v48 = vand.u32 4294901760, %v356_v27 }
  0x9a   : > { %1280 = vmatmul.mubr.f32.gmra.mxu1 %v5143_v6  ;;  %686 = vmatprep.mubr.f32.mxu0 %v685_v63  ;;  %v720_v63 = vsub.f32 %v5315_v57, %v7566_v19  ;;  %v5381_v6 = vsub.f32 %v354_v56, %v5356_v43  ;;  %v361_v57 = vld [vmem:[%s7092_s1 + $0x128] sm:$0xff] }
  0x9b   : > { %7565 = vst [vmem:[#allocation104_spill] sm:$0xff] %v5364_v21  ;;  %1285 = vmatprep.mubr.f32.mxu1 %v5145_v16  ;;  %1489 = vmatpush1.msra.mxu0 %v4652_v30  ;;  %7568 = vst [vmem:[#allocation106_spill] sm:$0xff] %v5383_v48  ;;  %v5385_v16 = vand.u32 4294901760, %v359_v41  ;;  %v715_v19 = vand.u32 4294901760, %v714_v8  ;;  %v5397_v20 = vsub.f32 %v357_v60, %v5364_v21  ;;  %v7573_v8 = vand.u32 4294901760, %v5346_v17 }
  0x9c   : > { %1490 = vmatprep.subr.mxu0 %v7463_v3  ;;  %1886 = vmatpush1.msra.mxu1 %v4579_v59  ;;  %7567 = vst [vmem:[#allocation105_spill] sm:$0xff] %v5381_v6  ;;  %v5413_v56 = vsub.f32 %v356_v27, %v5383_v48 }
  0x9d   : > { %692 = vmatmul.mubr.f32.gmra.mxu0 %v691_v32  ;;  %7569 = vst [vmem:[#allocation107_spill] sm:$0xff] %v5385_v16  ;;  %1887 = vmatprep.subr.mxu1 %v7463_v3  ;;  %v7570_v32 = vand.u32 4294901760, %v5332_v14  ;;  %7571 = vst [vmem:[#allocation108_spill] sm:$0xff] %v5397_v20  ;;  %v735_v60 = vsub.f32 %v5346_v17, %v7573_v8  ;;  %v7576_v8 = vand.u32 4294901760, %v5362_v29  ;;  %v5427_v17 = vand.u32 4294901760, %v361_v57 }
  0x9e   : > { %1287 = vmatmul.mubr.f32.gmra.mxu1 %v5164_v15  ;;  %701 = vmatprep.mubr.f32.mxu0 %v700_v18  ;;  %v721_v15 = vand.u32 4294901760, %v720_v63  ;;  %v5404_v18 = vand.u32 4294901760, %v358_v31  ;;  %7574 = vst [vmem:[#allocation110_spill] sm:$0xff] %v5413_v56  ;;  %v360_v63 = vld [vmem:[%s7092_s1 + $0x120] sm:$0xff] }
  0x9f   : > { %v729_v34 = vsub.f32 %v5332_v14, %v7570_v32  ;;  %1292 = vmatprep.mubr.f32.mxu1 %v5187_v7  ;;  %1493 = vmatpush1.msra.mxu0 %v4665_v42  ;;  %v5416_v7 = vsub.f32 %v359_v41, %v5385_v16  ;;  %v744_v32 = vsub.f32 %v5362_v29, %v7576_v8  ;;  %v363_v41 = vld [vmem:[%s7092_s1 + $0x138] sm:$0xff]  ;;  %v7580_v8 = vand.u32 4294901760, %v5381_v6 }
  0xa0   : > { %7572 = vst [vmem:[#allocation109_spill] sm:$0xff] %v5404_v18  ;;  %1494 = vmatprep.subr.mxu0 %v7463_v3  ;;  %1889 = vmatpush1.msra.mxu1 %v4584_v62  ;;  %7577 = vst [vmem:[#allocation112_spill] sm:$0xff] %v5427_v17 }
  0xa1   : > { %707 = vmatmul.mubr.f32.gmra.mxu0 %v706_v61  ;;  %7575 = vst [vmem:[#allocation111_spill] sm:$0xff] %v5416_v7  ;;  %1890 = vmatprep.subr.mxu1 %v7463_v3  ;;  %v730_v61 = vand.u32 4294901760, %v729_v34  ;;  %v736_v34 = vand.u32 4294901760, %v735_v60  ;;  %v750_v27 = vsub.f32 %v5381_v6, %v7580_v8  ;;  %v5454_v60 = vand.u32 4294901760, %v363_v41  ;;  %v362_v8 = vld [vmem:[%s7092_s1 + $0x130] sm:$0xff] }
  0xa2   : > { %1294 = vmatmul.mubr.f32.gmra.mxu1 %v5197_v12  ;;  %716 = vmatprep.mubr.f32.mxu0 %v715_v19  ;;  %v5435_v12 = vsub.f32 %v358_v31, %v5404_v18  ;;  %v5437_v19 = vand.u32 4294901760, %v360_v63  ;;  %v745_v31 = vand.u32 4294901760, %v744_v32  ;;  %v5476_v6 = vand.u32 4294901760, %v362_v8  ;;  %v7592_v32 = vld [vmem:[#allocation8_spill] sm:$0xff] }
  0xa3   : > { %1299 = vmatprep.mubr.f32.mxu1 %v5214_v22  ;;  %1497 = vmatpush1.msra.mxu0 %v4678_v1  ;;  %v7305_v22 = vand.u32 4294901760, %v5413_v56  ;;  %v7581_v1 = vand.u32 4294901760, %v5397_v20  ;;  %7583 = vst [vmem:[#allocation116_spill] sm:$0xff] %v5454_v60  ;;  %v751_v29 = vand.u32 4294901760, %v750_v27  ;;  %v5482_v27 = vsub.f32 %v363_v41, %v5454_v60  ;;  %v369_v41 = vld [vmem:[%s7092_s1 + $0x168] sm:$0xff] }
  0xa4   : > { %7578 = vst [vmem:[#allocation113_spill] sm:$0xff] %v5435_v12  ;;  %7579 = vst [vmem:[#allocation114_spill] sm:$0xff] %v5437_v19  ;;  %1498 = vmatprep.subr.mxu0 %v7463_v3  ;;  %1892 = vmatpush1.msra.mxu1 %v4604_v5 }
  0xa5   : > { %722 = vmatmul.mubr.f32.gmra.mxu0 %v721_v15  ;;  %1893 = vmatprep.subr.mxu1 %v7463_v3  ;;  %v759_v14 = vsub.f32 %v5397_v20, %v7581_v1  ;;  %v5452_v15 = vsub.f32 %v361_v57, %v5427_v17  ;;  %v5466_v1 = vsub.f32 %v360_v63, %v5437_v19  ;;  %v7585_v57 = vld [vmem:[#allocation6_spill] sm:$0xff] }
  0xa6   : > { %1301 = vmatmul.mubr.f32.gmra.mxu1 %v5236_v58  ;;  %731 = vmatprep.mubr.f32.mxu0 %v730_v61  ;;  %v365_v61 = vld [vmem:[%s7092_s1 + $0x148] sm:$0xff]  ;;  %v7586_v58 = vand.u32 4294901760, %v5416_v7  ;;  %7587 = vst [vmem:[#allocation6_spill] sm:$0xff] %v5476_v6  ;;  %7588 = vst [vmem:[#allocation118_spill] sm:$0xff] %v5482_v27 }
  0xa7   : > { %7582 = vst [vmem:[#allocation115_spill] sm:$0xff] %v5452_v15  ;;  %1306 = vmatprep.mubr.f32.mxu1 %v5244_v33  ;;  %1501 = vmatpush1.msra.mxu0 %v4691_v9  ;;  %7584 = vst [vmem:[#allocation117_spill] sm:$0xff] %v5466_v1  ;;  %v765_v33 = vsub.f32 %v5413_v56, %v7305_v22  ;;  %v760_v63 = vand.u32 4294901760, %v759_v14  ;;  %v364_v22 = vld [vmem:[%s7092_s1 + $0x140] sm:$0xff]  ;;  %v7591_v14 = vand.u32 4294901760, %v5435_v12 }
  0xa8   : > { %1502 = vmatprep.subr.mxu0 %v7463_v3  ;;  %1895 = vmatpush1.msra.mxu1 %v7585_v57  ;;  %v774_v20 = vsub.f32 %v5416_v7, %v7586_v58  ;;  %v367_v58 = vld [vmem:[%s7092_s1 + $0x158] sm:$0xff]  ;;  %v5503_v9 = vand.u32 4294901760, %v364_v22 }
  0xa9   : > { %737 = vmatmul.mubr.f32.gmra.mxu0 %v736_v34  ;;  %1896 = vmatprep.subr.mxu1 %v7463_v3  ;;  %v5484_v34 = vand.u32 4294901760, %v365_v61  ;;  %v766_v7 = vand.u32 4294901760, %v765_v33 }
  0xaa   : > { %1308 = vmatmul.mubr.f32.gmra.mxu1 %v5263_v36  ;;  %746 = vmatprep.mubr.f32.mxu0 %v745_v31  ;;  %v7590_v36 = vld [vmem:[#allocation16_spill] sm:$0xff]  ;;  %v780_v31 = vsub.f32 %v5435_v12, %v7591_v14  ;;  %v775_v56 = vand.u32 4294901760, %v774_v20  ;;  %7594 = vst [vmem:[#allocation121_spill] sm:$0xff] %v5503_v9  ;;  %v7595_v14 = vand.u32 4294901760, %v5452_v15  ;;  %v7598_v12 = vld [vmem:[#allocation18_spill] sm:$0xff] }
  0xab   : > { %7589 = vst [vmem:[#allocation119_spill] sm:$0xff] %v5484_v34  ;;  %1313 = vmatprep.mubr.f32.mxu1 %v5265_v2  ;;  %1505 = vmatpush1.msra.mxu0 %v7590_v36  ;;  %v5501_v2 = vsub.f32 %v362_v8, %v5476_v6  ;;  %v366_v36 = vld [vmem:[%s7092_s1 + $0x150] sm:$0xff]  ;;  %v5515_v20 = vsub.f32 %v365_v61, %v5484_v34  ;;  %v5517_v8 = vand.u32 4294901760, %v367_v58  ;;  %v7601_v61 = vand.u32 4294901760, %v5466_v1 }
  0xac   : > { %1506 = vmatprep.subr.mxu0 %v7463_v3  ;;  %1898 = vmatpush1.msra.mxu1 %v7592_v32  ;;  %v5533_v32 = vsub.f32 %v364_v22, %v5503_v9 }
  0xad   : > { %752 = vmatmul.mubr.f32.gmra.mxu0 %v751_v29  ;;  %7593 = vst [vmem:[#allocation120_spill] sm:$0xff] %v5501_v2  ;;  %1899 = vmatprep.subr.mxu1 %v7463_v3  ;;  %v789_v29 = vsub.f32 %v5452_v15, %v7595_v14  ;;  %7596 = vst [vmem:[#allocation122_spill] sm:$0xff] %v5515_v20  ;;  %v7600_v14 = vld [vmem:[#allocation9_spill] sm:$0xff]  ;;  %v795_v33 = vsub.f32 %v5466_v1, %v7601_v61  ;;  %v371_v1 = vld [vmem:[%s7092_s1 + $0x178] sm:$0xff]  ;;  %v7610_v15 = vand.u32 4294901760, %v5501_v2 }
  0xae   : > { %1315 = vmatmul.mubr.f32.gmra.mxu1 %v5284_v25  ;;  %761 = vmatprep.mubr.f32.mxu0 %v760_v63  ;;  %7597 = vst [vmem:[#allocation123_spill] sm:$0xff] %v5517_v8  ;;  %v781_v63 = vand.u32 4294901760, %v780_v31  ;;  %v5524_v25 = vand.u32 4294901760, %v366_v36  ;;  %7602 = vst [vmem:[#allocation125_spill] sm:$0xff] %v5533_v32  ;;  %v368_v31 = vld [vmem:[%s7092_s1 + $0x160] sm:$0xff]  ;;  %v5547_v22 = vsub.f32 %v367_v58, %v5517_v8 }
  0xaf   : > { %1320 = vmatprep.mubr.f32.mxu1 %v5307_v55  ;;  %1509 = vmatpush1.msra.mxu0 %v7598_v12  ;;  %v5535_v55 = vand.u32 4294901760, %v369_v41  ;;  %v7604_v12 = vand.u32 4294901760, %v5482_v27  ;;  %v796_v58 = vand.u32 4294901760, %v795_v33  ;;  %v7616_v33 = vld [vmem:[#allocation11_spill] sm:$0xff] }
  0xb0   : > { %7599 = vst [vmem:[#allocation124_spill] sm:$0xff] %v5524_v25  ;;  %1510 = vmatprep.subr.mxu0 %v7463_v3  ;;  %1901 = vmatpush1.msra.mxu1 %v7600_v14  ;;  %7605 = vst [vmem:[#allocation127_spill] sm:$0xff] %v5547_v22  ;;  %v7606_v14 = vld [vmem:[#allocation20_spill] sm:$0xff] }
  0xb1   : > { %767 = vmatmul.mubr.f32.gmra.mxu0 %v766_v7  ;;  %7603 = vst [vmem:[#allocation126_spill] sm:$0xff] %v5535_v55  ;;  %1902 = vmatprep.subr.mxu1 %v7463_v3  ;;  %v790_v7 = vand.u32 4294901760, %v789_v29  ;;  %v804_v61 = vsub.f32 %v5482_v27, %v7604_v12  ;;  %v5557_v29 = vand.u32 4294901760, %v368_v31  ;;  %v7609_v12 = vld [vmem:[#allocation10_spill] sm:$0xff]  ;;  %v5566_v27 = vsub.f32 %v369_v41, %v5535_v55  ;;  %v373_v41 = vld [vmem:[%s7092_s1 + $0x188] sm:$0xff] }
  0xb2   : > { %1322 = vmatmul.mubr.f32.gmra.mxu1 %v5317_v37  ;;  %776 = vmatprep.mubr.f32.mxu0 %v775_v56  ;;  %v5555_v56 = vsub.f32 %v366_v36, %v5524_v25 }
  0xb3   : > { %1327 = vmatprep.mubr.f32.mxu1 %v5334_v23  ;;  %1513 = vmatpush2.msra.mxu0 %v7606_v14  ;;  %7608 = vst [vmem:[#allocation129_spill] sm:$0xff] %v5557_v29  ;;  %v810_v23 = vsub.f32 %v5501_v2, %v7610_v15  ;;  %7611 = vst [vmem:[#allocation130_spill] sm:$0xff] %v5566_v27  ;;  %v805_v36 = vand.u32 4294901760, %v804_v61  ;;  %v7612_v14 = vand.u32 4294901760, %v5515_v20  ;;  %v370_v15 = vld [vmem:[%s7092_s1 + $0x170] sm:$0xff]  ;;  %v7619_v61 = vand.u32 4294901760, %v5547_v22 }
  0xb4   : > { %7607 = vst [vmem:[#allocation128_spill] sm:$0xff] %v5555_v56  ;;  %1514 = vmatprep.subr.mxu0 %v7463_v3  ;;  %1904 = vmatpush1.msra.mxu1 %v7609_v12  ;;  %v5574_v12 = vand.u32 4294901760, %v371_v1  ;;  %v5594_v2 = vand.u32 4294901760, %v370_v15 }
  0xb5   : > { %782 = vmatmul.mubr.f32.gmra.mxu0 %v781_v63  ;;  %1905 = vmatprep.subr.mxu1 %v7463_v3  ;;  %v819_v63 = vsub.f32 %v5515_v20, %v7612_v14  ;;  %v5586_v14 = vsub.f32 %v368_v31, %v5557_v29  ;;  %v811_v37 = vand.u32 4294901760, %v810_v23  ;;  %v7623_v20 = vand.u32 4294901760, %v5555_v56 }
  0xb6   : > { %1329 = vmatmul.mubr.f32.gmra.mxu1 %v5356_v43  ;;  %791 = vmatprep.mubr.f32.mxu0 %v790_v7  ;;  %7613 = vst [vmem:[#allocation131_spill] sm:$0xff] %v5574_v12  ;;  %v7614_v7 = vld [vmem:[#allocation22_spill] sm:$0xff]  ;;  %v7617_v43 = vand.u32 4294901760, %v5533_v32  ;;  %7618 = vst [vmem:[#allocation133_spill] sm:$0xff] %v5594_v2  ;;  %v5602_v23 = vsub.f32 %v371_v1, %v5574_v12  ;;  %v7632_v1 = vld [vmem:[#allocation15_spill] sm:$0xff] }
  0xb7   : > { %1334 = vmatprep.mubr.f32.mxu1 %v5364_v21  ;;  %1517 = vmatpush2.msra.mxu0 %v7614_v7  ;;  %7615 = vst [vmem:[#allocation132_spill] sm:$0xff] %v5586_v14  ;;  %v820_v31 = vand.u32 4294901760, %v819_v63  ;;  %v834_v7 = vsub.f32 %v5547_v22, %v7619_v61  ;;  %v7622_v63 = vld [vmem:[#allocation24_spill] sm:$0xff]  ;;  %v840_v61 = vsub.f32 %v5555_v56, %v7623_v20 }
  0xb8   : > { %1518 = vmatprep.subr.mxu0 %v7463_v3  ;;  %1907 = vmatpush1.msra.mxu1 %v7616_v33  ;;  %v825_v21 = vsub.f32 %v5533_v32, %v7617_v43  ;;  %7620 = vst [vmem:[#allocation134_spill] sm:$0xff] %v5602_v23  ;;  %v372_v43 = vld [vmem:[%s7092_s1 + $0x180] sm:$0xff]  ;;  %v5624_v33 = vsub.f32 %v370_v15, %v5594_v2  ;;  %v377_v15 = vld [vmem:[%s7092_s1 + $0x1a8] sm:$0xff] }
  0xb9   : > { %797 = vmatmul.mubr.f32.gmra.mxu0 %v796_v58  ;;  %1908 = vmatprep.subr.mxu1 %v7463_v3  ;;  %v5604_v58 = vand.u32 4294901760, %v373_v41  ;;  %v835_v20 = vand.u32 4294901760, %v834_v7  ;;  %v841_v7 = vand.u32 4294901760, %v840_v61  ;;  %v376_v61 = vld [vmem:[%s7092_s1 + $0x1a0] sm:$0xff]  ;;  %v5667_v56 = vand.u32 4294901760, %v377_v15 }
  0xba   : > { %1336 = vmatmul.mubr.f32.gmra.mxu1 %v5383_v48  ;;  %806 = vmatprep.mubr.f32.mxu0 %v805_v36  ;;  %v375_v36 = vld [vmem:[%s7092_s1 + $0x198] sm:$0xff]  ;;  %v7624_v48 = vld [vmem:[#allocation13_spill] sm:$0xff]  ;;  %v826_v22 = vand.u32 4294901760, %v825_v21  ;;  %7626 = vst [vmem:[#allocation136_spill] sm:$0xff] %v5624_v33 }
  0xbb   : > { %7621 = vst [vmem:[#allocation135_spill] sm:$0xff] %v5604_v58  ;;  %1341 = vmatprep.mubr.f32.mxu1 %v5385_v16  ;;  %1521 = vmatpush2.msra.mxu0 %v7622_v63  ;;  %v7625_v16 = vand.u32 4294901760, %v5566_v27  ;;  %v5626_v63 = vand.u32 4294901760, %v372_v43  ;;  %v5634_v21 = vand.u32 4294901760, %v375_v36  ;;  %7637 = vst [vmem:[#allocation143_spill] sm:$0xff] %v5667_v56 }
  0xbc   : > { %1522 = vmatprep.subr.mxu0 %v7463_v3  ;;  %1910 = vmatpush1.msra.mxu1 %v7624_v48 }
  0xbd   : > { %812 = vmatmul.mubr.f32.gmra.mxu0 %v811_v37  ;;  %v849_v32 = vsub.f32 %v5566_v27, %v7625_v16  ;;  %7627 = vst [vmem:[#allocation137_spill] sm:$0xff] %v5626_v63  ;;  %1911 = vmatprep.subr.mxu1 %v7463_v3  ;;  %v5632_v37 = vsub.f32 %v373_v41, %v5604_v58  ;;  %7629 = vst [vmem:[#allocation139_spill] sm:$0xff] %v5634_v21  ;;  %v374_v16 = vld [vmem:[%s7092_s1 + $0x190] sm:$0xff] }
  0xbe   : > { %1343 = vmatmul.mubr.f32.gmra.mxu1 %v5404_v18  ;;  %821 = vmatprep.mubr.f32.mxu0 %v820_v31  ;;  %v7630_v18 = vld [vmem:[#allocation26_spill] sm:$0xff]  ;;  %v7631_v31 = vand.u32 4294901760, %v5586_v14  ;;  %v5653_v48 = vand.u32 4294901760, %v374_v16 }
  0xbf   : > { %7628 = vst [vmem:[#allocation138_spill] sm:$0xff] %v5632_v37  ;;  %1348 = vmatprep.mubr.f32.mxu1 %v5427_v17  ;;  %1525 = vmatpush2.msra.mxu0 %v7630_v18  ;;  %v850_v27 = vand.u32 4294901760, %v849_v32  ;;  %v5651_v17 = vsub.f32 %v372_v43, %v5626_v63  ;;  %v5665_v43 = vsub.f32 %v375_v36, %v5634_v21  ;;  %v7638_v18 = vld [vmem:[#allocation28_spill] sm:$0xff]  ;;  %v7640_v36 = vand.u32 4294901760, %v5624_v33 }
  0xc0   : > { %v855_v41 = vsub.f32 %v5586_v14, %v7631_v31  ;;  %1526 = vmatprep.subr.mxu0 %v7463_v3  ;;  %1913 = vmatpush2.msra.mxu1 %v7632_v1  ;;  %7634 = vst [vmem:[#allocation141_spill] sm:$0xff] %v5653_v48  ;;  %v7635_v31 = vand.u32 4294901760, %v5602_v23  ;;  %v379_v14 = vld [vmem:[%s7092_s1 + $0x1b8] sm:$0xff]  ;;  %v5683_v1 = vsub.f32 %v374_v16, %v5653_v48 }
  0xc1   : > { %827 = vmatmul.mubr.f32.gmra.mxu0 %v826_v22  ;;  %7633 = vst [vmem:[#allocation140_spill] sm:$0xff] %v5651_v17  ;;  %1914 = vmatprep.subr.mxu1 %v7463_v3  ;;  %7636 = vst [vmem:[#allocation142_spill] sm:$0xff] %v5665_v43  ;;  %v870_v22 = vsub.f32 %v5624_v33, %v7640_v36  ;;  %v5697_v16 = vsub.f32 %v377_v15, %v5667_v56  ;;  %v7644_v33 = vld [vmem:[#allocation30_spill] sm:$0xff] }
  0xc2   : > { %1350 = vmatmul.mubr.f32.gmra.mxu1 %v5437_v19  ;;  %836 = vmatprep.mubr.f32.mxu0 %v835_v20  ;;  %v864_v32 = vsub.f32 %v5602_v23, %v7635_v31  ;;  %v856_v20 = vand.u32 4294901760, %v855_v41  ;;  %v5674_v19 = vand.u32 4294901760, %v376_v61  ;;  %v7639_v31 = vld [vmem:[#allocation17_spill] sm:$0xff]  ;;  %7641 = vst [vmem:[#allocation144_spill] sm:$0xff] %v5683_v1  ;;  %v378_v41 = vld [vmem:[%s7092_s1 + $0x1b0] sm:$0xff]  ;;  %v7647_v23 = vand.u32 4294901760, %v5651_v17 }
  0xc3   : > { %1355 = vmatprep.mubr.f32.mxu1 %v5454_v60  ;;  %1529 = vmatpush2.msra.mxu0 %v7638_v18  ;;  %v5685_v60 = vand.u32 4294901760, %v379_v14  ;;  %v7642_v18 = vand.u32 4294901760, %v5632_v37  ;;  %7643 = vst [vmem:[#allocation145_spill] sm:$0xff] %v5697_v16  ;;  %v871_v15 = vand.u32 4294901760, %v870_v22  ;;  %v7652_v22 = vld [vmem:[#allocation21_spill] sm:$0xff] }
  0xc4   : > { %1530 = vmatprep.subr.mxu0 %v7463_v3  ;;  %1916 = vmatpush2.msra.mxu1 %v7639_v31  ;;  %v381_v31 = vld [vmem:[%s7092_s1 + $0x1c8] sm:$0xff] }
  0xc5   : > { %842 = vmatmul.mubr.f32.gmra.mxu0 %v841_v7  ;;  %1917 = vmatprep.subr.mxu1 %v7463_v3  ;;  %v865_v7 = vand.u32 4294901760, %v864_v32  ;;  %v879_v36 = vsub.f32 %v5632_v37, %v7642_v18  ;;  %v5707_v32 = vand.u32 4294901760, %v378_v41  ;;  %v7646_v18 = vld [vmem:[#allocation19_spill] sm:$0xff]  ;;  %v5716_v37 = vsub.f32 %v379_v14, %v5685_v60  ;;  %v7650_v14 = vld [vmem:[#allocation32_spill] sm:$0xff] }
  0xc6   : > { %1357 = vmatmul.mubr.f32.gmra.mxu1 %v5476_v6  ;;  %851 = vmatprep.mubr.f32.mxu0 %v850_v27  ;;  %v5705_v27 = vsub.f32 %v376_v61, %v5674_v19 }
  0xc7   : > { %1362 = vmatprep.mubr.f32.mxu1 %v5484_v34  ;;  %1533 = vmatpush2.msra.mxu0 %v7644_v33  ;;  %v885_v34 = vsub.f32 %v5651_v17, %v7647_v23  ;;  %7648 = vst [vmem:[#allocation147_spill] sm:$0xff] %v5716_v37  ;;  %v880_v61 = vand.u32 4294901760, %v879_v36  ;;  %v7649_v33 = vand.u32 4294901760, %v5665_v43  ;;  %v380_v23 = vld [vmem:[%s7092_s1 + $0x1c0] sm:$0xff]  ;;  %v7655_v36 = vand.u32 4294901760, %v5697_v16 }
  0xc8   : > { %7645 = vst [vmem:[#allocation146_spill] sm:$0xff] %v5705_v27  ;;  %1534 = vmatprep.subr.mxu0 %v7463_v3  ;;  %1919 = vmatpush2.msra.mxu1 %v7646_v18  ;;  %v5724_v18 = vand.u32 4294901760, %v381_v31  ;;  %v5744_v17 = vand.u32 4294901760, %v380_v23 }
  0xc9   : > { %857 = vmatmul.mubr.f32.gmra.mxu0 %v856_v20  ;;  %1920 = vmatprep.subr.mxu1 %v7463_v3  ;;  %v894_v20 = vsub.f32 %v5665_v43, %v7649_v33  ;;  %v5736_v33 = vsub.f32 %v378_v41, %v5707_v32  ;;  %v886_v6 = vand.u32 4294901760, %v885_v34  ;;  %v7658_v43 = vld [vmem:[#allocation34_spill] sm:$0xff] }
  0xca   : > { %1364 = vmatmul.mubr.f32.gmra.mxu1 %v5503_v9  ;;  %866 = vmatprep.mubr.f32.mxu0 %v865_v7  ;;  %v383_v7 = vld [vmem:[%s7092_s1 + $0x1d8] sm:$0xff]  ;;  %v7653_v9 = vand.u32 4294901760, %v5683_v1  ;;  %7654 = vst [vmem:[#allocation149_spill] sm:$0xff] %v5744_v17  ;;  %v5752_v34 = vsub.f32 %v381_v31, %v5724_v18 }
  0xcb   : > { %1369 = vmatprep.mubr.f32.mxu1 %v5517_v8  ;;  %1537 = vmatpush2.msra.mxu0 %v7650_v14  ;;  %7651 = vst [vmem:[#allocation148_spill] sm:$0xff] %v5736_v33  ;;  %v895_v41 = vand.u32 4294901760, %v894_v20  ;;  %v909_v14 = vsub.f32 %v5697_v16, %v7655_v36  ;;  %v7659_v20 = vand.u32 4294901760, %v5705_v27  ;;  %v7665_v31 = vand.u32 4294901760, %v5736_v33 }
  0xcc   : > { %1538 = vmatprep.subr.mxu0 %v7463_v3  ;;  %1922 = vmatpush2.msra.mxu1 %v7652_v22  ;;  %v900_v8 = vsub.f32 %v5683_v1, %v7653_v9  ;;  %7656 = vst [vmem:[#allocation150_spill] sm:$0xff] %v5752_v34  ;;  %v382_v9 = vld [vmem:[%s7092_s1 + $0x1d0] sm:$0xff] }
  0xcd   : > { %872 = vmatmul.mubr.f32.gmra.mxu0 %v871_v15  ;;  %1923 = vmatprep.subr.mxu1 %v7463_v3  ;;  %v5754_v15 = vand.u32 4294901760, %v383_v7  ;;  %v915_v36 = vsub.f32 %v5705_v27, %v7659_v20  ;;  %v5777_v22 = vand.u32 4294901760, %v382_v9  ;;  %v910_v20 = vand.u32 4294901760, %v909_v14  ;;  %v7670_v27 = vld [vmem:[#allocation37_spill] sm:$0xff] }
  0xce   : > { %1371 = vmatmul.mubr.f32.gmra.mxu1 %v5524_v25  ;;  %881 = vmatprep.mubr.f32.mxu0 %v880_v61  ;;  %v385_v61 = vld [vmem:[%s7092_s1 + $0x1e8] sm:$0xff]  ;;  %v7660_v25 = vld [vmem:[#allocation23_spill] sm:$0xff]  ;;  %v901_v16 = vand.u32 4294901760, %v900_v8 }
  0xcf   : > { %7657 = vst [vmem:[#allocation151_spill] sm:$0xff] %v5754_v15  ;;  %1376 = vmatprep.mubr.f32.mxu1 %v5535_v55  ;;  %1541 = vmatpush2.msra.mxu0 %v7658_v43  ;;  %v7661_v55 = vand.u32 4294901760, %v5716_v37  ;;  %v5774_v43 = vsub.f32 %v380_v23, %v5744_v17  ;;  %7662 = vst [vmem:[#allocation23_spill] sm:$0xff] %v5777_v22  ;;  %v5784_v8 = vand.u32 4294901760, %v385_v61  ;;  %v7664_v23 = vld [vmem:[#allocation36_spill] sm:$0xff]  ;;  %v916_v14 = vand.u32 4294901760, %v915_v36 }
  0xd0   : > { %1542 = vmatprep.subr.mxu0 %v7463_v3  ;;  %1925 = vmatpush2.msra.mxu1 %v7660_v25  ;;  %v7668_v36 = vand.u32 4294901760, %v5752_v34 }
  0xd1   : > { %887 = vmatmul.mubr.f32.gmra.mxu0 %v886_v6  ;;  %v924_v1 = vsub.f32 %v5716_v37, %v7661_v55  ;;  %1926 = vmatprep.subr.mxu1 %v7463_v3  ;;  %v5782_v6 = vsub.f32 %v383_v7, %v5754_v15  ;;  %7663 = vst [vmem:[#allocation152_spill] sm:$0xff] %v5784_v8  ;;  %v384_v55 = vld [vmem:[%s7092_s1 + $0x1e0] sm:$0xff] }
  0xd2   : > { %1378 = vmatmul.mubr.f32.gmra.mxu1 %v5557_v29  ;;  %896 = vmatprep.mubr.f32.mxu0 %v895_v41  ;;  %v387_v41 = vld [vmem:[%s7092_s1 + $0x1f8] sm:$0xff]  ;;  %v930_v7 = vsub.f32 %v5736_v33, %v7665_v31  ;;  %v7666_v29 = vld [vmem:[#allocation25_spill] sm:$0xff]  ;;  %v939_v31 = vsub.f32 %v5752_v34, %v7668_v36  ;;  %v7672_v36 = vand.u32 4294901760, %v5774_v43  ;;  %v7675_v33 = vld [vmem:[#allocation40_spill] sm:$0xff] }
  0xd3   : > { %1383 = vmatprep.mubr.f32.mxu1 %v5574_v12  ;;  %1545 = vmatpush2.msra.mxu0 %v7664_v23  ;;  %v925_v37 = vand.u32 4294901760, %v924_v1  ;;  %v5801_v12 = vsub.f32 %v382_v9, %v5777_v22  ;;  %v5804_v23 = vand.u32 4294901760, %v384_v55  ;;  %v5812_v1 = vsub.f32 %v385_v61, %v5784_v8  ;;  %v386_v9 = vld [vmem:[%s7092_s1 + $0x1f0] sm:$0xff] }
  0xd4   : > { %1546 = vmatprep.subr.mxu0 %v7463_v3  ;;  %1928 = vmatpush2.msra.mxu1 %v7666_v29  ;;  %v945_v61 = vsub.f32 %v5774_v43, %v7672_v36 }
  0xd5   : > { %902 = vmatmul.mubr.f32.gmra.mxu0 %v901_v16  ;;  %1929 = vmatprep.subr.mxu1 %v7463_v3  ;;  %7667 = vst [vmem:[#allocation25_spill] sm:$0xff] %v5804_v23  ;;  %v5814_v16 = vand.u32 4294901760, %v387_v41  ;;  %v5829_v34 = vsub.f32 %v384_v55, %v5804_v23  ;;  %v7676_v55 = vld [vmem:[#allocation29_spill] sm:$0xff] }
  0xd6   : > { %1385 = vmatmul.mubr.f32.gmra.mxu1 %v5594_v2  ;;  %911 = vmatprep.mubr.f32.mxu0 %v910_v20  ;;  %v931_v20 = vand.u32 4294901760, %v930_v7  ;;  %v7671_v2 = vld [vmem:[#allocation27_spill] sm:$0xff]  ;;  %v940_v7 = vand.u32 4294901760, %v939_v31  ;;  %v7677_v31 = vand.u32 4294901760, %v5801_v12 }
  0xd7   : > { %7669 = vst [vmem:[#allocation153_spill] sm:$0xff] %v5814_v16  ;;  %1390 = vmatprep.mubr.f32.mxu1 %v5604_v58  ;;  %1549 = vmatpush2.msra.mxu0 %v7670_v27  ;;  %v5831_v58 = vand.u32 4294901760, %v386_v9  ;;  %v7674_v27 = vand.u32 4294901760, %v5782_v6  ;;  %v5839_v36 = vsub.f32 %v387_v41, %v5814_v16 }
  0xd8   : > { %1550 = vmatprep.subr.mxu0 %v7463_v3  ;;  %1931 = vmatpush2.msra.mxu1 %v7671_v2 }
  0xd9   : > { %917 = vmatmul.mubr.f32.gmra.mxu0 %v916_v14  ;;  %1932 = vmatprep.subr.mxu1 %v7463_v3  ;;  %7673 = vst [vmem:[#allocation154_spill] sm:$0xff] %v5831_v58  ;;  %v954_v14 = vsub.f32 %v5782_v6, %v7674_v27  ;;  %v5851_v41 = vsub.f32 %v386_v9, %v5831_v58  ;;  %v7680_v27 = vld [vmem:[#allocation31_spill] sm:$0xff] }
  0xda   : > { %1392 = vmatmul.mubr.f32.gmra.mxu1 %v5626_v63  ;;  %926 = vmatprep.mubr.f32.mxu0 %v925_v37  ;;  %v946_v37 = vand.u32 4294901760, %v945_v61  ;;  %v960_v63 = vsub.f32 %v5801_v12, %v7677_v31  ;;  %v7411_v61 = vand.u32 4294901760, %v5839_v36  ;;  %v7679_v31 = vld [vmem:[#allocation47_spill] sm:$0xff] }
  0xdb   : > { %1397 = vmatprep.mubr.f32.mxu1 %v5634_v21  ;;  %1553 = vmatpush2.msra.mxu0 %v7675_v33  ;;  %v955_v2 = vand.u32 4294901760, %v954_v14  ;;  %v7678_v21 = vand.u32 4294901760, %v5812_v1 }
  0xdc   : > { %1554 = vmatprep.subr.mxu0 %v7463_v3  ;;  %1934 = vmatpush2.msra.mxu1 %v7676_v55  ;;  %v961_v9 = vand.u32 4294901760, %v960_v63  ;;  %v7682_v63 = vld [vmem:[#allocation33_spill] sm:$0xff] }
  0xdd   : > { %932 = vmatmul.mubr.f32.gmra.mxu0 %v931_v20  ;;  %1935 = vmatprep.subr.mxu1 %v7463_v3  ;;  %v969_v20 = vsub.f32 %v5812_v1, %v7678_v21  ;;  %v7412_v21 = vand.u32 4294901760, %v5851_v41 }
  0xde   : > { %1399 = vmatmul.mubr.f32.gmra.mxu1 %v5653_v48  ;;  %941 = vmatprep.mubr.f32.mxu0 %v940_v7  ;;  %v7681_v48 = vand.u32 4294901760, %v5829_v34 }
  0xdf   : > { %1404 = vmatprep.mubr.f32.mxu1 %v5667_v56  ;;  %1557 = vmatpush2.msra.mxu0 %v7679_v31  ;;  %v970_v14 = vand.u32 4294901760, %v969_v20  ;;  %v984_v56 = vsub.f32 %v5839_v36, %v7411_v61  ;;  %v7683_v20 = vld [vmem:[#allocation52_spill] sm:$0xff]  ;;  %v7684_v61 = vld [vmem:[#allocation35_spill] sm:$0xff] }
  0xe0   : > { %1558 = vmatprep.subr.mxu0 %v7463_v3  ;;  %1937 = vmatpush2.msra.mxu1 %v7680_v27  ;;  %v975_v7 = vsub.f32 %v5829_v34, %v7681_v48 }
  0xe1   : > { %947 = vmatmul.mubr.f32.gmra.mxu0 %v946_v37  ;;  %1938 = vmatprep.subr.mxu1 %v7463_v3  ;;  %v990_v37 = vsub.f32 %v5851_v41, %v7412_v21  ;;  %v7692_v21 = vand.u32 4294901760, %v4557_v49 }
  0xe2   : > { %1406 = vmatmul.mubr.f32.gmra.mxu1 %v5674_v19  ;;  %956 = vmatprep.mubr.f32.mxu0 %v955_v2  ;;  %v976_v48 = vand.u32 4294901760, %v975_v7  ;;  %v985_v2 = vand.u32 4294901760, %v984_v56  ;;  %v7685_v7 = vld [vmem:[#allocation56_spill] sm:$0xff]  ;;  %v7686_v56 = vld [vmem:[#allocation39_spill] sm:$0xff] }
  0xe3   : > { %1411 = vmatprep.mubr.f32.mxu1 %v5685_v60  ;;  %1561 = vmatpush2.msra.mxu0 %v4928_v47 }
  0xe4   : > { %1562 = vmatprep.subr.mxu0 %v7463_v3  ;;  %1940 = vmatpush2.msra.mxu1 %v7682_v63 }
  0xe5   : > { %962 = vmatmul.mubr.f32.gmra.mxu0 %v961_v9  ;;  %1941 = vmatprep.subr.mxu1 %v7463_v3  ;;  %v991_v9 = vand.u32 4294901760, %v990_v37  ;;  %v7689_v37 = vld [vmem:[#allocation45_spill] sm:$0xff] }
  0xe6   : > { %1413 = vmatmul.mubr.f32.gmra.mxu1 %v5707_v32  ;;  %971 = vmatprep.mubr.f32.mxu0 %v970_v14  ;;  %v7687_v14 = vld [vmem:[#allocation43_spill] sm:$0xff]  ;;  %v7698_v49 = vand.u32 4294901760, %v7689_v37 }
  0xe7   : > { %1418 = vmatprep.mubr.f32.mxu1 %v5724_v18  ;;  %1565 = vmatpush2.msra.mxu0 %v7683_v20 }
  0xe8   : > { %1566 = vmatprep.subr.mxu0 %v7463_v3  ;;  %1943 = vmatpush2.msra.mxu1 %v7684_v61 }
  0xe9   : > { %977 = vmatmul.mubr.f32.gmra.mxu0 %v976_v48  ;;  %1944 = vmatprep.subr.mxu1 %v7463_v3  ;;  %v7688_v48 = vld [vmem:[#allocation44_spill] sm:$0xff] }
  0xea   : > { %1420 = vmatmul.mubr.f32.gmra.mxu1 %v5744_v17  ;;  %986 = vmatprep.mubr.f32.mxu0 %v985_v2  ;;  %v7690_v2 = vld [vmem:[#allocation48_spill] sm:$0xff]  ;;  %v7701_v17 = vand.u32 4294901760, %v4560_v50  ;;  %v7707_v50 = vld [vmem:[#allocation65_spill] sm:$0xff] }
  0xeb   : > { %1425 = vmatprep.mubr.f32.mxu1 %v5754_v15  ;;  %1569 = vmatpush2.msra.mxu0 %v7685_v7  ;;  %v7697_v15 = vld [vmem:[#allocation57_spill] sm:$0xff] }
  0xec   : > { %1570 = vmatprep.subr.mxu0 %v7463_v3  ;;  %1946 = vmatpush2.msra.mxu1 %v7686_v56 }
  0xed   : > { %992 = vmatmul.mubr.f32.gmra.mxu0 %v991_v9  ;;  %1947 = vmatprep.subr.mxu1 %v7463_v3  ;;  %v7691_v9 = vld [vmem:[#allocation46_spill] sm:$0xff] }
  0xee   : > { %1427 = vmatmul.mubr.f32.gmra.mxu1 %v5777_v22  ;;  %1573 = vmatpush2.msra.mxu0 %v4979_v53  ;;  %v7694_v22 = vld [vmem:[#allocation51_spill] sm:$0xff] }
  0xef   : > { %1432 = vmatprep.mubr.f32.mxu1 %v5784_v8  ;;  %1576 = vmatprep.mubr.f32.mxu0 %v7687_v14  ;;  %v7693_v8 = vld [vmem:[#allocation50_spill] sm:$0xff] }
  0xf0   : > { %1949 = vmatpush2.msra.mxu1 %v7688_v48  ;;  %2312 = vmatprep.subr.mxu0 %v7463_v3 }
  0xf1   : > { %1579 = vmatmul.mubr.f32.vlgmr.msra.gmra.mxu0 %v7689_v37  ;;  %1950 = vmatprep.subr.mxu1 %v7463_v3 }
  0xf2   : > { %1434 = vmatmul.mubr.f32.gmra.mxu1 %v5804_v23  ;;  %1585 = vmatprep.mubr.f32.mxu0 %v7690_v2  ;;  %v7695_v23 = vld [vmem:[#allocation53_spill] sm:$0xff] }
  0xf3   : > { %1439 = vmatprep.mubr.f32.mxu1 %v5814_v16  ;;  %1952 = vmatpush2.msra.mxu1 %v7691_v9  ;;  %v7696_v16 = vand.u32 4294901760, %v7687_v14  ;;  %v7703_v14 = vld [vmem:[#allocation63_spill] sm:$0xff]  ;;  %v7704_v37 = vand.u32 4294901760, %v7695_v23 }
  0xf4   : > { %1953 = vmatprep.subr.mxu1 %v7463_v3  ;;  %2316 = vmatpush1.msra.mxu0 %v7692_v21  ;;  %v7699_v21 = vld [vmem:[#allocation59_spill] sm:$0xff] }
  0xf5   : > { %1588 = vmatmul.mubr.f32.gmra.mxu0 %v7693_v8  ;;  %1955 = vmatpush2.msra.mxu1 %v7694_v22 }
  0xf6   : > { %1441 = vmatmul.mubr.f32.gmra.mxu1 %v5831_v58  ;;  %1956 = vmatprep.subr.mxu1 %v7463_v3  ;;  %v7700_v58 = vand.u32 4294901760, %v7690_v2  ;;  %v7714_v2 = vld [vmem:[#allocation5_spill] sm:$0xff] }
  0xf7   : > { %1594 = vmatprep.mubr.f32.mxu0 %v7695_v23  ;;  %1958 = vmatpush2.msra.mxu1 %v4934_v11  ;;  %v7713_v23 = vand.u32 4294901760, %v7703_v14 }
  0xf8   : > { %1962 = vmatprep.mubr.f32.mxu1 %v7696_v16  ;;  %2317 = vmatprep.subr.mxu0 %v7463_v3  ;;  %v7702_v16 = vand.u32 4294901760, %v7693_v8  ;;  %v7709_v8 = vand.u32 4294901760, %v4570_v54  ;;  %v7717_v54 = vand.u32 4294901760, %v5058_v28 }
  0xf9   : > { %1597 = vmatmul.mubr.f32.gmra.mxu0 %v7697_v15  ;;  %2697 = vmatprep.subr.mxu1 %v7463_v3 }
  0xfa   : > { %1966 = vmatmul.mubr.f32.vlgmr.msra.gmra.mxu1 %v7698_v49  ;;  %1603 = vmatprep.mubr.f32.mxu0 %v7699_v21  ;;  %v7715_v49 = vand.u32 4294901760, %v7714_v2  ;;  %v7742_v2 = vld [vmem:[#allocation92_spill] sm:$0xff] }
  0xfb   : > { %1973 = vmatprep.mubr.f32.mxu1 %v7700_v58  ;;  %2321 = vmatpush1.msra.mxu0 %v7701_v17  ;;  %v7705_v58 = vand.u32 4294901760, %v4565_v52  ;;  %v7708_v17 = vand.u32 4294901760, %v7699_v21  ;;  %v7711_v52 = vand.u32 4294901760, %v5022_v10  ;;  %v7719_v21 = vand.u32 4294901760, %v7707_v50 }
  0xfc   : > { %2322 = vmatprep.subr.mxu0 %v7463_v3  ;;  %2699 = vmatpush1.msra.mxu1 %v4538_v38  ;;  %v7706_v38 = vand.u32 4294901760, %v7697_v15  ;;  %v7712_v15 = vld [vmem:[#allocation69_spill] sm:$0xff] }
  0xfd   : > { %1606 = vmatmul.mubr.f32.gmra.mxu0 %v5022_v10  ;;  %2700 = vmatprep.subr.mxu1 %v7463_v3  ;;  %v7718_v10 = vld [vmem:[#allocation73_spill] sm:$0xff] }
  0xfe   : > { %1977 = vmatmul.mubr.f32.gmra.mxu1 %v7702_v16  ;;  %1612 = vmatprep.mubr.f32.mxu0 %v7703_v14  ;;  %v7720_v16 = vand.u32 4294901760, %v4588_v0  ;;  %v7723_v14 = vand.u32 4294901760, %v7712_v15 }
  0xff   : > { %1984 = vmatprep.mubr.f32.mxu1 %v7704_v37  ;;  %2326 = vmatpush1.msra.mxu0 %v7705_v58  ;;  %v7724_v37 = vand.u32 4294901760, %v4601_v4  ;;  %v7727_v58 = vld [vmem:[#allocation80_spill] sm:$0xff]  ;;  %v7731_v4 = vand.u32 4294901760, %v5141_v26 }
 0x100   : > { %2327 = vmatprep.subr.mxu0 %v7463_v3  ;;  %2702 = vmatpush1.msra.mxu1 %v4540_v39  ;;  %v7710_v39 = vld [vmem:[#allocation67_spill] sm:$0xff] }
 0x101   : > { %1615 = vmatmul.mubr.f32.gmra.mxu0 %v5058_v28  ;;  %2703 = vmatprep.subr.mxu1 %v7463_v3  ;;  %v7722_v28 = vld [vmem:[#allocation77_spill] sm:$0xff] }
 0x102   : > { %1988 = vmatmul.mubr.f32.gmra.mxu1 %v7706_v38  ;;  %1621 = vmatprep.mubr.f32.mxu0 %v7707_v50  ;;  %v7728_v38 = vand.u32 4294901760, %v7718_v10  ;;  %v7729_v50 = vand.u32 4294901760, %v4618_v13 }
 0x103   : > { %1995 = vmatprep.mubr.f32.mxu1 %v7708_v17  ;;  %2331 = vmatpush1.msra.mxu0 %v7709_v8  ;;  %v7732_v17 = vld [vmem:[#allocation84_spill] sm:$0xff]  ;;  %v7733_v8 = vand.u32 4294901760, %v7722_v28 }
 0x104   : > { %2332 = vmatprep.subr.mxu0 %v7463_v3  ;;  %2705 = vmatpush1.msra.mxu1 %v4542_v40  ;;  %v7716_v40 = vld [vmem:[#allocation71_spill] sm:$0xff] }
 0x105   : > { %1624 = vmatmul.mubr.f32.gmra.mxu0 %v7710_v39  ;;  %2706 = vmatprep.subr.mxu1 %v7463_v3  ;;  %v7726_v0 = vand.u32 4294901760, %v7716_v40 }
 0x106   : > { %1999 = vmatmul.mubr.f32.gmra.mxu1 %v7711_v52  ;;  %1630 = vmatprep.mubr.f32.mxu0 %v7712_v15  ;;  %v7739_v15 = vand.u32 4294901760, %v7727_v58 }
 0x107   : > { %2006 = vmatprep.mubr.f32.mxu1 %v7713_v23  ;;  %2336 = vmatpush1.msra.mxu0 %v7715_v49  ;;  %v7740_v23 = vand.u32 4294901760, %v4639_v24  ;;  %v7743_v49 = vand.u32 4294901760, %v7732_v17 }
 0x108   : > { %2337 = vmatprep.subr.mxu0 %v7463_v3  ;;  %2708 = vmatpush1.msra.mxu1 %v4547_v44  ;;  %v7721_v44 = vand.u32 4294901760, %v7710_v39  ;;  %v7734_v39 = vld [vmem:[#allocation7_spill] sm:$0xff] }
 0x109   : > { %1633 = vmatmul.mubr.f32.gmra.mxu0 %v7716_v40  ;;  %2709 = vmatprep.subr.mxu1 %v7463_v3  ;;  %v7735_v52 = vand.u32 4294901760, %v7734_v39  ;;  %v7744_v40 = vand.u32 4294901760, %v4652_v30  ;;  %v7751_v30 = vand.u32 4294901760, %v5261_v35 }
 0x10a   : > { %2010 = vmatmul.mubr.f32.gmra.mxu1 %v7717_v54  ;;  %1639 = vmatprep.mubr.f32.mxu0 %v7718_v10  ;;  %v7747_v54 = vld [vmem:[#allocation95_spill] sm:$0xff] }
 0x10b   : > { %2017 = vmatprep.mubr.f32.mxu1 %v7719_v21  ;;  %2341 = vmatpush1.msra.mxu0 %v7720_v16  ;;  %v7749_v21 = vand.u32 4294901760, %v4665_v42  ;;  %v7752_v16 = vld [vmem:[#allocation99_spill] sm:$0xff]  ;;  %v7756_v42 = vld [vmem:[#allocation8_spill] sm:$0xff] }
 0x10c   : > { %2342 = vmatprep.subr.mxu0 %v7463_v3  ;;  %2711 = vmatpush1.msra.mxu1 %v4549_v45  ;;  %v7725_v45 = vld [vmem:[#allocation79_spill] sm:$0xff] }
 0x10d   : > { %1642 = vmatmul.mubr.f32.gmra.mxu0 %v5141_v26  ;;  %2712 = vmatprep.subr.mxu1 %v7463_v3  ;;  %v7737_v13 = vand.u32 4294901760, %v7725_v45  ;;  %v7738_v26 = vld [vmem:[#allocation88_spill] sm:$0xff] }
 0x10e   : > { %2021 = vmatmul.mubr.f32.gmra.mxu1 %v7721_v44  ;;  %1648 = vmatprep.mubr.f32.mxu0 %v7722_v28  ;;  %v7748_v10 = vand.u32 4294901760, %v7738_v26  ;;  %v7753_v44 = vand.u32 4294901760, %v7742_v2  ;;  %v7754_v28 = vld [vmem:[#allocation12_spill] sm:$0xff] }
 0x10f   : > { %2028 = vmatprep.mubr.f32.mxu1 %v7723_v14  ;;  %2346 = vmatpush1.msra.mxu0 %v7724_v37  ;;  %v7755_v14 = vand.u32 4294901760, %v7754_v28 }
 0x110   : > { %2347 = vmatprep.subr.mxu0 %v7463_v3  ;;  %2714 = vmatpush1.msra.mxu1 %v4551_v46  ;;  %v7730_v46 = vld [vmem:[#allocation82_spill] sm:$0xff] }
 0x111   : > { %1651 = vmatmul.mubr.f32.gmra.mxu0 %v7725_v45  ;;  %2715 = vmatprep.subr.mxu1 %v7463_v3  ;;  %v7760_v45 = vand.u32 4294901760, %v7747_v54 }
 0x112   : > { %2032 = vmatmul.mubr.f32.gmra.mxu1 %v7726_v0  ;;  %1657 = vmatprep.mubr.f32.mxu0 %v7727_v58  ;;  %v7761_v0 = vld [vmem:[#allocation14_spill] sm:$0xff] }
 0x113   : > { %2039 = vmatprep.mubr.f32.mxu1 %v7728_v38  ;;  %2351 = vmatpush1.msra.mxu0 %v7729_v50  ;;  %v7762_v58 = vand.u32 4294901760, %v7761_v0  ;;  %v7763_v38 = vld [vmem:[#allocation9_spill] sm:$0xff] }
 0x114   : > { %2352 = vmatprep.subr.mxu0 %v7463_v3  ;;  %2717 = vmatpush1.msra.mxu1 %v4562_v51  ;;  %v7736_v51 = vld [vmem:[#allocation86_spill] sm:$0xff]  ;;  %v7764_v50 = vld [vmem:[#allocation105_spill] sm:$0xff] }
 0x115   : > { %1660 = vmatmul.mubr.f32.gmra.mxu0 %v7730_v46  ;;  %2718 = vmatprep.subr.mxu1 %v7463_v3  ;;  %v7746_v24 = vand.u32 4294901760, %v7736_v51 }
 0x116   : > { %2043 = vmatmul.mubr.f32.gmra.mxu1 %v7731_v4  ;;  %1666 = vmatprep.mubr.f32.mxu0 %v7732_v17  ;;  %v7766_v4 = vld [vmem:[#allocation108_spill] sm:$0xff]  ;;  %v7767_v17 = vand.u32 4294901760, %v7752_v16 }
 0x117   : > { %2050 = vmatprep.mubr.f32.mxu1 %v7733_v8  ;;  %2356 = vmatpush1.msra.mxu0 %v7735_v52  ;;  %v7768_v8 = vld [vmem:[#allocation16_spill] sm:$0xff]  ;;  %v7770_v52 = vld [vmem:[#allocation10_spill] sm:$0xff] }
 0x118   : > { %2357 = vmatprep.subr.mxu0 %v7463_v3  ;;  %2720 = vmatpush1.msra.mxu1 %v4579_v59  ;;  %v7741_v59 = vand.u32 4294901760, %v7730_v46  ;;  %v7769_v39 = vand.u32 4294901760, %v7768_v8 }
 0x119   : > { %1669 = vmatmul.mubr.f32.gmra.mxu0 %v7736_v51  ;;  %2721 = vmatprep.subr.mxu1 %v7463_v3 }
 0x11a   : > { %2054 = vmatmul.mubr.f32.gmra.mxu1 %v7737_v13  ;;  %1675 = vmatprep.mubr.f32.mxu0 %v7738_v26  ;;  %v7771_v13 = vld [vmem:[#allocation110_spill] sm:$0xff] }
 0x11b   : > { %2061 = vmatprep.mubr.f32.mxu1 %v7739_v15  ;;  %2361 = vmatpush1.msra.mxu0 %v7740_v23  ;;  %v7773_v15 = vld [vmem:[#allocation111_spill] sm:$0xff] }
 0x11c   : > { %2362 = vmatprep.subr.mxu0 %v7463_v3  ;;  %2723 = vmatpush1.msra.mxu1 %v4584_v62  ;;  %v7745_v62 = vld [vmem:[#allocation94_spill] sm:$0xff]  ;;  %v7788_v0 = vand.u32 4294901760, %v7773_v15 }
 0x11d   : > { %1678 = vmatmul.mubr.f32.gmra.mxu0 %v5261_v35  ;;  %2724 = vmatprep.subr.mxu1 %v7463_v3  ;;  %v7758_v37 = vand.u32 4294901760, %v7745_v62  ;;  %v7759_v35 = vld [vmem:[#allocation103_spill] sm:$0xff] }
 0x11e   : > { %2065 = vmatmul.mubr.f32.gmra.mxu1 %v7741_v59  ;;  %1684 = vmatprep.mubr.f32.mxu0 %v7742_v2  ;;  %v7774_v59 = vand.u32 4294901760, %v7759_v35  ;;  %v7775_v2 = vld [vmem:[#allocation18_spill] sm:$0xff] }
 0x11f   : > { %2072 = vmatprep.mubr.f32.mxu1 %v7743_v49  ;;  %2366 = vmatpush1.msra.mxu0 %v7744_v40  ;;  %v7776_v49 = vand.u32 4294901760, %v7775_v2  ;;  %v7777_v40 = vld [vmem:[#allocation11_spill] sm:$0xff]  ;;  %v7798_v2 = vld [vmem:[#allocation17_spill] sm:$0xff] }
 0x120   : > { %2367 = vmatprep.subr.mxu0 %v7463_v3  ;;  %2726 = vmatpush1.msra.mxu1 %v4604_v5  ;;  %v7750_v5 = vld [vmem:[#allocation97_spill] sm:$0xff] }
 0x121   : > { %1687 = vmatmul.mubr.f32.gmra.mxu0 %v7745_v62  ;;  %2727 = vmatprep.subr.mxu1 %v7463_v3  ;;  %v7765_v46 = vand.u32 4294901760, %v7750_v5 }
 0x122   : > { %2076 = vmatmul.mubr.f32.gmra.mxu1 %v7746_v24  ;;  %1693 = vmatprep.mubr.f32.mxu0 %v7747_v54  ;;  %v7778_v24 = vld [vmem:[#allocation113_spill] sm:$0xff]  ;;  %v7779_v54 = vand.u32 4294901760, %v7764_v50 }
 0x123   : > { %2083 = vmatprep.mubr.f32.mxu1 %v7748_v10  ;;  %2371 = vmatpush1.msra.mxu0 %v7749_v21  ;;  %v7780_v10 = vld [vmem:[#allocation115_spill] sm:$0xff] }
 0x124   : > { %2372 = vmatprep.subr.mxu0 %v7463_v3  ;;  %2729 = vmatpush1.msra.mxu1 %v7585_v57  ;;  %v7757_v57 = vld [vmem:[#allocation101_spill] sm:$0xff] }
 0x125   : > { %1696 = vmatmul.mubr.f32.gmra.mxu0 %v7750_v5  ;;  %2730 = vmatprep.subr.mxu1 %v7463_v3  ;;  %v7772_v26 = vand.u32 4294901760, %v7757_v57  ;;  %v7781_v5 = vand.u32 4294901760, %v7766_v4 }
 0x126   : > { %2087 = vmatmul.mubr.f32.gmra.mxu1 %v7751_v30  ;;  %1702 = vmatprep.mubr.f32.mxu0 %v7752_v16  ;;  %v7782_v30 = vld [vmem:[#allocation20_spill] sm:$0xff] }
 0x127   : > { %2094 = vmatprep.mubr.f32.mxu1 %v7753_v44  ;;  %2376 = vmatpush1.msra.mxu0 %v7755_v14  ;;  %v7783_v16 = vand.u32 4294901760, %v7782_v30  ;;  %v7784_v44 = vld [vmem:[#allocation13_spill] sm:$0xff]  ;;  %v7803_v30 = vld [vmem:[#allocation26_spill] sm:$0xff] }
 0x128   : > { %2377 = vmatprep.subr.mxu0 %v7463_v3  ;;  %2732 = vmatpush1.msra.mxu1 %v7756_v42  ;;  %v7785_v14 = vld [vmem:[#allocation117_spill] sm:$0xff] }
 0x129   : > { %1705 = vmatmul.mubr.f32.gmra.mxu0 %v7757_v57  ;;  %2733 = vmatprep.subr.mxu1 %v7463_v3  ;;  %v7786_v57 = vand.u32 4294901760, %v7771_v13 }
 0x12a   : > { %2098 = vmatmul.mubr.f32.gmra.mxu1 %v7758_v37  ;;  %1711 = vmatprep.mubr.f32.mxu0 %v7759_v35  ;;  %v7787_v37 = vld [vmem:[#allocation118_spill] sm:$0xff] }
 0x12b   : > { %2105 = vmatprep.mubr.f32.mxu1 %v7760_v45  ;;  %2381 = vmatpush1.msra.mxu0 %v7762_v58  ;;  %v7789_v58 = vld [vmem:[#allocation22_spill] sm:$0xff] }
 0x12c   : > { %2382 = vmatprep.subr.mxu0 %v7463_v3  ;;  %2735 = vmatpush1.msra.mxu1 %v7763_v38  ;;  %v7790_v38 = vand.u32 4294901760, %v7789_v58 }
 0x12d   : > { %1714 = vmatmul.mubr.f32.gmra.mxu0 %v7764_v50  ;;  %2736 = vmatprep.subr.mxu1 %v7463_v3 }
 0x12e   : > { %2109 = vmatmul.mubr.f32.gmra.mxu1 %v7765_v46  ;;  %1720 = vmatprep.mubr.f32.mxu0 %v7766_v4  ;;  %v7791_v46 = vld [vmem:[#allocation15_spill] sm:$0xff] }
 0x12f   : > { %2116 = vmatprep.mubr.f32.mxu1 %v7767_v17  ;;  %2386 = vmatpush1.msra.mxu0 %v7769_v39  ;;  %v7792_v17 = vld [vmem:[#allocation120_spill] sm:$0xff]  ;;  %v7793_v39 = vand.u32 4294901760, %v7778_v24 }
 0x130   : > { %2387 = vmatprep.subr.mxu0 %v7463_v3  ;;  %2738 = vmatpush1.msra.mxu1 %v7770_v52  ;;  %v7794_v52 = vld [vmem:[#allocation122_spill] sm:$0xff] }
 0x131   : > { %v528_v51 = vpop.f32.mrf.mxu0  ;;  %1723 = vmatmul.mubr.f32.gmra.mxu0 %v7771_v13  ;;  %2739 = vmatprep.subr.mxu1 %v7463_v3 }
 0x132   : > { %2120 = vmatmul.mubr.f32.gmra.mxu1 %v7772_v26  ;;  %1729 = vmatprep.mubr.f32.mxu0 %v7773_v15  ;;  %v7795_v26 = vand.u32 4294901760, %v7780_v10  ;;  %v7796_v15 = vld [vmem:[#allocation24_spill] sm:$0xff] }
 0x133   : > { %v530_v23 = vpop.f32.mrf.mxu0  ;;  %2127 = vmatprep.mubr.f32.mxu1 %v7774_v59  ;;  %2391 = vmatpush1.msra.mxu0 %v7776_v49 }
 0x134   : > { %2392 = vmatprep.subr.mxu0 %v7463_v3  ;;  %2741 = vmatpush1.msra.mxu1 %v7777_v40  ;;  %v7797_v23 = vand.u32 4294901760, %v7796_v15  ;;  %v7799_v40 = vld [vmem:[#allocation125_spill] sm:$0xff]  ;;  %v7815_v15 = vld [vmem:[#allocation134_spill] sm:$0xff] }
 0x135   : > { %v543_v62 = vpop.f32.mrf.mxu0  ;;  %1732 = vmatmul.mubr.f32.gmra.mxu0 %v7778_v24  ;;  %2742 = vmatprep.subr.mxu1 %v7463_v3 }
 0x136   : > { %2131 = vmatmul.mubr.f32.gmra.mxu1 %v7779_v54  ;;  %1738 = vmatprep.mubr.f32.mxu0 %v7780_v10  ;;  %v7801_v54 = vld [vmem:[#allocation127_spill] sm:$0xff] }
 0x137   : > { %v545_v21 = vpop.f32.mrf.mxu0  ;;  %2138 = vmatprep.mubr.f32.mxu1 %v7781_v5  ;;  %2396 = vmatpush2.msra.mxu0 %v7783_v16  ;;  %v7802_v5 = vand.u32 4294901760, %v7787_v37  ;;  %v7804_v16 = vand.u32 4294901760, %v7803_v30  ;;  %v7821_v30 = vld [vmem:[#allocation138_spill] sm:$0xff] }
 0x138   : > { %2397 = vmatprep.subr.mxu0 %v7463_v3  ;;  %2744 = vmatpush1.msra.mxu1 %v7784_v44 }
 0x139   : > { %v558_v28 = vpop.f32.mrf.mxu0  ;;  %1741 = vmatmul.mubr.f32.gmra.mxu0 %v7785_v14  ;;  %2745 = vmatprep.subr.mxu1 %v7463_v3 }
 0x13a   : > { %v1225_v42 = vpop.f32.mrf.mxu1  ;;  %2142 = vmatmul.mubr.f32.gmra.mxu1 %v7786_v57  ;;  %1747 = vmatprep.mubr.f32.mxu0 %v7787_v37 }
 0x13b   : > { %v6096_v35 = vadd.f32 %v1225_v42, %v528_v51  ;;  %v560_v45 = vpop.f32.mrf.mxu0  ;;  %2149 = vmatprep.mubr.f32.mxu1 %v7788_v0  ;;  %2401 = vmatpush2.msra.mxu0 %v7790_v38  ;;  %v7805_v42 = vld [vmem:[#allocation19_spill] sm:$0xff]  ;;  %v7808_v0 = vld [vmem:[#allocation130_spill] sm:$0xff]  ;;  %v7809_v38 = vand.u32 4294901760, %v7794_v52 }
 0x13c   : > { %v1227_v50 = vpop.f32.mrf.mxu1  ;;  %2402 = vmatprep.subr.mxu0 %v7463_v3  ;;  %2747 = vmatpush2.msra.mxu1 %v7791_v46  ;;  %v7806_v45 = vld [vmem:[#allocation128_spill] sm:$0xff] }
 0x13d   : > { %v573_v4 = vpop.f32.mrf.mxu0  ;;  %1750 = vmatmul.mubr.f32.gmra.mxu0 %v7792_v17  ;;  %2748 = vmatprep.subr.mxu1 %v7463_v3  ;;  %v7810_v50 = vld [vmem:[#allocation28_spill] sm:$0xff] }
 0x13e   : > { %v1232_v8 = vpop.f32.mrf.mxu1  ;;  %2153 = vmatmul.mubr.f32.gmra.mxu1 %v7793_v39  ;;  %1756 = vmatprep.mubr.f32.mxu0 %v7794_v52  ;;  %v7811_v46 = vand.u32 4294901760, %v7810_v50  ;;  %v7812_v39 = vld [vmem:[#allocation21_spill] sm:$0xff] }
 0x13f   : > { %v6109_v51 = vadd.f32 %v1232_v8, %v543_v62  ;;  %v575_v13 = vpop.f32.mrf.mxu0  ;;  %2160 = vmatprep.mubr.f32.mxu1 %v7795_v26  ;;  %2406 = vmatpush2.msra.mxu0 %v7797_v23  ;;  %v7800_v62 = vand.u32 4294901760, %v7785_v14  ;;  %v7813_v26 = vld [vmem:[#allocation132_spill] sm:$0xff] }
 0x140   : > { %v1234_v59 = vpop.f32.mrf.mxu1  ;;  %2407 = vmatprep.subr.mxu0 %v7463_v3  ;;  %2750 = vmatpush2.msra.mxu1 %v7798_v2  ;;  %v7817_v2 = vld [vmem:[#allocation30_spill] sm:$0xff] }
 0x141   : > { %v588_v49 = vpop.f32.mrf.mxu0  ;;  %1759 = vmatmul.mubr.f32.gmra.mxu0 %v7799_v40  ;;  %2751 = vmatprep.subr.mxu1 %v7463_v3  ;;  %v7816_v59 = vand.u32 4294901760, %v7801_v54 }
 0x142   : > { %v1239_v24 = vpop.f32.mrf.mxu1  ;;  %2164 = vmatmul.mubr.f32.gmra.mxu1 %v7800_v62  ;;  %1765 = vmatprep.mubr.f32.mxu0 %v7801_v54 }
 0x143   : > { %v6122_v10 = vadd.f32 %v1239_v24, %v558_v28  ;;  %v590_v21 = vpop.f32.mrf.mxu0  ;;  %2171 = vmatprep.mubr.f32.mxu1 %v7802_v5  ;;  %2411 = vmatpush2.msra.mxu0 %v7804_v16  ;;  %v7807_v28 = vand.u32 4294901760, %v7792_v17  ;;  %v7818_v24 = vand.u32 4294901760, %v7817_v2  ;;  %v7819_v5 = vld [vmem:[#allocation136_spill] sm:$0xff] }
 0x144   : > { %v1241_v44 = vpop.f32.mrf.mxu1  ;;  %2412 = vmatprep.subr.mxu0 %v7463_v3  ;;  %2753 = vmatpush2.msra.mxu1 %v7805_v42  ;;  %v7823_v42 = vld [vmem:[#allocation32_spill] sm:$0xff] }
 0x145   : > { %v603_v57 = vpop.f32.mrf.mxu0  ;;  %1768 = vmatmul.mubr.f32.gmra.mxu0 %v7806_v45  ;;  %2754 = vmatprep.subr.mxu1 %v7463_v3  ;;  %v7822_v44 = vand.u32 4294901760, %v7808_v0 }
 0x146   : > { %v1246_v14 = vpop.f32.mrf.mxu1  ;;  %2175 = vmatmul.mubr.f32.gmra.mxu1 %v7807_v28  ;;  %1774 = vmatprep.mubr.f32.mxu0 %v7808_v0 }
 0x147   : > { %v6135_v37 = vadd.f32 %v1246_v14, %v573_v4  ;;  %v605_v58 = vpop.f32.mrf.mxu0  ;;  %2182 = vmatprep.mubr.f32.mxu1 %v7809_v38  ;;  %2416 = vmatpush2.msra.mxu0 %v7811_v46  ;;  %v7814_v4 = vand.u32 4294901760, %v7799_v40  ;;  %v7824_v14 = vand.u32 4294901760, %v7823_v42  ;;  %v7827_v38 = vld [vmem:[#allocation142_spill] sm:$0xff]  ;;  %v7828_v46 = vand.u32 4294901760, %v7815_v15  ;;  %v7840_v42 = vld [vmem:[#allocation147_spill] sm:$0xff] }
 0x148   : > { %v1248_v8 = vpop.f32.mrf.mxu1  ;;  %2417 = vmatprep.subr.mxu0 %v7463_v3  ;;  %2756 = vmatpush2.msra.mxu1 %v7812_v39  ;;  %v7825_v58 = vld [vmem:[#allocation140_spill] sm:$0xff] }
 0x149   : > { %v618_v13 = vpop.f32.mrf.mxu0  ;;  %1777 = vmatmul.mubr.f32.gmra.mxu0 %v7813_v26  ;;  %2757 = vmatprep.subr.mxu1 %v7463_v3  ;;  %v7829_v8 = vld [vmem:[#allocation34_spill] sm:$0xff] }
 0x14a   : > { %v1253_v17 = vpop.f32.mrf.mxu1  ;;  %2186 = vmatmul.mubr.f32.gmra.mxu1 %v7814_v4  ;;  %1783 = vmatprep.mubr.f32.mxu0 %v7815_v15  ;;  %v7830_v39 = vand.u32 4294901760, %v7829_v8  ;;  %v7846_v8 = vld [vmem:[#allocation150_spill] sm:$0xff] }
 0x14b   : > { %v6148_v52 = vadd.f32 %v1253_v17, %v588_v49  ;;  %v620_v23 = vpop.f32.mrf.mxu0  ;;  %2193 = vmatprep.mubr.f32.mxu1 %v7816_v59  ;;  %2421 = vmatpush2.msra.mxu0 %v7818_v24  ;;  %v7820_v49 = vand.u32 4294901760, %v7806_v45  ;;  %v7831_v17 = vld [vmem:[#allocation27_spill] sm:$0xff]  ;;  %v7834_v59 = vld [vmem:[#allocation145_spill] sm:$0xff]  ;;  %v7835_v24 = vand.u32 4294901760, %v7821_v30 }
 0x14c   : > { %v1255_v62 = vpop.f32.mrf.mxu1  ;;  %2422 = vmatprep.subr.mxu0 %v7463_v3  ;;  %2759 = vmatpush2.msra.mxu1 %v7660_v25  ;;  %v7832_v23 = vld [vmem:[#allocation144_spill] sm:$0xff] }
 0x14d   : > { %v633_v21 = vpop.f32.mrf.mxu0  ;;  %1786 = vmatmul.mubr.f32.gmra.mxu0 %v7819_v5  ;;  %2760 = vmatprep.subr.mxu1 %v7463_v3  ;;  %v7836_v62 = vld [vmem:[#allocation36_spill] sm:$0xff] }
 0x14e   : > { %v1260_v40 = vpop.f32.mrf.mxu1  ;;  %2197 = vmatmul.mubr.f32.gmra.mxu1 %v7820_v49  ;;  %1792 = vmatprep.mubr.f32.mxu0 %v7821_v30 }
 0x14f   : > { %v6161_v54 = vadd.f32 %v1260_v40, %v603_v57  ;;  %v635_v16 = vpop.f32.mrf.mxu0  ;;  %2204 = vmatprep.mubr.f32.mxu1 %v7822_v44  ;;  %2426 = vmatpush2.msra.mxu0 %v7824_v14  ;;  %v7826_v57 = vand.u32 4294901760, %v7813_v26  ;;  %v7837_v40 = vand.u32 4294901760, %v7836_v62  ;;  %v7838_v44 = vld [vmem:[#allocation146_spill] sm:$0xff] }
 0x150   : > { %v1262_v25 = vpop.f32.mrf.mxu1  ;;  %2427 = vmatprep.subr.mxu0 %v7463_v3  ;;  %2762 = vmatpush2.msra.mxu1 %v7666_v29 }
 0x151   : > { %v648_v28 = vpop.f32.mrf.mxu0  ;;  %1795 = vmatmul.mubr.f32.gmra.mxu0 %v7825_v58  ;;  %2763 = vmatprep.subr.mxu1 %v7463_v3  ;;  %v7841_v25 = vand.u32 4294901760, %v7827_v38 }
 0x152   : > { %v1267_v45 = vpop.f32.mrf.mxu1  ;;  %2208 = vmatmul.mubr.f32.gmra.mxu1 %v7826_v57  ;;  %1801 = vmatprep.mubr.f32.mxu0 %v7827_v38 }
 0x153   : > { %v6174_v0 = vadd.f32 %v1267_v45, %v618_v13  ;;  %v650_v50 = vpop.f32.mrf.mxu0  ;;  %2215 = vmatprep.mubr.f32.mxu1 %v7828_v46  ;;  %2431 = vmatpush2.msra.mxu0 %v7830_v39  ;;  %v7833_v13 = vand.u32 4294901760, %v7819_v5  ;;  %v7842_v45 = vld [vmem:[#allocation37_spill] sm:$0xff]  ;;  %v7844_v46 = vld [vmem:[#allocation148_spill] sm:$0xff] }
 0x154   : > { %v1269_v29 = vpop.f32.mrf.mxu1  ;;  %2432 = vmatprep.subr.mxu0 %v7463_v3  ;;  %2765 = vmatpush2.msra.mxu1 %v7831_v17  ;;  %v7843_v57 = vand.u32 4294901760, %v7842_v45  ;;  %v7848_v17 = vand.u32 4294901760, %v7675_v33  ;;  %v7857_v45 = vand.u32 4294901760, %v7683_v20 }
 0x155   : > { %v663_v4 = vpop.f32.mrf.mxu0  ;;  %1804 = vmatmul.mubr.f32.gmra.mxu0 %v7832_v23  ;;  %2766 = vmatprep.subr.mxu1 %v7463_v3  ;;  %v7847_v29 = vand.u32 4294901760, %v7834_v59 }
 0x156   : > { %v1274_v26 = vpop.f32.mrf.mxu1  ;;  %2219 = vmatmul.mubr.f32.gmra.mxu1 %v7833_v13  ;;  %1810 = vmatprep.mubr.f32.mxu0 %v7834_v59  ;;  %v7850_v59 = vand.u32 4294901760, %v7840_v42 }
 0x157   : > { %v6187_v15 = vadd.f32 %v1274_v26, %v633_v21  ;;  %v665_v2 = vpop.f32.mrf.mxu0  ;;  %2226 = vmatprep.mubr.f32.mxu1 %v7835_v24  ;;  %2436 = vmatpush2.msra.mxu0 %v7837_v40  ;;  %v7839_v21 = vand.u32 4294901760, %v7825_v58  ;;  %v7852_v40 = vand.u32 4294901760, %v7844_v46 }
 0x158   : > { %v1276_v49 = vpop.f32.mrf.mxu1  ;;  %2437 = vmatprep.subr.mxu0 %v7463_v3  ;;  %2768 = vmatpush2.msra.mxu1 %v7676_v55  ;;  %v7851_v2 = vand.u32 4294901760, %v7679_v31 }
 0x159   : > { %v678_v16 = vpop.f32.mrf.mxu0  ;;  %1813 = vmatmul.mubr.f32.gmra.mxu0 %v7838_v44  ;;  %2769 = vmatprep.subr.mxu1 %v7463_v3 }
 0x15a   : > { %v1281_v5 = vpop.f32.mrf.mxu1  ;;  %2230 = vmatmul.mubr.f32.gmra.mxu1 %v7839_v21  ;;  %1819 = vmatprep.mubr.f32.mxu0 %v7840_v42  ;;  %v7855_v42 = vand.u32 4294901760, %v5774_v43 }
 0x15b   : > { %v6200_v30 = vadd.f32 %v1281_v5, %v648_v28  ;;  %v680_v14 = vpop.f32.mrf.mxu0  ;;  %2237 = vmatprep.mubr.f32.mxu1 %v7841_v25  ;;  %2441 = vmatpush2.msra.mxu0 %v7843_v57  ;;  %v7845_v28 = vand.u32 4294901760, %v7832_v23  ;;  %v7856_v25 = vand.u32 4294901760, %v5782_v6 }
 0x15c   : > { %v1283_v55 = vpop.f32.mrf.mxu1  ;;  %2442 = vmatprep.subr.mxu0 %v7463_v3  ;;  %2771 = vmatpush2.msra.mxu1 %v7680_v27 }
 0x15d   : > { %v693_v50 = vpop.f32.mrf.mxu0  ;;  %1822 = vmatmul.mubr.f32.gmra.mxu0 %v7844_v46  ;;  %2772 = vmatprep.subr.mxu1 %v7463_v3  ;;  %v7858_v55 = vand.u32 4294901760, %v5801_v12  ;;  %v7860_v46 = vand.u32 4294901760, %v5812_v1 }
 0x15e   : > { %v1288_v58 = vpop.f32.mrf.mxu1  ;;  %2241 = vmatmul.mubr.f32.gmra.mxu1 %v7845_v28  ;;  %1828 = vmatprep.mubr.f32.mxu0 %v7846_v8  ;;  %v7862_v28 = vld [vmem:[#allocation4_spill] sm:$0xff] }
 0x15f   : > { %v6213_v38 = vadd.f32 %v1288_v58, %v663_v4  ;;  %v695_v39 = vpop.f32.mrf.mxu0  ;;  %2248 = vmatprep.mubr.f32.mxu1 %v7847_v29  ;;  %2446 = vmatpush2.msra.mxu0 %v7848_v17  ;;  %v7849_v4 = vand.u32 4294901760, %v7838_v44  ;;  %v7854_v44 = vand.u32 4294901760, %v4928_v47  ;;  %v7861_v58 = vand.u32 4294901760, %v4979_v53  ;;  %v7865_v29 = vld [vmem:[#allocation41_spill] sm:$0xff] }
 0x160   : > { %v1290_v27 = vpop.f32.mrf.mxu1  ;;  %2447 = vmatprep.subr.mxu0 %v7463_v3  ;;  %2774 = vmatpush2.msra.mxu1 %v7682_v63  ;;  %v7864_v39 = vand.u32 4294901760, %v5829_v34 }
 0x161   : > { %v708_v26 = vpop.f32.mrf.mxu0  ;;  %1831 = vmatmul.mubr.f32.gmra.mxu0 %v5774_v43  ;;  %2775 = vmatprep.subr.mxu1 %v7463_v3  ;;  %v7866_v27 = vand.u32 4294901760, %v5839_v36 }
 0x162   : > { %v1295_v23 = vpop.f32.mrf.mxu1  ;;  %2252 = vmatmul.mubr.f32.gmra.mxu1 %v7849_v4  ;;  %1837 = vmatprep.mubr.f32.mxu0 %v5782_v6  ;;  %v7859_v6 = vand.u32 4294901760, %v7685_v7  ;;  %v7869_v4 = vld [vmem:[#allocation49_spill] sm:$0xff] }
 0x163   : > { %v6226_v13 = vadd.f32 %v1295_v23, %v678_v16  ;;  %v710_v33 = vpop.f32.mrf.mxu0  ;;  %2259 = vmatprep.mubr.f32.mxu1 %v7850_v59  ;;  %2451 = vmatpush2.msra.mxu0 %v7851_v2  ;;  %v7853_v16 = vand.u32 4294901760, %v7846_v8  ;;  %v7867_v23 = vld [vmem:[#allocation42_spill] sm:$0xff] }
 0x164   : > { %v1297_v63 = vpop.f32.mrf.mxu1  ;;  %2452 = vmatprep.subr.mxu0 %v7463_v3  ;;  %2777 = vmatpush2.msra.mxu1 %v7684_v61  ;;  %v7870_v2 = vld [vmem:[#allocation54_spill] sm:$0xff] }
 0x165   : > { %v723_v24 = vpop.f32.mrf.mxu0  ;;  %1840 = vmatmul.mubr.f32.gmra.mxu0 %v5801_v12  ;;  %2778 = vmatprep.subr.mxu1 %v7463_v3  ;;  %v7863_v12 = vld [vmem:[#allocation38_spill] sm:$0xff] }
 0x166   : > { %v1302_v62 = vpop.f32.mrf.mxu1  ;;  %2263 = vmatmul.mubr.f32.gmra.mxu1 %v7852_v40  ;;  %1846 = vmatprep.mubr.f32.mxu0 %v5812_v1 }
 0x167   : > { %v6239_v49 = vadd.f32 %v1302_v62, %v693_v50  ;;  %v725_v31 = vpop.f32.mrf.mxu0  ;;  %2270 = vmatprep.mubr.f32.mxu1 %v7853_v16  ;;  %2456 = vmatpush2.msra.mxu0 %v7854_v44  ;;  %v7873_v16 = vld [vmem:[#allocation60_spill] sm:$0xff] }
 0x168   : > { %v1304_v61 = vpop.f32.mrf.mxu1  ;;  %2457 = vmatprep.subr.mxu0 %v7463_v3  ;;  %2780 = vmatpush2.msra.mxu1 %v7686_v56  ;;  %v7872_v31 = vld [vmem:[#allocation58_spill] sm:$0xff] }
 0x169   : > { %v738_v5 = vpop.f32.mrf.mxu0  ;;  %1849 = vmatmul.mubr.f32.gmra.mxu0 %v5829_v34  ;;  %2781 = vmatprep.subr.mxu1 %v7463_v3 }
 0x16a   : > { %v1309_v21 = vpop.f32.mrf.mxu1  ;;  %2274 = vmatmul.mubr.f32.gmra.mxu1 %v7855_v42  ;;  %1855 = vmatprep.mubr.f32.mxu0 %v5839_v36  ;;  %v7874_v42 = vld [vmem:[#allocation61_spill] sm:$0xff] }
 0x16b   : > { %v6252_v14 = vadd.f32 %v1309_v21, %v708_v26  ;;  %v740_v47 = vpop.f32.mrf.mxu0  ;;  %2281 = vmatprep.mubr.f32.mxu1 %v7856_v25  ;;  %2461 = vmatpush2.msra.mxu0 %v7857_v45  ;;  %v7875_v25 = vld [vmem:[#allocation62_spill] sm:$0xff] }
 0x16c   : > { %v1311_v56 = vpop.f32.mrf.mxu1  ;;  %2462 = vmatprep.subr.mxu0 %v7463_v3  ;;  %2783 = vmatpush2.msra.mxu1 %v7688_v48 }
 0x16d   : > { %v753_v57 = vpop.f32.mrf.mxu0  ;;  %1858 = vmatmul.mubr.f32.gmra.mxu0 %v5851_v41  ;;  %2784 = vmatprep.subr.mxu1 %v7463_v3 }
 0x16e   : > { %v1316_v43 = vpop.f32.mrf.mxu1  ;;  %2285 = vmatmul.mubr.f32.gmra.mxu1 %v7858_v55  ;;  %2466 = vmatpush2.msra.mxu0 %v7859_v6  ;;  %v7876_v55 = vld [vmem:[#allocation64_spill] sm:$0xff] }
 0x16f   : > { %v6266_v50 = vadd.f32 %v1316_v43, %v723_v24  ;;  %v755_v20 = vpop.f32.mrf.mxu0  ;;  %2467 = vmatprep.subr.mxu0 %v7463_v3  ;;  %2292 = vmatprep.mubr.f32.mxu1 %v7860_v46 }
 0x170   : > { %v1318_v48 = vpop.f32.mrf.mxu1  ;;  %2471 = vmatpush2.msra.mxu0 %v7861_v58  ;;  %2473 = vmatprep.mubr.f32.mxu0 %v7862_v28  ;;  %v7877_v20 = vld [vmem:[#allocation66_spill] sm:$0xff] }
 0x171   : > { %v768_v8 = vpop.f32.mrf.mxu0  ;;  %2475 = vmatmul.mubr.f32.vlgmr.msra.gmra.mxu0 %v7863_v12  ;;  %2786 = vmatpush2.msra.mxu1 %v7691_v9  ;;  %v7868_v9 = vand.u32 4294901760, %v5851_v41 }
 0x172   : > { %v1323_v7 = vpop.f32.mrf.mxu1  ;;  %2296 = vmatmul.mubr.f32.gmra.mxu1 %v7864_v39  ;;  %2480 = vmatprep.mubr.f32.mxu0 %v7865_v29 }
 0x173   : > { %v6279_v17 = vadd.f32 %v1323_v7, %v738_v5  ;;  %v770_v1 = vpop.f32.mrf.mxu0  ;;  %2303 = vmatprep.mubr.f32.mxu1 %v7866_v27  ;;  %2787 = vmatprep.subr.mxu1 %v7463_v3  ;;  %v7879_v7 = vld [vmem:[#allocation70_spill] sm:$0xff] }
 0x174   : > { %v1325_v53 = vpop.f32.mrf.mxu1  ;;  %2789 = vmatpush2.msra.mxu1 %v7694_v22 }
 0x175   : > { %v783_v26 = vpop.f32.mrf.mxu0  ;;  %2482 = vmatmul.mubr.f32.gmra.mxu0 %v7867_v23  ;;  %2790 = vmatprep.subr.mxu1 %v7463_v3  ;;  %v7871_v3 = vld [vmem:[#allocation55_spill] sm:$0xff]  ;;  %v7880_v53 = vld [vmem:[#allocation72_spill] sm:$0xff] }
 0x176   : > { %v1330_v34 = vpop.f32.mrf.mxu1  ;;  %2307 = vmatmul.mubr.f32.gmra.mxu1 %v7868_v9  ;;  %2487 = vmatprep.mubr.f32.mxu0 %v7869_v4 }
 0x177   : > { %v6290_v33 = vadd.f32 %v1330_v34, %v753_v57  ;;  %v785_v36 = vpop.f32.mrf.mxu0  ;;  %2792 = vmatpush2.msra.mxu1 %v4934_v11  ;;  %2794 = vmatprep.mubr.f32.mxu1 %v7862_v28 }
 0x178   : > { %v1332_v59 = vpop.f32.mrf.mxu1 }
 0x179   : > { %v798_v22 = vpop.f32.mrf.mxu0  ;;  %2489 = vmatmul.mubr.f32.gmra.mxu0 %v7870_v2  ;;  %v7882_v59 = vld [vmem:[#allocation75_spill] sm:$0xff] }
 0x17a   : > { %v1337_v63 = vpop.f32.mrf.mxu1  ;;  %2796 = vmatmul.mubr.f32.vlgmr.msra.gmra.mxu1 %v7863_v12  ;;  %2494 = vmatprep.mubr.f32.mxu0 %v7871_v3 }
 0x17b   : > { %v6297_v41 = vadd.f32 %v1337_v63, %v768_v8  ;;  %v800_v24 = vpop.f32.mrf.mxu0  ;;  %2801 = vmatprep.mubr.f32.mxu1 %v7865_v29  ;;  %v7878_v8 = vld [vmem:[#allocation68_spill] sm:$0xff] }
 0x17c   : > { %v1339_v62 = vpop.f32.mrf.mxu1 }
 0x17d   : > { %v813_v40 = vpop.f32.mrf.mxu0  ;;  %2496 = vmatmul.mubr.f32.gmra.mxu0 %v7872_v31 }
 0x17e   : > { %v1344_v11 = vpop.f32.mrf.mxu1  ;;  %2803 = vmatmul.mubr.f32.gmra.mxu1 %v7867_v23  ;;  %2501 = vmatprep.mubr.f32.mxu0 %v7873_v16  ;;  %v7881_v23 = vld [vmem:[#allocation74_spill] sm:$0xff] }
 0x17f   : > { %v6303_v44 = vadd.f32 %v1344_v11, %v783_v26  ;;  %v815_v61 = vpop.f32.mrf.mxu0  ;;  %2808 = vmatprep.mubr.f32.mxu1 %v7869_v4  ;;  %v7885_v11 = vld [vmem:[#allocation81_spill] sm:$0xff] }
 0x180   : > { %v1346_v5 = vpop.f32.mrf.mxu1 }
 0x181   : > { %v828_v21 = vpop.f32.mrf.mxu0  ;;  %2503 = vmatmul.mubr.f32.gmra.mxu0 %v7874_v42 }
 0x182   : > { %v1351_v47 = vpop.f32.mrf.mxu1  ;;  %2810 = vmatmul.mubr.f32.gmra.mxu1 %v7870_v2  ;;  %2508 = vmatprep.mubr.f32.mxu0 %v7875_v25  ;;  %v7883_v2 = vld [vmem:[#allocation76_spill] sm:$0xff] }
 0x183   : > { %v6309_v45 = vadd.f32 %v1351_v47, %v798_v22  ;;  %v830_v56 = vpop.f32.mrf.mxu0  ;;  %2815 = vmatprep.mubr.f32.mxu1 %v7871_v3 }
 0x184   : > { %v1353_v57 = vpop.f32.mrf.mxu1 }
 0x185   : > { %v843_v43 = vpop.f32.mrf.mxu0  ;;  %2510 = vmatmul.mubr.f32.gmra.mxu0 %v7876_v55 }
 0x186   : > { %v1358_v6 = vpop.f32.mrf.mxu1  ;;  %2817 = vmatmul.mubr.f32.gmra.mxu1 %v7872_v31  ;;  %2515 = vmatprep.mubr.f32.mxu0 %v7877_v20 }
 0x187   : > { %v6315_v46 = vadd.f32 %v1358_v6, %v813_v40  ;;  %v845_v48 = vpop.f32.mrf.mxu0  ;;  %2822 = vmatprep.mubr.f32.mxu1 %v7873_v16  ;;  %v7884_v40 = vld [vmem:[#allocation78_spill] sm:$0xff]  ;;  %v7888_v6 = vld [vmem:[#allocation87_spill] sm:$0xff] }
 0x188   : > { %v1360_v58 = vpop.f32.mrf.mxu1  ;;  %v7889_v48 = vld [vmem:[#allocation89_spill] sm:$0xff] }
 0x189   : > { %v858_v28 = vpop.f32.mrf.mxu0  ;;  %2517 = vmatmul.mubr.f32.gmra.mxu0 %v7878_v8 }
 0x18a   : > { %v1365_v12 = vpop.f32.mrf.mxu1  ;;  %2824 = vmatmul.mubr.f32.gmra.mxu1 %v7874_v42  ;;  %2522 = vmatprep.mubr.f32.mxu0 %v7879_v7  ;;  %v7886_v42 = vld [vmem:[#allocation83_spill] sm:$0xff] }
 0x18b   : > { %v6321_v39 = vadd.f32 %v1365_v12, %v828_v21  ;;  %v860_v29 = vpop.f32.mrf.mxu0  ;;  %2829 = vmatprep.mubr.f32.mxu1 %v7875_v25  ;;  %v7887_v25 = vld [vmem:[#allocation85_spill] sm:$0xff] }
 0x18c   : > { %v1367_v1 = vpop.f32.mrf.mxu1 }
 0x18d   : > { %v873_v27 = vpop.f32.mrf.mxu0  ;;  %2524 = vmatmul.mubr.f32.gmra.mxu0 %v7880_v53  ;;  %v7891_v1 = vld [vmem:[#allocation91_spill] sm:$0xff] }
 0x18e   : > { %v1372_v26 = vpop.f32.mrf.mxu1  ;;  %2831 = vmatmul.mubr.f32.gmra.mxu1 %v7876_v55  ;;  %2529 = vmatprep.mubr.f32.mxu0 %v7881_v23 }
 0x18f   : > { %v6327_v34 = vadd.f32 %v1372_v26, %v843_v43  ;;  %v875_v9 = vpop.f32.mrf.mxu0  ;;  %2836 = vmatprep.mubr.f32.mxu1 %v7877_v20 }
 0x190   : > { %v1374_v4 = vpop.f32.mrf.mxu1  ;;  %v7892_v9 = vld [vmem:[#allocation93_spill] sm:$0xff] }
 0x191   : > { %v888_v36 = vpop.f32.mrf.mxu0  ;;  %2531 = vmatmul.mubr.f32.gmra.mxu0 %v7882_v59 }
 0x192   : > { %v1379_v22 = vpop.f32.mrf.mxu1  ;;  %2838 = vmatmul.mubr.f32.gmra.mxu1 %v7878_v8  ;;  %2536 = vmatprep.mubr.f32.mxu0 %v7883_v2 }
 0x193   : > { %v6333_v63 = vadd.f32 %v1379_v22, %v858_v28  ;;  %v890_v3 = vpop.f32.mrf.mxu0  ;;  %2843 = vmatprep.mubr.f32.mxu1 %v7879_v7  ;;  %v7890_v7 = vld [vmem:[#allocation90_spill] sm:$0xff] }
 0x194   : > { %v1381_v24 = vpop.f32.mrf.mxu1 }
 0x195   : > { %v903_v62 = vpop.f32.mrf.mxu0  ;;  %2538 = vmatmul.mubr.f32.gmra.mxu0 %v7884_v40  ;;  %v7894_v24 = vld [vmem:[#allocation98_spill] sm:$0xff] }
 0x196   : > { %v1386_v31 = vpop.f32.mrf.mxu1  ;;  %2845 = vmatmul.mubr.f32.gmra.mxu1 %v7880_v53  ;;  %2543 = vmatprep.mubr.f32.mxu0 %v7885_v11 }
 0x197   : > { %v6339_v16 = vadd.f32 %v1386_v31, %v873_v27  ;;  %v905_v61 = vpop.f32.mrf.mxu0  ;;  %2850 = vmatprep.mubr.f32.mxu1 %v7881_v23 }
 0x198   : > { %v1388_v5 = vpop.f32.mrf.mxu1 }
 0x199   : > { %v918_v21 = vpop.f32.mrf.mxu0  ;;  %2545 = vmatmul.mubr.f32.gmra.mxu0 %v7886_v42 }
 0x19a   : > { %v1393_v47 = vpop.f32.mrf.mxu1  ;;  %2852 = vmatmul.mubr.f32.gmra.mxu1 %v7882_v59  ;;  %2550 = vmatprep.mubr.f32.mxu0 %v7887_v25 }
 0x19b   : > { %v6345_v56 = vadd.f32 %v1393_v47, %v888_v36  ;;  %v920_v57 = vpop.f32.mrf.mxu0  ;;  %2857 = vmatprep.mubr.f32.mxu1 %v7883_v2  ;;  %v7893_v36 = vld [vmem:[#allocation96_spill] sm:$0xff] }
 0x19c   : > { %v1395_v43 = vpop.f32.mrf.mxu1  ;;  %v7897_v47 = vld [vmem:[#allocation104_spill] sm:$0xff] }
 0x19d   : > { %v933_v55 = vpop.f32.mrf.mxu0  ;;  %2552 = vmatmul.mubr.f32.gmra.mxu0 %v7888_v6 }
 0x19e   : > { %v1400_v20 = vpop.f32.mrf.mxu1  ;;  %2859 = vmatmul.mubr.f32.gmra.mxu1 %v7884_v40  ;;  %2557 = vmatprep.mubr.f32.mxu0 %v7889_v48  ;;  %v7895_v40 = vld [vmem:[#allocation100_spill] sm:$0xff] }
 0x19f   : > { %v6351_v58 = vadd.f32 %v1400_v20, %v903_v62  ;;  %v935_v28 = vpop.f32.mrf.mxu0  ;;  %2864 = vmatprep.mubr.f32.mxu1 %v7885_v11 }
 0x1a0   : > { %v1402_v8 = vpop.f32.mrf.mxu1  ;;  %v7899_v28 = vld [vmem:[#allocation107_spill] sm:$0xff] }
 0x1a1   : > { %v948_v12 = vpop.f32.mrf.mxu0  ;;  %2559 = vmatmul.mubr.f32.gmra.mxu0 %v7890_v7 }
 0x1a2   : > { %v1407_v29 = vpop.f32.mrf.mxu1  ;;  %2866 = vmatmul.mubr.f32.gmra.mxu1 %v7886_v42  ;;  %2564 = vmatprep.mubr.f32.mxu0 %v7891_v1 }
 0x1a3   : > { %v6357_v27 = vadd.f32 %v1407_v29, %v918_v21  ;;  %v950_v53 = vpop.f32.mrf.mxu0  ;;  %2871 = vmatprep.mubr.f32.mxu1 %v7887_v25  ;;  %v7896_v21 = vld [vmem:[#allocation102_spill] sm:$0xff] }
 0x1a4   : > { %v1409_v26 = vpop.f32.mrf.mxu1 }
 0x1a5   : > { %v963_v23 = vpop.f32.mrf.mxu0  ;;  %2566 = vmatmul.mubr.f32.gmra.mxu0 %v7892_v9 }
 0x1a6   : > { %v1414_v4 = vpop.f32.mrf.mxu1  ;;  %2873 = vmatmul.mubr.f32.gmra.mxu1 %v7888_v6  ;;  %2571 = vmatprep.mubr.f32.mxu0 %v7893_v36  ;;  %v7898_v6 = vld [vmem:[#allocation106_spill] sm:$0xff] }
 0x1a7   : > { %v6363_v59 = vadd.f32 %v1414_v4, %v933_v55  ;;  %v965_v22 = vpop.f32.mrf.mxu0  ;;  %2878 = vmatprep.mubr.f32.mxu1 %v7889_v48 }
 0x1a8   : > { %v1416_v2 = vpop.f32.mrf.mxu1  ;;  %v7902_v22 = vld [vmem:[#allocation114_spill] sm:$0xff] }
 0x1a9   : > { %v978_v3 = vpop.f32.mrf.mxu0  ;;  %2573 = vmatmul.mubr.f32.gmra.mxu0 %v7894_v24 }
 0x1aa   : > { %v1421_v62 = vpop.f32.mrf.mxu1  ;;  %2880 = vmatmul.mubr.f32.gmra.mxu1 %v7890_v7  ;;  %2578 = vmatprep.mubr.f32.mxu0 %v7895_v40 }
 0x1ab   : > { %v6369_v31 = vadd.f32 %v1421_v62, %v948_v12  ;;  %v980_v11 = vpop.f32.mrf.mxu0  ;;  %2885 = vmatprep.mubr.f32.mxu1 %v7891_v1  ;;  %v7900_v1 = vld [vmem:[#allocation109_spill] sm:$0xff] }
 0x1ac   : > { %v1423_v61 = vpop.f32.mrf.mxu1 }
 0x1ad   : > { %v993_v5 = vpop.f32.mrf.mxu0  ;;  %2580 = vmatmul.mubr.f32.gmra.mxu0 %v7896_v21  ;;  %v7904_v61 = vld [vmem:[#allocation6_spill] sm:$0xff] }
 0x1ae   : > { %v1428_v42 = vpop.f32.mrf.mxu1  ;;  %2887 = vmatmul.mubr.f32.gmra.mxu1 %v7892_v9  ;;  %2585 = vmatprep.mubr.f32.mxu0 %v7897_v47 }
 0x1af   : > { %v6375_v25 = vadd.f32 %v1428_v42, %v963_v23  ;;  %v995_v57 = vpop.f32.mrf.mxu0  ;;  %2892 = vmatprep.mubr.f32.mxu1 %v7893_v36  ;;  %v7901_v23 = vld [vmem:[#allocation112_spill] sm:$0xff] }
 0x1b0   : > { %v1430_v43 = vpop.f32.mrf.mxu1 }
 0x1b1   : > { %v1580_v55 = vpop.f32.mrf.mxu0  ;;  %2587 = vmatmul.mubr.f32.gmra.mxu0 %v7898_v6 }
 0x1b2   : > { %v1435_v20 = vpop.f32.mrf.mxu1  ;;  %v1581_v48 = vadd.f32 %v1580_v55, %v6096_v35  ;;  %2894 = vmatmul.mubr.f32.gmra.mxu1 %v7894_v24  ;;  %2592 = vmatprep.mubr.f32.mxu0 %v7899_v28  ;;  %v7903_v24 = vld [vmem:[#allocation116_spill] sm:$0xff]  ;;  %v7906_v55 = vld [vmem:[#allocation121_spill] sm:$0xff] }
 0x1b3   : > { %v6382_v8 = vadd.f32 %v1435_v20, %v978_v3  ;;  %v1582_v12 = vpop.f32.mrf.mxu0  ;;  %2899 = vmatprep.mubr.f32.mxu1 %v7895_v40 }
 0x1b4   : > { %v1437_v7 = vpop.f32.mrf.mxu1 }
 0x1b5   : > { %v1589_v29 = vpop.f32.mrf.mxu0  ;;  %2594 = vmatmul.mubr.f32.gmra.mxu0 %v7900_v1 }
 0x1b6   : > { %v1442_v53 = vpop.f32.mrf.mxu1  ;;  %v1590_v26 = vadd.f32 %v1589_v29, %v6109_v51  ;;  %2901 = vmatmul.mubr.f32.gmra.mxu1 %v7896_v21  ;;  %2599 = vmatprep.mubr.f32.mxu0 %v7901_v23  ;;  %v7908_v29 = vld [vmem:[#allocation124_spill] sm:$0xff] }
 0x1b7   : > { %v6389_v35 = vadd.f32 %v1442_v53, %v993_v5  ;;  %v1591_v9 = vpop.f32.mrf.mxu0  ;;  %2906 = vmatprep.mubr.f32.mxu1 %v7897_v47 }
 0x1b8   : > { %v1444_v4 = vpop.f32.mrf.mxu1 }
 0x1b9   : > { %v1598_v36 = vpop.f32.mrf.mxu0  ;;  %2601 = vmatmul.mubr.f32.gmra.mxu0 %v7902_v22 }
 0x1ba   : > { %v1599_v2 = vadd.f32 %v1598_v36, %v6122_v10  ;;  %v1967_v3 = vpop.f32.mrf.mxu1  ;;  %2908 = vmatmul.mubr.f32.gmra.mxu1 %v7898_v6  ;;  %2606 = vmatprep.mubr.f32.mxu0 %v7903_v24  ;;  %v7905_v10 = vld [vmem:[#allocation119_spill] sm:$0xff]  ;;  %v7910_v36 = vld [vmem:[#allocation129_spill] sm:$0xff] }
 0x1bb   : > { %v6396_v51 = vadd.f32 %v1967_v3, %v1581_v48  ;;  %v1600_v62 = vpop.f32.mrf.mxu0  ;;  %2913 = vmatprep.mubr.f32.mxu1 %v7899_v28 }
 0x1bc   : > { %v1969_v40 = vpop.f32.mrf.mxu1 }
 0x1bd   : > { %v1607_v11 = vpop.f32.mrf.mxu0  ;;  %2608 = vmatmul.mubr.f32.gmra.mxu0 %v7904_v61 }
 0x1be   : > { %v1608_v5 = vadd.f32 %v1607_v11, %v6135_v37  ;;  %v1978_v21 = vpop.f32.mrf.mxu1  ;;  %2915 = vmatmul.mubr.f32.gmra.mxu1 %v7900_v1  ;;  %2613 = vmatprep.mubr.f32.mxu0 %v7905_v10  ;;  %v7907_v37 = vld [vmem:[#allocation123_spill] sm:$0xff]  ;;  %v7912_v11 = vld [vmem:[#allocation133_spill] sm:$0xff] }
 0x1bf   : > { %v6403_v42 = vadd.f32 %v1978_v21, %v1590_v26  ;;  %v1609_v47 = vpop.f32.mrf.mxu0  ;;  %2920 = vmatprep.mubr.f32.mxu1 %v7901_v23 }
 0x1c0   : > { %v1980_v57 = vpop.f32.mrf.mxu1 }
 0x1c1   : > { %v1616_v43 = vpop.f32.mrf.mxu0  ;;  %2615 = vmatmul.mubr.f32.gmra.mxu0 %v7906_v55 }
 0x1c2   : > { %v1617_v6 = vadd.f32 %v1616_v43, %v6148_v52  ;;  %v1989_v20 = vpop.f32.mrf.mxu1  ;;  %2922 = vmatmul.mubr.f32.gmra.mxu1 %v7902_v22  ;;  %2620 = vmatprep.mubr.f32.mxu0 %v7907_v37  ;;  %v7909_v52 = vld [vmem:[#allocation126_spill] sm:$0xff]  ;;  %v7914_v43 = vld [vmem:[#allocation137_spill] sm:$0xff] }
 0x1c3   : > { %v6410_v48 = vadd.f32 %v1989_v20, %v1599_v2  ;;  %v1618_v28 = vpop.f32.mrf.mxu0  ;;  %2927 = vmatprep.mubr.f32.mxu1 %v7903_v24 }
 0x1c4   : > { %v1991_v12 = vpop.f32.mrf.mxu1 }
 0x1c5   : > { %v1625_v7 = vpop.f32.mrf.mxu0  ;;  %2622 = vmatmul.mubr.f32.gmra.mxu0 %v7908_v29 }
 0x1c6   : > { %v1626_v1 = vadd.f32 %v1625_v7, %v6161_v54  ;;  %v2000_v53 = vpop.f32.mrf.mxu1  ;;  %2929 = vmatmul.mubr.f32.gmra.mxu1 %v7904_v61  ;;  %2627 = vmatprep.mubr.f32.mxu0 %v7909_v52  ;;  %v7911_v54 = vld [vmem:[#allocation131_spill] sm:$0xff]  ;;  %v7916_v7 = vld [vmem:[#allocation141_spill] sm:$0xff] }
 0x1c7   : > { %v6417_v26 = vadd.f32 %v2000_v53, %v1608_v5  ;;  %v1627_v23 = vpop.f32.mrf.mxu0  ;;  %2934 = vmatprep.mubr.f32.mxu1 %v7905_v10 }
 0x1c8   : > { %v2002_v9 = vpop.f32.mrf.mxu1 }
 0x1c9   : > { %v1634_v4 = vpop.f32.mrf.mxu0  ;;  %2629 = vmatmul.mubr.f32.gmra.mxu0 %v7910_v36 }
 0x1ca   : > { %v1635_v22 = vadd.f32 %v1634_v4, %v6174_v0  ;;  %v2011_v2 = vpop.f32.mrf.mxu1  ;;  %2936 = vmatmul.mubr.f32.gmra.mxu1 %v7906_v55  ;;  %2634 = vmatprep.mubr.f32.mxu0 %v7911_v54  ;;  %v7913_v0 = vld [vmem:[#allocation135_spill] sm:$0xff] }
 0x1cb   : > { %v6424_v3 = vadd.f32 %v2011_v2, %v1617_v6  ;;  %v1636_v24 = vpop.f32.mrf.mxu0  ;;  %2941 = vmatprep.mubr.f32.mxu1 %v7907_v37 }
 0x1cc   : > { %v2013_v62 = vpop.f32.mrf.mxu1 }
 0x1cd   : > { %v1643_v40 = vpop.f32.mrf.mxu0  ;;  %2636 = vmatmul.mubr.f32.gmra.mxu0 %v7912_v11 }
 0x1ce   : > { %v1644_v61 = vadd.f32 %v1643_v40, %v6187_v15  ;;  %v2022_v5 = vpop.f32.mrf.mxu1  ;;  %2943 = vmatmul.mubr.f32.gmra.mxu1 %v7908_v29  ;;  %2641 = vmatprep.mubr.f32.mxu0 %v7913_v0  ;;  %v7915_v15 = vld [vmem:[#allocation139_spill] sm:$0xff] }
 0x1cf   : > { %v6431_v21 = vadd.f32 %v2022_v5, %v1626_v1  ;;  %v1645_v10 = vpop.f32.mrf.mxu0  ;;  %2948 = vmatprep.mubr.f32.mxu1 %v7909_v52  ;;  %v7918_v5 = vld [vmem:[#allocation149_spill] sm:$0xff] }
 0x1d0   : > { %v2024_v47 = vpop.f32.mrf.mxu1 }
 0x1d1   : > { %v1652_v57 = vpop.f32.mrf.mxu0  ;;  %2643 = vmatmul.mubr.f32.gmra.mxu0 %v7914_v43 }
 0x1d2   : > { %v1653_v55 = vadd.f32 %v1652_v57, %v6200_v30  ;;  %v2033_v6 = vpop.f32.mrf.mxu1  ;;  %2950 = vmatmul.mubr.f32.gmra.mxu1 %v7910_v36  ;;  %2648 = vmatprep.mubr.f32.mxu0 %v7915_v15  ;;  %v7917_v30 = vld [vmem:[#allocation143_spill] sm:$0xff] }
 0x1d3   : > { %v6438_v20 = vadd.f32 %v2033_v6, %v1635_v22  ;;  %v1654_v37 = vpop.f32.mrf.mxu0  ;;  %2955 = vmatprep.mubr.f32.mxu1 %v7911_v54  ;;  %v7920_v6 = vld [vmem:[#allocation23_spill] sm:$0xff] }
 0x1d4   : > { %v2035_v28 = vpop.f32.mrf.mxu1 }
 0x1d5   : > { %v1661_v12 = vpop.f32.mrf.mxu0  ;;  %2650 = vmatmul.mubr.f32.gmra.mxu0 %v7916_v7 }
 0x1d6   : > { %v1662_v29 = vadd.f32 %v1661_v12, %v6213_v38  ;;  %v2044_v1 = vpop.f32.mrf.mxu1  ;;  %2957 = vmatmul.mubr.f32.gmra.mxu1 %v7912_v11  ;;  %2655 = vmatprep.mubr.f32.mxu0 %v7917_v30 }
 0x1d7   : > { %v6445_v53 = vadd.f32 %v2044_v1, %v1644_v61  ;;  %v1663_v52 = vpop.f32.mrf.mxu0  ;;  %2962 = vmatprep.mubr.f32.mxu1 %v7913_v0 }
 0x1d8   : > { %v2046_v23 = vpop.f32.mrf.mxu1 }
 0x1d9   : > { %v1670_v9 = vpop.f32.mrf.mxu0  ;;  %2657 = vmatmul.mubr.f32.gmra.mxu0 %v5674_v19 }
 0x1da   : > { %v1671_v4 = vadd.f32 %v1670_v9, %v6226_v13  ;;  %v2055_v36 = vpop.f32.mrf.mxu1  ;;  %2964 = vmatmul.mubr.f32.gmra.mxu1 %v7914_v43  ;;  %2662 = vmatprep.mubr.f32.mxu0 %v5685_v60  ;;  %v7924_v9 = vld [vmem:[#allocation154_spill] sm:$0xff] }
 0x1db   : > { %v6452_v38 = vadd.f32 %v2055_v36, %v1653_v55  ;;  %v1672_v22 = vpop.f32.mrf.mxu0  ;;  %2969 = vmatprep.mubr.f32.mxu1 %v7915_v15 }
 0x1dc   : > { %v2057_v2 = vpop.f32.mrf.mxu1 }
 0x1dd   : > { %v1679_v54 = vpop.f32.mrf.mxu0  ;;  %2664 = vmatmul.mubr.f32.gmra.mxu0 %v5707_v32 }
 0x1de   : > { %v1680_v24 = vadd.f32 %v1679_v54, %v6239_v49  ;;  %v2066_v62 = vpop.f32.mrf.mxu1  ;;  %2971 = vmatmul.mubr.f32.gmra.mxu1 %v7916_v7  ;;  %2669 = vmatprep.mubr.f32.mxu0 %v5724_v18  ;;  %v7919_v49 = vld [vmem:[#allocation151_spill] sm:$0xff] }
 0x1df   : > { %v6459_v13 = vadd.f32 %v2066_v62, %v1662_v29  ;;  %v1681_v40 = vpop.f32.mrf.mxu0  ;;  %2976 = vmatprep.mubr.f32.mxu1 %v7917_v30  ;;  %v7922_v29 = vld [vmem:[#allocation25_spill] sm:$0xff] }
 0x1e0   : > { %v2068_v11 = vpop.f32.mrf.mxu1 }
 0x1e1   : > { %v1688_v61 = vpop.f32.mrf.mxu0  ;;  %2671 = vmatmul.mubr.f32.gmra.mxu0 %v7918_v5 }
 0x1e2   : > { %v1689_v0 = vadd.f32 %v1688_v61, %v6252_v14  ;;  %v2077_v10 = vpop.f32.mrf.mxu1  ;;  %2978 = vmatmul.mubr.f32.gmra.mxu1 %v5674_v19  ;;  %2676 = vmatprep.mubr.f32.mxu0 %v7919_v49  ;;  %v7921_v14 = vld [vmem:[#allocation152_spill] sm:$0xff] }
 0x1e3   : > { %v6466_v47 = vadd.f32 %v2077_v10, %v1671_v4  ;;  %v1690_v57 = vpop.f32.mrf.mxu0  ;;  %2983 = vmatprep.mubr.f32.mxu1 %v5685_v60 }
 0x1e4   : > { %v2079_v43 = vpop.f32.mrf.mxu1 }
 0x1e5   : > { %v1697_v55 = vpop.f32.mrf.mxu0  ;;  %2678 = vmatmul.mubr.f32.gmra.mxu0 %v7920_v6 }
 0x1e6   : > { %v1698_v15 = vadd.f32 %v1697_v55, %v6266_v50  ;;  %v2088_v37 = vpop.f32.mrf.mxu1  ;;  %2985 = vmatmul.mubr.f32.gmra.mxu1 %v5707_v32  ;;  %2683 = vmatprep.mubr.f32.mxu0 %v7921_v14  ;;  %v7923_v50 = vld [vmem:[#allocation153_spill] sm:$0xff] }
 0x1e7   : > { %v6473_v28 = vadd.f32 %v2088_v37, %v1680_v24  ;;  %v1699_v19 = vpop.f32.mrf.mxu0  ;;  %2990 = vmatprep.mubr.f32.mxu1 %v5724_v18 }
 0x1e8   : > { %v2090_v12 = vpop.f32.mrf.mxu1 }
 0x1e9   : > { %v1706_v7 = vpop.f32.mrf.mxu0  ;;  %2685 = vmatmul.mubr.f32.gmra.mxu0 %v7922_v29 }
 0x1ea   : > { %v1707_v60 = vadd.f32 %v1706_v7, %v6279_v17  ;;  %v2099_v1 = vpop.f32.mrf.mxu1  ;;  %2992 = vmatmul.mubr.f32.gmra.mxu1 %v7918_v5  ;;  %2690 = vmatprep.mubr.f32.mxu0 %v7923_v50 }
 0x1eb   : > { %v6480_v30 = vadd.f32 %v2099_v1, %v1689_v0  ;;  %v1708_v32 = vpop.f32.mrf.mxu0  ;;  %2997 = vmatprep.mubr.f32.mxu1 %v7919_v49 }
 0x1ec   : > { %v2101_v52 = vpop.f32.mrf.mxu1 }
 0x1ed   : > { %v1715_v23 = vpop.f32.mrf.mxu0  ;;  %2692 = vmatmul.mubr.f32.gmra.mxu0 %v7924_v9 }
 0x1ee   : > { %v1716_v18 = vadd.f32 %v1715_v23, %v6290_v33  ;;  %v2110_v4 = vpop.f32.mrf.mxu1  ;;  %2999 = vmatmul.mubr.f32.gmra.mxu1 %v7920_v6 }
 0x1ef   : > { %v6486_v17 = vadd.f32 %v2110_v4, %v1698_v15  ;;  %v1717_v36 = vpop.f32.mrf.mxu0  ;;  %3004 = vmatprep.mubr.f32.mxu1 %v7921_v14 }
 0x1f0   : > { %v2112_v22 = vpop.f32.mrf.mxu1 }
 0x1f1   : > { %v1724_v2 = vpop.f32.mrf.mxu0 }
 0x1f2   : > { %v1725_v54 = vadd.f32 %v1724_v2, %v6297_v41  ;;  %v2121_v24 = vpop.f32.mrf.mxu1  ;;  %3006 = vmatmul.mubr.f32.gmra.mxu1 %v7922_v29 }
 0x1f3   : > { %v6491_v62 = vadd.f32 %v2121_v24, %v1707_v60  ;;  %v1726_v40 = vpop.f32.mrf.mxu0  ;;  %3011 = vmatprep.mubr.f32.mxu1 %v7923_v50 }
 0x1f4   : > { %v2123_v33 = vpop.f32.mrf.mxu1 }
 0x1f5   : > { %v1733_v11 = vpop.f32.mrf.mxu0 }
 0x1f6   : > { %v1734_v61 = vadd.f32 %v1733_v11, %v6303_v44  ;;  %v2132_v5 = vpop.f32.mrf.mxu1  ;;  %3013 = vmatmul.mubr.f32.gmra.mxu1 %v7924_v9 }
 0x1f7   : > { %v6496_v0 = vadd.f32 %v2132_v5, %v1716_v18  ;;  %v1735_v10 = vpop.f32.mrf.mxu0 }
 0x1f8   : > { %v2134_v49 = vpop.f32.mrf.mxu1 }
 0x1f9   : > { %v1742_v41 = vpop.f32.mrf.mxu0 }
 0x1fa   : > { %v1743_v57 = vadd.f32 %v1742_v41, %v6309_v45  ;;  %v2143_v43 = vpop.f32.mrf.mxu1 }
 0x1fb   : > { %v6499_v55 = vadd.f32 %v2143_v43, %v1725_v54  ;;  %v1744_v6 = vpop.f32.mrf.mxu0 }
 0x1fc   : > { %v2145_v15 = vpop.f32.mrf.mxu1 }
 0x1fd   : > { %v1751_v37 = vpop.f32.mrf.mxu0 }
 0x1fe   : > { %v1752_v14 = vadd.f32 %v1751_v37, %v6315_v46  ;;  %v2154_v19 = vpop.f32.mrf.mxu1 }
 0x1ff   : > { %v6502_v44 = vadd.f32 %v2154_v19, %v1734_v61  ;;  %v1753_v12 = vpop.f32.mrf.mxu0 }
 0x200   : > { %v2156_v7 = vpop.f32.mrf.mxu1 }
 0x201   : > { %v1760_v29 = vpop.f32.mrf.mxu0 }
 0x202   : > { %v1761_v60 = vadd.f32 %v1760_v29, %v6321_v39  ;;  %v2165_v1 = vpop.f32.mrf.mxu1 }
 0x203   : > { %v6505_v50 = vadd.f32 %v2165_v1, %v1743_v57  ;;  %v1762_v45 = vpop.f32.mrf.mxu0 }
 0x204   : > { %v2167_v32 = vpop.f32.mrf.mxu1 }
 0x205   : > { %v1769_v52 = vpop.f32.mrf.mxu0 }
 0x206   : > { %v1770_v23 = vadd.f32 %v1769_v52, %v6327_v34  ;;  %v2176_v9 = vpop.f32.mrf.mxu1 }
 0x207   : > { %v6508_v18 = vadd.f32 %v2176_v9, %v1752_v14  ;;  %v1771_v46 = vpop.f32.mrf.mxu0 }
 0x208   : > { %v2178_v4 = vpop.f32.mrf.mxu1 }
 0x209   : > { %v1778_v36 = vpop.f32.mrf.mxu0 }
 0x20a   : > { %v1779_v22 = vadd.f32 %v1778_v36, %v6333_v63  ;;  %v2187_v2 = vpop.f32.mrf.mxu1 }
 0x20b   : > { %v6511_v54 = vadd.f32 %v2187_v2, %v1761_v60  ;;  %v1780_v39 = vpop.f32.mrf.mxu0 }
 0x20c   : > { %v2189_v24 = vpop.f32.mrf.mxu1 }
 0x20d   : > { %v1787_v40 = vpop.f32.mrf.mxu0 }
 0x20e   : > { %v1788_v33 = vadd.f32 %v1787_v40, %v6339_v16  ;;  %v2198_v11 = vpop.f32.mrf.mxu1 }
 0x20f   : > { %v6514_v61 = vadd.f32 %v2198_v11, %v1770_v23  ;;  %v1789_v34 = vpop.f32.mrf.mxu0 }
 0x210   : > { %v2200_v5 = vpop.f32.mrf.mxu1 }
 0x211   : > { %v1796_v10 = vpop.f32.mrf.mxu0 }
 0x212   : > { %v1797_v49 = vadd.f32 %v1796_v10, %v6345_v56  ;;  %v2209_v41 = vpop.f32.mrf.mxu1 }
 0x213   : > { %v6517_v57 = vadd.f32 %v2209_v41, %v1779_v22  ;;  %v1798_v63 = vpop.f32.mrf.mxu0 }
 0x214   : > { %v2211_v43 = vpop.f32.mrf.mxu1 }
 0x215   : > { %v1805_v6 = vpop.f32.mrf.mxu0 }
 0x216   : > { %v1806_v15 = vadd.f32 %v1805_v6, %v6351_v58  ;;  %v2220_v37 = vpop.f32.mrf.mxu1 }
 0x217   : > { %v6520_v14 = vadd.f32 %v2220_v37, %v1788_v33  ;;  %v1807_v16 = vpop.f32.mrf.mxu0 }
 0x218   : > { %v2222_v19 = vpop.f32.mrf.mxu1 }
 0x219   : > { %v1814_v12 = vpop.f32.mrf.mxu0 }
 0x21a   : > { %v1815_v7 = vadd.f32 %v1814_v12, %v6357_v27  ;;  %v2231_v29 = vpop.f32.mrf.mxu1 }
 0x21b   : > { %v6523_v60 = vadd.f32 %v2231_v29, %v1797_v49  ;;  %v1816_v56 = vpop.f32.mrf.mxu0 }
 0x21c   : > { %v2233_v1 = vpop.f32.mrf.mxu1 }
 0x21d   : > { %v1823_v45 = vpop.f32.mrf.mxu0 }
 0x21e   : > { %v1824_v32 = vadd.f32 %v1823_v45, %v6363_v59  ;;  %v2242_v52 = vpop.f32.mrf.mxu1 }
 0x21f   : > { %v6526_v23 = vadd.f32 %v2242_v52, %v1806_v15  ;;  %v1825_v58 = vpop.f32.mrf.mxu0 }
 0x220   : > { %v2244_v9 = vpop.f32.mrf.mxu1 }
 0x221   : > { %v1832_v46 = vpop.f32.mrf.mxu0 }
 0x222   : > { %v1833_v4 = vadd.f32 %v1832_v46, %v6369_v31  ;;  %v2253_v36 = vpop.f32.mrf.mxu1 }
 0x223   : > { %v6529_v22 = vadd.f32 %v2253_v36, %v1815_v7  ;;  %v1834_v27 = vpop.f32.mrf.mxu0 }
 0x224   : > { %v2255_v2 = vpop.f32.mrf.mxu1 }
 0x225   : > { %v1841_v39 = vpop.f32.mrf.mxu0 }
 0x226   : > { %v1842_v24 = vadd.f32 %v1841_v39, %v6375_v25  ;;  %v2264_v40 = vpop.f32.mrf.mxu1 }
 0x227   : > { %v6532_v33 = vadd.f32 %v2264_v40, %v1824_v32  ;;  %v1843_v59 = vpop.f32.mrf.mxu0 }
 0x228   : > { %v2266_v11 = vpop.f32.mrf.mxu1 }
 0x229   : > { %v1850_v34 = vpop.f32.mrf.mxu0 }
 0x22a   : > { %v1851_v5 = vadd.f32 %v1850_v34, %v6382_v8  ;;  %v2275_v10 = vpop.f32.mrf.mxu1 }
 0x22b   : > { %v6535_v49 = vadd.f32 %v2275_v10, %v1833_v4  ;;  %v1852_v31 = vpop.f32.mrf.mxu0 }
 0x22c   : > { %v2277_v41 = vpop.f32.mrf.mxu1 }
 0x22d   : > { %v1859_v63 = vpop.f32.mrf.mxu0 }
 0x22e   : > { %v1860_v43 = vadd.f32 %v1859_v63, %v6389_v35  ;;  %v2286_v6 = vpop.f32.mrf.mxu1 }
 0x22f   : > { %v6538_v15 = vadd.f32 %v2286_v6, %v1842_v24  ;;  %v1861_v25 = vpop.f32.mrf.mxu0 }
 0x230   : > { %v2288_v37 = vpop.f32.mrf.mxu1 }
 0x231   : > { %v2476_v16 = vpop.f32.mrf.mxu0 }
 0x232   : > { %v2297_v19 = vpop.f32.mrf.mxu1  ;;  %v2477_v12 = vadd.f32 %v2476_v16, %v6396_v51 }
 0x233   : > { %v6541_v7 = vadd.f32 %v2297_v19, %v1851_v5  ;;  %v2478_v8 = vpop.f32.mrf.mxu0 }
 0x234   : > { %v2299_v29 = vpop.f32.mrf.mxu1 }
 0x235   : > { %v2483_v56 = vpop.f32.mrf.mxu0 }
 0x236   : > { %v2308_v1 = vpop.f32.mrf.mxu1  ;;  %v2484_v45 = vadd.f32 %v2483_v56, %v6403_v42 }
 0x237   : > { %v6544_v32 = vadd.f32 %v2308_v1, %v1860_v43  ;;  %v2485_v35 = vpop.f32.mrf.mxu0 }
 0x238   : > { %v2310_v52 = vpop.f32.mrf.mxu1 }
 0x239   : > { %v2490_v58 = vpop.f32.mrf.mxu0 }
 0x23a   : > { %v2491_v9 = vadd.f32 %v2490_v58, %v6410_v48  ;;  %v2797_v46 = vpop.f32.mrf.mxu1 }
 0x23b   : > { %v6547_v4 = vadd.f32 %v2797_v46, %v2477_v12  ;;  %v2492_v36 = vpop.f32.mrf.mxu0 }
 0x23c   : > { %v2799_v51 = vpop.f32.mrf.mxu1  ;;  %v3066_v36 = vld [vmem:[%s7093_s2] sm:$0xff] }
 0x23d   : > { %v2497_v27 = vpop.f32.mrf.mxu0 }
 0x23e   : > { %v2498_v2 = vadd.f32 %v2497_v27, %v6417_v26  ;;  %v2804_v39 = vpop.f32.mrf.mxu1  ;;  %v6570_v27 = vand.u32 4294901760, %v3066_v36 }
 0x23f   : > { %v6550_v24 = vadd.f32 %v2804_v39, %v2484_v45  ;;  %v2499_v40 = vpop.f32.mrf.mxu0 }
 0x240   : > { %v2806_v42 = vpop.f32.mrf.mxu1  ;;  %4173 = vmatprep.mubr.f32.mxu1 %v6570_v27 }
 0x241   : > { %v2504_v59 = vpop.f32.mrf.mxu0 }
 0x242   : > { %v2505_v11 = vadd.f32 %v2504_v59, %v6424_v3  ;;  %v2811_v34 = vpop.f32.mrf.mxu1 }
 0x243   : > { %v6553_v5 = vadd.f32 %v2811_v34, %v2491_v9  ;;  %v2506_v48 = vpop.f32.mrf.mxu0 }
 0x244   : > { %v2813_v10 = vpop.f32.mrf.mxu1 }
 0x245   : > { %v2511_v31 = vpop.f32.mrf.mxu0 }
 0x246   : > { %v2512_v41 = vadd.f32 %v2511_v31, %v6431_v21  ;;  %v2818_v63 = vpop.f32.mrf.mxu1 }
 0x247   : > { %v6556_v43 = vadd.f32 %v2818_v63, %v2498_v2  ;;  %v2513_v26 = vpop.f32.mrf.mxu0 }
 0x248   : > { %v2820_v6 = vpop.f32.mrf.mxu1 }
 0x249   : > { %v2518_v25 = vpop.f32.mrf.mxu0 }
 0x24a   : > { %v2519_v37 = vadd.f32 %v2518_v25, %v6438_v20  ;;  %v2825_v16 = vpop.f32.mrf.mxu1 }
 0x24b   : > { %v6559_v19 = vadd.f32 %v2825_v16, %v2505_v11  ;;  %v2520_v3 = vpop.f32.mrf.mxu0 }
 0x24c   : > { %v2827_v12 = vpop.f32.mrf.mxu1 }
 0x24d   : > { %v2525_v8 = vpop.f32.mrf.mxu0 }
 0x24e   : > { %v2526_v29 = vadd.f32 %v2525_v8, %v6445_v53  ;;  %v2832_v56 = vpop.f32.mrf.mxu1 }
 0x24f   : > { %v6562_v1 = vadd.f32 %v2832_v56, %v2512_v41  ;;  %v2527_v21 = vpop.f32.mrf.mxu0 }
 0x250   : > { %v2834_v45 = vpop.f32.mrf.mxu1 }
 0x251   : > { %v2532_v35 = vpop.f32.mrf.mxu0 }
 0x252   : > { %v2533_v52 = vadd.f32 %v2532_v35, %v6452_v38  ;;  %v2839_v58 = vpop.f32.mrf.mxu1  ;;  %v6576_v38 = vsub.f32 %v3066_v36, %v6570_v27 }
 0x253   : > { %v6565_v9 = vadd.f32 %v2839_v58, %v2519_v37  ;;  %v2534_v20 = vpop.f32.mrf.mxu0 }
 0x254   : > { %v2841_v46 = vpop.f32.mrf.mxu1  ;;  %v3153_v11 = vand.u32 4294901760, %v6576_v38 }
 0x255   : > { %v2539_v51 = vpop.f32.mrf.mxu0 }
 0x256   : > { %v2540_v53 = vadd.f32 %v2539_v51, %v6459_v13  ;;  %v2846_v2 = vpop.f32.mrf.mxu1  ;;  %v3154_v13 = vsub.f32 %v6576_v38, %v3153_v11 }
 0x257   : > { %v6573_v39 = vadd.f32 %v2846_v2, %v2526_v29  ;;  %v2541_v40 = vpop.f32.mrf.mxu0 }
 0x258   : > { %v2848_v42 = vpop.f32.mrf.mxu1  ;;  %v3155_v26 = vand.u32 4294901760, %v3154_v13 }
 0x259   : > { %v2546_v59 = vpop.f32.mrf.mxu0 }
 0x25a   : > { %v2547_v34 = vadd.f32 %v2546_v59, %v6466_v47  ;;  %v2853_v48 = vpop.f32.mrf.mxu1  ;;  %4135 = vmatprep.mubr.f32.mxu0 %v3155_v26 }
 0x25b   : > { %v6581_v10 = vadd.f32 %v2853_v48, %v2533_v52  ;;  %v2548_v31 = vpop.f32.mrf.mxu0 }
 0x25c   : > { %v2855_v41 = vpop.f32.mrf.mxu1 }
 0x25d   : > { %v2553_v63 = vpop.f32.mrf.mxu0 }
 0x25e   : > { %v2554_v6 = vadd.f32 %v2553_v63, %v6473_v28  ;;  %v2860_v25 = vpop.f32.mrf.mxu1 }
 0x25f   : > { %v6587_v37 = vadd.f32 %v2860_v25, %v2540_v53  ;;  %v2555_v16 = vpop.f32.mrf.mxu0 }
 0x260   : > { %v2862_v3 = vpop.f32.mrf.mxu1 }
 0x261   : > { %v2560_v47 = vpop.f32.mrf.mxu0 }
 0x262   : > { %v2561_v12 = vadd.f32 %v2560_v47, %v6480_v30  ;;  %v2867_v8 = vpop.f32.mrf.mxu1 }
 0x263   : > { %v6590_v29 = vadd.f32 %v2867_v8, %v2547_v34  ;;  %v2562_v56 = vpop.f32.mrf.mxu0 }
 0x264   : > { %v2869_v21 = vpop.f32.mrf.mxu1 }
 0x265   : > { %v2567_v45 = vpop.f32.mrf.mxu0 }
 0x266   : > { %v2568_v35 = vadd.f32 %v2567_v45, %v6486_v17  ;;  %v2874_v52 = vpop.f32.mrf.mxu1 }
 0x267   : > { %v6593_v58 = vadd.f32 %v2874_v52, %v2554_v6  ;;  %v2569_v28 = vpop.f32.mrf.mxu0 }
 0x268   : > { %v2876_v20 = vpop.f32.mrf.mxu1 }
 0x269   : > { %v2574_v46 = vpop.f32.mrf.mxu0 }
 0x26a   : > { %v2575_v36 = vadd.f32 %v2574_v46, %v6491_v62  ;;  %v2881_v51 = vpop.f32.mrf.mxu1 }
 0x26b   : > { %v6596_v53 = vadd.f32 %v2881_v51, %v2561_v12  ;;  %v2576_v30 = vpop.f32.mrf.mxu0 }
 0x26c   : > { %v2883_v2 = vpop.f32.mrf.mxu1 }
 0x26d   : > { %v2581_v40 = vpop.f32.mrf.mxu0 }
 0x26e   : > { %v2582_v42 = vadd.f32 %v2581_v40, %v6496_v0  ;;  %v2888_v59 = vpop.f32.mrf.mxu1 }
 0x26f   : > { %v6599_v34 = vadd.f32 %v2888_v59, %v2568_v35  ;;  %v2583_v17 = vpop.f32.mrf.mxu0  ;;  %v3018_v35 = vmul.f32 %v6547_v4, %v6547_v4 }
 0x270   : > { %v2890_v48 = vpop.f32.mrf.mxu1 }
 0x271   : > { %v2588_v31 = vpop.f32.mrf.mxu0 }
 0x272   : > { %v2589_v13 = vadd.f32 %v2588_v31, %v6499_v55  ;;  %v2895_v41 = vpop.f32.mrf.mxu1 }
 0x273   : > { %v6602_v63 = vadd.f32 %v2895_v41, %v2575_v36  ;;  %v2590_v62 = vpop.f32.mrf.mxu0 }
 0x274   : > { %v2897_v26 = vpop.f32.mrf.mxu1 }
 0x275   : > { %v2595_v6 = vpop.f32.mrf.mxu0 }
 0x276   : > { %v2596_v25 = vadd.f32 %v2595_v6, %v6502_v44  ;;  %v2902_v16 = vpop.f32.mrf.mxu1 }
 0x277   : > { %v6605_v3 = vadd.f32 %v2902_v16, %v2582_v42  ;;  %v2597_v0 = vpop.f32.mrf.mxu0 }
 0x278   : > { %v2904_v47 = vpop.f32.mrf.mxu1 }
 0x279   : > { %v2602_v12 = vpop.f32.mrf.mxu0 }
 0x27a   : > { %v2603_v8 = vadd.f32 %v2602_v12, %v6505_v50  ;;  %v2909_v56 = vpop.f32.mrf.mxu1  ;;  %v3019_v50 = vmul.f32 %v6550_v24, %v6550_v24 }
 0x27b   : > { %v2910_v21 = vadd.f32 %v2909_v56, %v2589_v13  ;;  %v2604_v45 = vpop.f32.mrf.mxu0 }
 0x27c   : > { %v2911_v55 = vpop.f32.mrf.mxu1 }
 0x27d   : > { %v3034_v52 = vmul.f32 %v2910_v21, %v2910_v21  ;;  %v2609_v28 = vpop.f32.mrf.mxu0 }
 0x27e   : > { %v2610_v20 = vadd.f32 %v2609_v28, %v6508_v18  ;;  %v2916_v44 = vpop.f32.mrf.mxu1  ;;  %v3020_v18 = vmul.f32 %v6553_v5, %v6553_v5 }
 0x27f   : > { %v6611_v46 = vadd.f32 %v3034_v52, %v3018_v35  ;;  %v2917_v36 = vadd.f32 %v2916_v44, %v2596_v25  ;;  %v2611_v51 = vpop.f32.mrf.mxu0 }
 0x280   : > { %v2918_v30 = vpop.f32.mrf.mxu1 }
 0x281   : > { %v3035_v2 = vmul.f32 %v2917_v36, %v2917_v36  ;;  %v2616_v40 = vpop.f32.mrf.mxu0 }
 0x282   : > { %v2617_v42 = vadd.f32 %v2616_v40, %v6511_v54  ;;  %v2923_v59 = vpop.f32.mrf.mxu1  ;;  %v3021_v54 = vmul.f32 %v6556_v43, %v6556_v43  ;;  %v3023_v43 = vmul.f32 %v6562_v1, %v6562_v1 }
 0x283   : > { %v6616_v17 = vadd.f32 %v3035_v2, %v3019_v50  ;;  %v2924_v4 = vadd.f32 %v2923_v59, %v2603_v8  ;;  %v2618_v48 = vpop.f32.mrf.mxu0  ;;  %v3024_v59 = vmul.f32 %v6565_v9, %v6565_v9 }
 0x284   : > { %v2925_v31 = vpop.f32.mrf.mxu1 }
 0x285   : > { %v3036_v13 = vmul.f32 %v2924_v4, %v2924_v4  ;;  %v2623_v41 = vpop.f32.mrf.mxu0 }
 0x286   : > { %v2624_v62 = vadd.f32 %v2623_v41, %v6514_v61  ;;  %v2930_v26 = vpop.f32.mrf.mxu1  ;;  %v3022_v61 = vmul.f32 %v6559_v19, %v6559_v19 }
 0x287   : > { %v6621_v6 = vadd.f32 %v3036_v13, %v3020_v18  ;;  %v2931_v24 = vadd.f32 %v2930_v26, %v2610_v20  ;;  %v2625_v25 = vpop.f32.mrf.mxu0 }
 0x288   : > { %v2932_v16 = vpop.f32.mrf.mxu1 }
 0x289   : > { %v3037_v0 = vmul.f32 %v2931_v24, %v2931_v24  ;;  %v2630_v47 = vpop.f32.mrf.mxu0 }
 0x28a   : > { %v2937_v12 = vpop.f32.mrf.mxu1  ;;  %v2631_v36 = vadd.f32 %v2630_v47, %v6517_v57  ;;  %v3026_v47 = vmul.f32 %v6581_v10, %v6581_v10 }
 0x28b   : > { %v6625_v8 = vadd.f32 %v3037_v0, %v3021_v54  ;;  %v2938_v56 = vadd.f32 %v2937_v12, %v2617_v42  ;;  %v2632_v5 = vpop.f32.mrf.mxu0 }
 0x28c   : > { %v2939_v21 = vpop.f32.mrf.mxu1 }
 0x28d   : > { %v3038_v45 = vmul.f32 %v2938_v56, %v2938_v56  ;;  %v2637_v55 = vpop.f32.mrf.mxu0 }
 0x28e   : > { %v2944_v35 = vpop.f32.mrf.mxu1  ;;  %v2638_v4 = vadd.f32 %v2637_v55, %v6520_v14  ;;  %v3027_v55 = vmul.f32 %v6587_v37, %v6587_v37 }
 0x28f   : > { %v6629_v52 = vadd.f32 %v3038_v45, %v3022_v61  ;;  %v2945_v28 = vadd.f32 %v2944_v35, %v2624_v62  ;;  %v2639_v20 = vpop.f32.mrf.mxu0  ;;  %v3025_v62 = vmul.f32 %v6573_v39, %v6573_v39 }
 0x290   : > { %v2946_v44 = vpop.f32.mrf.mxu1 }
 0x291   : > { %v3039_v51 = vmul.f32 %v2945_v28, %v2945_v28  ;;  %v2644_v30 = vpop.f32.mrf.mxu0 }
 0x292   : > { %v2951_v50 = vpop.f32.mrf.mxu1  ;;  %v2645_v26 = vadd.f32 %v2644_v30, %v6523_v60 }
 0x293   : > { %v6634_v2 = vadd.f32 %v3039_v51, %v3023_v43  ;;  %v2952_v40 = vadd.f32 %v2951_v50, %v2631_v36  ;;  %v2646_v19 = vpop.f32.mrf.mxu0  ;;  %v3028_v51 = vmul.f32 %v6590_v29, %v6590_v29 }
 0x294   : > { %v2953_v42 = vpop.f32.mrf.mxu1 }
 0x295   : > { %v3040_v48 = vmul.f32 %v2952_v40, %v2952_v40  ;;  %v2651_v31 = vpop.f32.mrf.mxu0 }
 0x296   : > { %v2958_v18 = vpop.f32.mrf.mxu1  ;;  %v2652_v12 = vadd.f32 %v2651_v31, %v6526_v23 }
 0x297   : > { %v6639_v13 = vadd.f32 %v3040_v48, %v3024_v59  ;;  %v2959_v1 = vadd.f32 %v2958_v18, %v2638_v4  ;;  %v2653_v57 = vpop.f32.mrf.mxu0  ;;  %v3029_v4 = vmul.f32 %v6593_v58, %v6593_v58 }
 0x298   : > { %v2960_v41 = vpop.f32.mrf.mxu1 }
 0x299   : > { %v3041_v24 = vmul.f32 %v2959_v1, %v2959_v1  ;;  %v2658_v25 = vpop.f32.mrf.mxu0 }
 0x29a   : > { %v2965_v16 = vpop.f32.mrf.mxu1  ;;  %v2659_v35 = vadd.f32 %v2658_v25, %v6529_v22 }
 0x29b   : > { %v6644_v54 = vadd.f32 %v3041_v24, %v3025_v62  ;;  %v2966_v9 = vadd.f32 %v2965_v16, %v2645_v26  ;;  %v2660_v14 = vpop.f32.mrf.mxu0 }
 0x29c   : > { %v2967_v0 = vpop.f32.mrf.mxu1 }
 0x29d   : > { %v3042_v56 = vmul.f32 %v2966_v9, %v2966_v9  ;;  %v2665_v5 = vpop.f32.mrf.mxu0 }
 0x29e   : > { %v2972_v21 = vpop.f32.mrf.mxu1  ;;  %v2666_v30 = vadd.f32 %v2665_v5, %v6532_v33  ;;  %v3030_v33 = vmul.f32 %v6596_v53, %v6596_v53 }
 0x29f   : > { %v6649_v61 = vadd.f32 %v3042_v56, %v3026_v47  ;;  %v2973_v39 = vadd.f32 %v2972_v21, %v2652_v12  ;;  %v2667_v60 = vpop.f32.mrf.mxu0 }
 0x2a0   : > { %v2974_v45 = vpop.f32.mrf.mxu1 }
 0x2a1   : > { %v3043_v28 = vmul.f32 %v2973_v39, %v2973_v39  ;;  %v2672_v20 = vpop.f32.mrf.mxu0 }
 0x2a2   : > { %v2979_v44 = vpop.f32.mrf.mxu1  ;;  %v2673_v48 = vadd.f32 %v2672_v20, %v6535_v49  ;;  %v3031_v49 = vmul.f32 %v6599_v34, %v6599_v34  ;;  %v3033_v34 = vmul.f32 %v6605_v3, %v6605_v3 }
 0x2a3   : > { %v6654_v43 = vadd.f32 %v3043_v28, %v3027_v55  ;;  %v2980_v10 = vadd.f32 %v2979_v44, %v2659_v35  ;;  %v2674_v23 = vpop.f32.mrf.mxu0 }
 0x2a4   : > { %v2981_v36 = vpop.f32.mrf.mxu1 }
 0x2a5   : > { %v3044_v50 = vmul.f32 %v2980_v10, %v2980_v10  ;;  %v2679_v40 = vpop.f32.mrf.mxu0 }
 0x2a6   : > { %v2986_v19 = vpop.f32.mrf.mxu1  ;;  %v2680_v26 = vadd.f32 %v2679_v40, %v6538_v15  ;;  %v3032_v15 = vmul.f32 %v6602_v63, %v6602_v63 }
 0x2a7   : > { %v3060_v42 = vadd.f32 %v3044_v50, %v3028_v51  ;;  %v2987_v37 = vadd.f32 %v2986_v19, %v2666_v30  ;;  %v2681_v59 = vpop.f32.mrf.mxu0  ;;  %v6703_v19 = vand.u32 4294901760, %v6654_v43 }
 0x2a8   : > { %v2988_v22 = vpop.f32.mrf.mxu1 }
 0x2a9   : > { %v3045_v31 = vmul.f32 %v2987_v37, %v2987_v37  ;;  %v2686_v18 = vpop.f32.mrf.mxu0  ;;  %v6689_v30 = vand.u32 4294901760, %v3060_v42 }
 0x2aa   : > { %v2993_v1 = vpop.f32.mrf.mxu1  ;;  %v2687_v47 = vadd.f32 %v2686_v18, %v6541_v7 }
 0x2ab   : > { %v3061_v57 = vadd.f32 %v3045_v31, %v3029_v4  ;;  %v2994_v41 = vadd.f32 %v2993_v1, %v2673_v48  ;;  %v2688_v29 = vpop.f32.mrf.mxu0  ;;  %v6716_v4 = vand.u32 4294901760, %v6649_v61  ;;  %v6720_v48 = vsub.f32 %v3060_v42, %v6689_v30 }
 0x2ac   : > { %v2995_v62 = vpop.f32.mrf.mxu1  ;;  %v6736_v42 = vsub.f32 %v6654_v43, %v6703_v19 }
 0x2ad   : > { %v3046_v24 = vmul.f32 %v2994_v41, %v2994_v41  ;;  %v2693_v25 = vpop.f32.mrf.mxu0 }
 0x2ae   : > { %v3000_v16 = vpop.f32.mrf.mxu1  ;;  %v2694_v53 = vadd.f32 %v2693_v25, %v6544_v32  ;;  %v6682_v32 = vand.u32 4294901760, %v3061_v57  ;;  %v6756_v25 = vand.u32 4294901760, %v6720_v48 }
 0x2af   : > { %v3062_v9 = vadd.f32 %v3046_v24, %v3030_v33  ;;  %v3001_v14 = vadd.f32 %v3000_v16, %v2680_v26  ;;  %v2695_v58 = vpop.f32.mrf.mxu0  ;;  %v6745_v33 = vand.u32 4294901760, %v6639_v13  ;;  %v6750_v26 = vsub.f32 %v6649_v61, %v6716_v4 }
 0x2b0   : > { %v3002_v0 = vpop.f32.mrf.mxu1  ;;  %v6706_v37 = vsub.f32 %v3061_v57, %v6682_v32  ;;  %v6731_v57 = vand.u32 4294901760, %v6644_v54  ;;  %v6759_v16 = vand.u32 4294901760, %v6634_v2  ;;  %v6770_v58 = vand.u32 4294901760, %v6736_v42 }
 0x2b1   : > { %v3047_v12 = vmul.f32 %v3001_v14, %v3001_v14  ;;  %v6677_v10 = vand.u32 4294901760, %v3062_v9  ;;  %v3067_v0 = vld [vmem:[%s7093_s2 + $0x8] sm:$0xff] }
 0x2b2   : > { %v3007_v56 = vpop.f32.mrf.mxu1  ;;  %v6742_v62 = vand.u32 4294901760, %v6706_v37  ;;  %v6764_v61 = vsub.f32 %v6644_v54, %v6731_v57  ;;  %v6781_v54 = vsub.f32 %v6639_v13, %v6745_v33  ;;  %v6797_v13 = vsub.f32 %v6634_v2, %v6759_v16 }
 0x2b3   : > { %v3063_v5 = vadd.f32 %v3047_v12, %v3031_v49  ;;  %v3008_v21 = vadd.f32 %v3007_v56, %v2687_v47  ;;  %v6692_v3 = vsub.f32 %v3062_v9, %v6677_v10  ;;  %v6776_v49 = vand.u32 4294901760, %v6629_v52 }
 0x2b4   : > { %v3009_v39 = vpop.f32.mrf.mxu1  ;;  %v3223_v14 = vsub.f32 %v6706_v37, %v6742_v62  ;;  %v3230_v12 = vsub.f32 %v6720_v48, %v6756_v25  ;;  %v6787_v56 = vand.u32 4294901760, %v6750_v26 }
 0x2b5   : > { %v3048_v60 = vmul.f32 %v3008_v21, %v3008_v21  ;;  %v6673_v20 = vand.u32 4294901760, %v3063_v5  ;;  %v6728_v1 = vand.u32 4294901760, %v6692_v3  ;;  %v6793_v21 = vand.u32 4294901760, %v3067_v0 }
 0x2b6   : > { %v3014_v45 = vpop.f32.mrf.mxu1  ;;  %v3224_v39 = vand.u32 4294901760, %v3223_v14  ;;  %v6811_v2 = vsub.f32 %v6629_v52, %v6776_v49 }
 0x2b7   : > { %v3064_v55 = vadd.f32 %v3048_v60, %v3032_v15  ;;  %v3015_v35 = vadd.f32 %v3014_v45, %v2694_v53  ;;  %v6685_v36 = vsub.f32 %v3063_v5, %v6673_v20  ;;  %v3216_v24 = vsub.f32 %v6692_v3, %v6728_v1 }
 0x2b8   : > { %v3016_v28 = vpop.f32.mrf.mxu1  ;;  %v6790_v5 = vand.u32 4294901760, %v6625_v8  ;;  %v3237_v15 = vsub.f32 %v6736_v42, %v6770_v58  ;;  %v6803_v53 = vand.u32 4294901760, %v6764_v61  ;;  %v6806_v60 = vand.u32 4294901760, %v6621_v6 }
 0x2b9   : > { %v6675_v7 = vand.u32 4294901760, %v3064_v55  ;;  %v3049_v44 = vmul.f32 %v3015_v35, %v3015_v35  ;;  %v6713_v22 = vand.u32 4294901760, %v6685_v36  ;;  %v3217_v47 = vand.u32 4294901760, %v3216_v24 }
 0x2ba   : > { %v3231_v45 = vand.u32 4294901760, %v3230_v12  ;;  %v6817_v35 = vand.u32 4294901760, %v6781_v54  ;;  %v6820_v28 = vand.u32 4294901760, %v6616_v17  ;;  %v6828_v52 = vsub.f32 %v6625_v8, %v6790_v5 }
 0x2bb   : > { %v6680_v23 = vsub.f32 %v3064_v55, %v6675_v7  ;;  %v3065_v63 = vadd.f32 %v3049_v44, %v3033_v34  ;;  %v3209_v29 = vsub.f32 %v6685_v36, %v6713_v22  ;;  %v3244_v55 = vsub.f32 %v6750_v26, %v6787_v56 }
 0x2bc   : > { %v6824_v34 = vsub.f32 %v3067_v0, %v6793_v21  ;;  %v3238_v44 = vand.u32 4294901760, %v3237_v15  ;;  %v6842_v8 = vsub.f32 %v6621_v6, %v6806_v60  ;;  %v6860_v0 = vand.u32 4294901760, %v6828_v52 }
 0x2bd   : > { %v6687_v51 = vand.u32 4294901760, %v3065_v63  ;;  %v6699_v40 = vand.u32 4294901760, %v6680_v23  ;;  %v3210_v9 = vand.u32 4294901760, %v3209_v29  ;;  %v3258_v29 = vsub.f32 %v6781_v54, %v6817_v35 }
 0x2be   : > { %v3163_v24 = vand.u32 4294901760, %v6824_v34 }
 0x2bf   : > { %v6695_v50 = vsub.f32 %v3065_v63, %v6687_v51  ;;  %4103 = vmatprep.subr.mxu0 %v6687_v51  ;;  %v3202_v18 = vsub.f32 %v6680_v23, %v6699_v40  ;;  %v3251_v63 = vsub.f32 %v6764_v61, %v6803_v53 }
 0x2c0   : > { %4104 = vmatpush3.msra.mxu0 %v6687_v51  ;;  %v3164_v15 = vsub.f32 %v6824_v34, %v3163_v24 }
 0x2c1   : > { %4105 = vmatprep.subr.mxu0 %v6675_v7  ;;  %v6710_v59 = vand.u32 4294901760, %v6695_v50  ;;  %v3203_v43 = vand.u32 4294901760, %v3202_v18  ;;  %v6837_v18 = vand.u32 4294901760, %v6611_v46  ;;  %v3252_v6 = vand.u32 4294901760, %v3251_v63 }
 0x2c2   : > { %4106 = vmatpush3.msra.mxu0 %v6675_v7 }
 0x2c3   : > { %4107 = vmatprep.subr.mxu0 %v6673_v20  ;;  %v3195_v31 = vsub.f32 %v6695_v50, %v6710_v59 }
 0x2c4   : > { %4108 = vmatpush3.msra.mxu0 %v6673_v20 }
 0x2c5   : > { %4109 = vmatprep.subr.mxu0 %v6677_v10  ;;  %v3196_v41 = vand.u32 4294901760, %v3195_v31  ;;  %v6834_v31 = vand.u32 4294901760, %v6797_v13 }
 0x2c6   : > { %4110 = vmatpush3.msra.mxu0 %v6677_v10 }
 0x2c7   : > { %4111 = vmatprep.subr.mxu0 %v6682_v32  ;;  %4141 = vmatprep.subr.mxu1 %v3196_v41  ;;  %v3265_v14 = vsub.f32 %v6797_v13, %v6834_v31 }
 0x2c8   : > { %4112 = vmatpush3.msra.mxu0 %v6682_v32  ;;  %4142 = vmatpush3.msra.mxu1 %v3196_v41  ;;  %v3245_v41 = vand.u32 4294901760, %v3244_v55 }
 0x2c9   : > { %4113 = vmatprep.subr.mxu0 %v6689_v30  ;;  %4143 = vmatprep.subr.mxu1 %v3203_v43 }
 0x2ca   : > { %4114 = vmatpush3.msra.mxu0 %v6689_v30  ;;  %4144 = vmatpush3.msra.mxu1 %v3203_v43  ;;  %v6848_v43 = vand.u32 4294901760, %v6811_v2 }
 0x2cb   : > { %4115 = vmatprep.subr.mxu0 %v6703_v19  ;;  %4145 = vmatprep.subr.mxu1 %v3210_v9 }
 0x2cc   : > { %4116 = vmatpush3.msra.mxu0 %v6703_v19  ;;  %4146 = vmatpush3.msra.mxu1 %v3210_v9  ;;  %v6854_v9 = vsub.f32 %v6616_v17, %v6820_v28  ;;  %v3259_v17 = vand.u32 4294901760, %v3258_v29  ;;  %v3272_v12 = vsub.f32 %v6811_v2, %v6848_v43  ;;  %v3165_v29 = vand.u32 4294901760, %v3164_v15 }
 0x2cd   : > { %4117 = vmatprep.subr.mxu0 %v6716_v4  ;;  %4147 = vmatprep.subr.mxu1 %v3217_v47 }
 0x2ce   : > { %4118 = vmatpush3.msra.mxu0 %v6716_v4  ;;  %4148 = vmatpush3.msra.mxu1 %v3217_v47  ;;  %v6865_v47 = vsub.f32 %v6611_v46, %v6837_v18  ;;  %v3266_v46 = vand.u32 4294901760, %v3265_v14  ;;  %v6881_v55 = vand.u32 4294901760, %v6854_v9 }
 0x2cf   : > { %4119 = vmatprep.subr.mxu0 %v6731_v57  ;;  %4149 = vmatprep.subr.mxu1 %v3224_v39 }
 0x2d0   : > { %4120 = vmatpush3.msra.mxu0 %v6731_v57  ;;  %4150 = vmatpush3.msra.mxu1 %v3224_v39  ;;  %v6871_v39 = vand.u32 4294901760, %v6842_v8  ;;  %v3293_v14 = vsub.f32 %v6854_v9, %v6881_v55 }
 0x2d1   : > { %4121 = vmatprep.subr.mxu0 %v6745_v33  ;;  %4151 = vmatprep.subr.mxu1 %v3231_v45 }
 0x2d2   : > { %4122 = vmatpush3.msra.mxu0 %v6745_v33  ;;  %4152 = vmatpush3.msra.mxu1 %v3231_v45  ;;  %v3279_v45 = vsub.f32 %v6828_v52, %v6860_v0  ;;  %v3286_v63 = vsub.f32 %v6842_v8, %v6871_v39  ;;  %v3294_v15 = vand.u32 4294901760, %v3293_v14 }
 0x2d3   : > { %4123 = vmatprep.subr.mxu0 %v6759_v16  ;;  %4153 = vmatprep.subr.mxu1 %v3238_v44 }
 0x2d4   : > { %4124 = vmatpush3.msra.mxu0 %v6759_v16  ;;  %4154 = vmatpush3.msra.mxu1 %v3238_v44  ;;  %v3273_v44 = vand.u32 4294901760, %v3272_v12 }
 0x2d5   : > { %4125 = vmatprep.subr.mxu0 %v6776_v49  ;;  %4155 = vmatprep.subr.mxu1 %v3245_v41 }
 0x2d6   : > { %4126 = vmatpush3.msra.mxu0 %v6776_v49  ;;  %4156 = vmatpush3.msra.mxu1 %v3245_v41  ;;  %v6888_v41 = vand.u32 4294901760, %v6865_v47 }
 0x2d7   : > { %4127 = vmatprep.subr.mxu0 %v6790_v5  ;;  %4157 = vmatprep.subr.mxu1 %v3252_v6 }
 0x2d8   : > { %4128 = vmatpush3.msra.mxu0 %v6790_v5  ;;  %4158 = vmatpush3.msra.mxu1 %v3252_v6  ;;  %v3280_v6 = vand.u32 4294901760, %v3279_v45  ;;  %v3300_v12 = vsub.f32 %v6865_v47, %v6888_v41  ;;  %v3068_v45 = vld [vmem:[%s7093_s2 + $0x10] sm:$0xff] }
 0x2d9   : > { %4129 = vmatprep.subr.mxu0 %v6806_v60  ;;  %4159 = vmatprep.subr.mxu1 %v3259_v17 }
 0x2da   : > { %4130 = vmatpush3.msra.mxu0 %v6806_v60  ;;  %4160 = vmatpush3.msra.mxu1 %v3259_v17  ;;  %v3287_v17 = vand.u32 4294901760, %v3286_v63 }
 0x2db   : > { %4131 = vmatprep.subr.mxu0 %v6820_v28  ;;  %4161 = vmatprep.subr.mxu1 %v3266_v46 }
 0x2dc   : > { %4132 = vmatpush3.msra.mxu0 %v6820_v28  ;;  %4162 = vmatpush3.msra.mxu1 %v3266_v46  ;;  %v3301_v46 = vand.u32 4294901760, %v3300_v12 }
 0x2dd   : > { %4133 = vmatprep.subr.mxu0 %v6837_v18  ;;  %4163 = vmatprep.subr.mxu1 %v3273_v44 }
 0x2de   : > { %4134 = vmatpush3.msra.mxu0 %v6837_v18  ;;  %4164 = vmatpush3.msra.mxu1 %v3273_v44 }
 0x2df   : > { %4165 = vmatprep.subr.mxu1 %v3280_v6  ;;  %4179 = vmatprep.subr.mxu0 %v6695_v50 }
 0x2e0   : > { %4136 = vmatmul.mubr.f32.vlgmr.msra.gmra.mxu0 %v3165_v29  ;;  %4166 = vmatpush3.msra.mxu1 %v3280_v6 }
 0x2e1   : > { %4180 = vmatpush3.msra.mxu0 %v6695_v50  ;;  %4167 = vmatprep.subr.mxu1 %v3287_v17  ;;  %v3069_v50 = vld [vmem:[%s7093_s2 + $0x18] sm:$0xff] }
 0x2e2   : > { %4181 = vmatprep.subr.mxu0 %v6680_v23  ;;  %4168 = vmatpush3.msra.mxu1 %v3287_v17 }
 0x2e3   : > { %4182 = vmatpush3.msra.mxu0 %v6680_v23  ;;  %4169 = vmatprep.subr.mxu1 %v3294_v15  ;;  %v6914_v23 = vand.u32 4294901760, %v3068_v45 }
 0x2e4   : > { %4183 = vmatprep.subr.mxu0 %v6685_v36  ;;  %4170 = vmatpush3.msra.mxu1 %v3294_v15 }
 0x2e5   : > { %4184 = vmatpush3.msra.mxu0 %v6685_v36  ;;  %4171 = vmatprep.subr.mxu1 %v3301_v46  ;;  %v6918_v36 = vand.u32 4294901760, %v3069_v50 }
 0x2e6   : > { %4185 = vmatprep.subr.mxu0 %v6692_v3  ;;  %4172 = vmatpush3.msra.mxu1 %v3301_v46 }
 0x2e7   : > { %4186 = vmatpush3.msra.mxu0 %v6692_v3  ;;  %4217 = vmatprep.subr.mxu1 %v6687_v51  ;;  %v6927_v3 = vsub.f32 %v3068_v45, %v6914_v23 }
 0x2e8   : > { %4187 = vmatprep.subr.mxu0 %v6706_v37  ;;  %4174 = vmatmul.mubr.f32.vlgmr.msra.gmra.mxu1 %v6793_v21 }
 0x2e9   : > { %4188 = vmatpush3.msra.mxu0 %v6706_v37  ;;  %4218 = vmatpush3.msra.mxu1 %v6687_v51  ;;  %v6932_v37 = vsub.f32 %v3069_v50, %v6918_v36 }
 0x2ea   : > { %4189 = vmatprep.subr.mxu0 %v6720_v48  ;;  %4219 = vmatprep.subr.mxu1 %v6675_v7 }
 0x2eb   : > { %4190 = vmatpush3.msra.mxu0 %v6720_v48  ;;  %4220 = vmatpush3.msra.mxu1 %v6675_v7  ;;  %v3173_v48 = vand.u32 4294901760, %v6927_v3 }
 0x2ec   : > { %4191 = vmatprep.subr.mxu0 %v6736_v42  ;;  %4221 = vmatprep.subr.mxu1 %v6673_v20 }
 0x2ed   : > { %4192 = vmatpush3.msra.mxu0 %v6736_v42  ;;  %4222 = vmatpush3.msra.mxu1 %v6673_v20  ;;  %v3183_v42 = vand.u32 4294901760, %v6932_v37 }
 0x2ee   : > { %4193 = vmatprep.subr.mxu0 %v6750_v26  ;;  %4223 = vmatprep.subr.mxu1 %v6677_v10 }
 0x2ef   : > { %4194 = vmatpush3.msra.mxu0 %v6750_v26  ;;  %4224 = vmatpush3.msra.mxu1 %v6677_v10  ;;  %v3174_v26 = vsub.f32 %v6927_v3, %v3173_v48 }
 0x2f0   : > { %4195 = vmatprep.subr.mxu0 %v6764_v61  ;;  %4225 = vmatprep.subr.mxu1 %v6682_v32 }
 0x2f1   : > { %4196 = vmatpush3.msra.mxu0 %v6764_v61  ;;  %4226 = vmatpush3.msra.mxu1 %v6682_v32  ;;  %v3184_v61 = vsub.f32 %v6932_v37, %v3183_v42 }
 0x2f2   : > { %4197 = vmatprep.subr.mxu0 %v6781_v54  ;;  %4227 = vmatprep.subr.mxu1 %v6689_v30 }
 0x2f3   : > { %4198 = vmatpush3.msra.mxu0 %v6781_v54  ;;  %4228 = vmatpush3.msra.mxu1 %v6689_v30  ;;  %v3175_v54 = vand.u32 4294901760, %v3174_v26 }
 0x2f4   : > { %4199 = vmatprep.subr.mxu0 %v6797_v13  ;;  %4229 = vmatprep.subr.mxu1 %v6703_v19 }
 0x2f5   : > { %4200 = vmatpush3.msra.mxu0 %v6797_v13  ;;  %4230 = vmatpush3.msra.mxu1 %v6703_v19  ;;  %v3185_v13 = vand.u32 4294901760, %v3184_v61 }
 0x2f6   : > { %4201 = vmatprep.subr.mxu0 %v6811_v2  ;;  %4231 = vmatprep.subr.mxu1 %v6716_v4 }
 0x2f7   : > { %4202 = vmatpush3.msra.mxu0 %v6811_v2  ;;  %4232 = vmatpush3.msra.mxu1 %v6716_v4 }
 0x2f8   : > { %4203 = vmatprep.subr.mxu0 %v6828_v52  ;;  %4233 = vmatprep.subr.mxu1 %v6731_v57 }
 0x2f9   : > { %4204 = vmatpush3.msra.mxu0 %v6828_v52  ;;  %4234 = vmatpush3.msra.mxu1 %v6731_v57 }
 0x2fa   : > { %4205 = vmatprep.subr.mxu0 %v6842_v8  ;;  %4235 = vmatprep.subr.mxu1 %v6745_v33 }
 0x2fb   : > { %4206 = vmatpush3.msra.mxu0 %v6842_v8  ;;  %4236 = vmatpush3.msra.mxu1 %v6745_v33 }
 0x2fc   : > { %4138 = vmatprep.mubr.f32.mxu0 %v3175_v54  ;;  %4207 = vmatprep.subr.mxu0 %v6854_v9 }
 0x2fd   : > { %4237 = vmatprep.subr.mxu1 %v6759_v16  ;;  %4139 = vmatmul.mubr.f32.gmra.mxu0 %v3185_v13 }
 0x2fe   : > { %4208 = vmatpush3.msra.mxu0 %v6854_v9  ;;  %4238 = vmatpush3.msra.mxu1 %v6759_v16 }
 0x2ff   : > { %4209 = vmatprep.subr.mxu0 %v6865_v47  ;;  %4239 = vmatprep.subr.mxu1 %v6776_v49 }
 0x300   : > { %4210 = vmatpush3.msra.mxu0 %v6865_v47  ;;  %4240 = vmatpush3.msra.mxu1 %v6776_v49 }
 0x301   : > { %4211 = vmatprep.mubr.f32.mxu0 %v6576_v38  ;;  %4241 = vmatprep.subr.mxu1 %v6790_v5 }
 0x302   : > { %4255 = vmatprep.subr.mxu0 %v6710_v59  ;;  %4212 = vmatmul.mubr.f32.vlgmr.msra.gmra.mxu0 %v6824_v34 }
 0x303   : > { %4242 = vmatpush3.msra.mxu1 %v6790_v5  ;;  %4256 = vmatpush3.msra.mxu0 %v6710_v59 }
 0x304   : > { %4243 = vmatprep.subr.mxu1 %v6806_v60  ;;  %4257 = vmatprep.subr.mxu0 %v6699_v40 }
 0x305   : > { %4244 = vmatpush3.msra.mxu1 %v6806_v60  ;;  %4258 = vmatpush3.msra.mxu0 %v6699_v40 }
 0x306   : > { %4176 = vmatprep.mubr.f32.mxu1 %v6914_v23  ;;  %4245 = vmatprep.subr.mxu1 %v6820_v28 }
 0x307   : > { %4259 = vmatprep.subr.mxu0 %v6713_v22  ;;  %4177 = vmatmul.mubr.f32.gmra.mxu1 %v6918_v36 }
 0x308   : > { %4246 = vmatpush3.msra.mxu1 %v6820_v28  ;;  %4260 = vmatpush3.msra.mxu0 %v6713_v22 }
 0x309   : > { %4247 = vmatprep.subr.mxu1 %v6837_v18  ;;  %4261 = vmatprep.subr.mxu0 %v6728_v1 }
 0x30a   : > { %4248 = vmatpush3.msra.mxu1 %v6837_v18  ;;  %4262 = vmatpush3.msra.mxu0 %v6728_v1 }
 0x30b   : > { %4249 = vmatprep.mubr.f32.mxu1 %v3153_v11  ;;  %4263 = vmatprep.subr.mxu0 %v6742_v62 }
 0x30c   : > { %4293 = vmatprep.subr.mxu1 %v6687_v51  ;;  %4250 = vmatmul.mubr.f32.vlgmr.msra.gmra.mxu1 %v3163_v24 }
 0x30d   : > { %4264 = vmatpush3.msra.mxu0 %v6742_v62  ;;  %4294 = vmatpush3.msra.mxu1 %v6687_v51 }
 0x30e   : > { %4265 = vmatprep.subr.mxu0 %v6756_v25  ;;  %4295 = vmatprep.subr.mxu1 %v6675_v7 }
 0x30f   : > { %4266 = vmatpush3.msra.mxu0 %v6756_v25  ;;  %4296 = vmatpush3.msra.mxu1 %v6675_v7 }
 0x310   : > { %4267 = vmatprep.subr.mxu0 %v6770_v58  ;;  %4297 = vmatprep.subr.mxu1 %v6673_v20 }
 0x311   : > { %4268 = vmatpush3.msra.mxu0 %v6770_v58  ;;  %4298 = vmatpush3.msra.mxu1 %v6673_v20 }
 0x312   : > { %4269 = vmatprep.subr.mxu0 %v6787_v56  ;;  %4299 = vmatprep.subr.mxu1 %v6677_v10 }
 0x313   : > { %4270 = vmatpush3.msra.mxu0 %v6787_v56  ;;  %4300 = vmatpush3.msra.mxu1 %v6677_v10 }
 0x314   : > { %4271 = vmatprep.subr.mxu0 %v6803_v53  ;;  %4301 = vmatprep.subr.mxu1 %v6682_v32 }
 0x315   : > { %4272 = vmatpush3.msra.mxu0 %v6803_v53  ;;  %4302 = vmatpush3.msra.mxu1 %v6682_v32 }
 0x316   : > { %4273 = vmatprep.subr.mxu0 %v6817_v35  ;;  %4303 = vmatprep.subr.mxu1 %v6689_v30 }
 0x317   : > { %4274 = vmatpush3.msra.mxu0 %v6817_v35  ;;  %4304 = vmatpush3.msra.mxu1 %v6689_v30 }
 0x318   : > { %4275 = vmatprep.subr.mxu0 %v6834_v31  ;;  %4305 = vmatprep.subr.mxu1 %v6703_v19 }
 0x319   : > { %4276 = vmatpush3.msra.mxu0 %v6834_v31  ;;  %4306 = vmatpush3.msra.mxu1 %v6703_v19 }
 0x31a   : > { %4277 = vmatprep.subr.mxu0 %v6848_v43  ;;  %4307 = vmatprep.subr.mxu1 %v6716_v4 }
 0x31b   : > { %4278 = vmatpush3.msra.mxu0 %v6848_v43  ;;  %4308 = vmatpush3.msra.mxu1 %v6716_v4 }
 0x31c   : > { %4279 = vmatprep.subr.mxu0 %v6860_v0  ;;  %4309 = vmatprep.subr.mxu1 %v6731_v57 }
 0x31d   : > { %4280 = vmatpush3.msra.mxu0 %v6860_v0  ;;  %4310 = vmatpush3.msra.mxu1 %v6731_v57 }
 0x31e   : > { %4281 = vmatprep.subr.mxu0 %v6871_v39  ;;  %4311 = vmatprep.subr.mxu1 %v6745_v33 }
 0x31f   : > { %4282 = vmatpush3.msra.mxu0 %v6871_v39  ;;  %4312 = vmatpush3.msra.mxu1 %v6745_v33 }
 0x320   : > { %4283 = vmatprep.subr.mxu0 %v6881_v55  ;;  %4313 = vmatprep.subr.mxu1 %v6759_v16 }
 0x321   : > { %4284 = vmatpush3.msra.mxu0 %v6881_v55  ;;  %4314 = vmatpush3.msra.mxu1 %v6759_v16 }
 0x322   : > { %4285 = vmatprep.subr.mxu0 %v6888_v41  ;;  %4315 = vmatprep.subr.mxu1 %v6776_v49 }
 0x323   : > { %4286 = vmatpush3.msra.mxu0 %v6888_v41  ;;  %4316 = vmatpush3.msra.mxu1 %v6776_v49 }
 0x324   : > { %4317 = vmatprep.subr.mxu1 %v6790_v5  ;;  %4214 = vmatprep.mubr.f32.mxu0 %v6927_v3 }
 0x325   : > { %4318 = vmatpush3.msra.mxu1 %v6790_v5  ;;  %4215 = vmatmul.mubr.f32.gmra.mxu0 %v6932_v37 }
 0x326   : > { %4319 = vmatprep.subr.mxu1 %v6806_v60  ;;  %4252 = vmatprep.mubr.f32.mxu1 %v3173_v48 }
 0x327   : > { %4320 = vmatpush3.msra.mxu1 %v6806_v60  ;;  %4287 = vmatprep.mubr.f32.mxu0 %v6570_v27 }
 0x328   : > { %4321 = vmatprep.subr.mxu1 %v6820_v28  ;;  %4253 = vmatmul.mubr.f32.gmra.mxu1 %v3183_v42 }
 0x329   : > { %4322 = vmatpush3.msra.mxu1 %v6820_v28  ;;  %4288 = vmatmul.mubr.f32.vlgmr.msra.gmra.mxu0 %v6793_v21 }
 0x32a   : > { %4323 = vmatprep.subr.mxu1 %v6837_v18  ;;  %4325 = vmatprep.mubr.f32.mxu1 %v6570_v27 }
 0x32b   : > { %4324 = vmatpush3.msra.mxu1 %v6837_v18  ;;  %4290 = vmatprep.mubr.f32.mxu0 %v6914_v23 }
 0x32c   : > { %4326 = vmatmul.mubr.f32.vlgmr.msra.gmra.mxu1 %v6793_v21 }
 0x32d   : > { %4291 = vmatmul.mubr.f32.gmra.mxu0 %v6918_v36  ;;  %4328 = vmatprep.mubr.f32.mxu1 %v6914_v23 }
 0x330   : > { %4329 = vmatmul.mubr.f32.gmra.mxu1 %v6918_v36 }
 0x3a0   : > { %v4137_v38 = vpop.f32.mrf.mxu0 }
 0x3a2   : > { %v3157_v11 = vpop.f32.mrf.mxu0 }
 0x3a8   : > { %v4175_v20 = vpop.f32.mrf.mxu1 }
 0x3a9   : > { %v3345_v22 = vadd.f32 %v4175_v20, %v4137_v38 }
 0x3aa   : > { %v3338_v10 = vpop.f32.mrf.mxu1 }
 0x3ab   : > { %v3339_v1 = vadd.f32 %v3338_v10, %v3157_v11 }
 0x3bd   : > { %v4140_v7 = vpop.f32.mrf.mxu0 }
 0x3bf   : > { %v3177_v32 = vpop.f32.mrf.mxu0 }
 0x3c2   : > { %v4213_v27 = vpop.f32.mrf.mxu0 }
 0x3c3   : > { %v3468_v62 = vadd.f32 %v4213_v27, %v3345_v22 }
 0x3c4   : > { %v3460_v19 = vpop.f32.mrf.mxu0 }
 0x3c5   : > { %v3461_v58 = vadd.f32 %v3460_v19, %v3339_v1 }
 0x3c7   : > { %v4178_v51 = vpop.f32.mrf.mxu1 }
 0x3c8   : > { %v3357_v57 = vadd.f32 %v4178_v51, %v4140_v7 }
 0x3c9   : > { %v3350_v30 = vpop.f32.mrf.mxu1 }
 0x3ca   : > { %v3351_v16 = vadd.f32 %v3350_v30, %v3177_v32 }
 0x3cc   : > { %v4251_v40 = vpop.f32.mrf.mxu1 }
 0x3cd   : > { %v3579_v49 = vadd.f32 %v4251_v40, %v3468_v62 }
 0x3ce   : > { %v3570_v59 = vpop.f32.mrf.mxu1 }
 0x3cf   : > { %v3571_v53 = vadd.f32 %v3570_v59, %v3461_v58 }
 0x3e5   : > { %v4216_v4 = vpop.f32.mrf.mxu0 }
 0x3e6   : > { %v3482_v21 = vadd.f32 %v4216_v4, %v3357_v57 }
 0x3e7   : > { %v3474_v33 = vpop.f32.mrf.mxu0 }
 0x3e8   : > { %v4254_v25 = vpop.f32.mrf.mxu1  ;;  %v3475_v28 = vadd.f32 %v3474_v33, %v3351_v16 }
 0x3e9   : > { %v4289_v56 = vpop.f32.mrf.mxu0  ;;  %v3595_v34 = vadd.f32 %v4254_v25, %v3482_v21 }
 0x3ea   : > { %v3586_v5 = vpop.f32.mrf.mxu1  ;;  %v3720_v60 = vadd.f32 %v4289_v56, %v3579_v49 }
 0x3eb   : > { %v3713_v2 = vpop.f32.mrf.mxu0  ;;  %v3587_v43 = vadd.f32 %v3586_v5, %v3475_v28 }
 0x3ec   : > { %v4327_v35 = vpop.f32.mrf.mxu1  ;;  %v3714_v52 = vadd.f32 %v3713_v2, %v3571_v53 }
 0x3ed   : > { %v3825_v31 = vadd.f32 %v4327_v35, %v3720_v60  ;;  %v4292_v18 = vpop.f32.mrf.mxu0 }
 0x3ee   : > { %v3818_v8 = vpop.f32.mrf.mxu1  ;;  %v3732_v0 = vadd.f32 %v4292_v18, %v3595_v34 }
 0x3ef   : > { %v3841_v24 = vmax.f32 %v3825_v31, 1e-10  ;;  %v3819_v9 = vadd.f32 %v3818_v8, %v3714_v52  ;;  %v3725_v47 = vpop.f32.mrf.mxu0 }
 0x3f0   : > { %v4330_v39 = vpop.f32.mrf.mxu1  ;;  %v3726_v44 = vadd.f32 %v3725_v47, %v3587_v43 }
 0x3f1   : > { %4356 = vlog2.f32 %v3841_v24  ;;  %v3840_v55 = vmax.f32 %v3819_v9, 1e-10  ;;  %v3837_v63 = vadd.f32 %v4330_v39, %v3732_v0 }
 0x3f2   : > { %v3830_v41 = vpop.f32.mrf.mxu1 }
 0x3f3   : > { %4358 = vlog2.f32 %v3840_v55  ;;  %v3843_v29 = vmax.f32 %v3837_v63, 1e-10  ;;  %v3831_v6 = vadd.f32 %v3830_v41, %v3726_v44 }
 0x3f5   : > { %4360 = vlog2.f32 %v3843_v29  ;;  %v3842_v14 = vmax.f32 %v3831_v6, 1e-10 }
 0x3f7   : > { %4362 = vlog2.f32 %v3842_v14 }
 0x3fe   : > { %v4357_v17 = vpop.eup %4356 }
 0x3ff   : > { %v3847_v12 = vmul.f32 0.6931472, %v4357_v17 }
 0x400   : > { %v4359_v15 = vpop.eup %4358 }
 0x401   : > { %v3853_v46 = vmul.f32 4.3429446, %v3847_v12  ;;  %v3845_v45 = vmul.f32 0.6931472, %v4359_v15 }
 0x402   : > { %v4361_v50 = vpop.eup %4360 }
 0x403   : > { %3857 = vst [vmem:[%s323_s8 + $0x8] sm:$0xff] %v3853_v46  ;;  %v3852_v23 = vmul.f32 4.3429446, %v3845_v45  ;;  %v3851_v36 = vmul.f32 0.6931472, %v4361_v50 }
 0x404   : > { %v4363_v3 = vpop.eup %4362 }
 0x405   : > { %3856 = vst [vmem:[%s323_s8] sm:$0xff] %v3852_v23  ;;  %v3855_v37 = vmul.f32 4.3429446, %v3851_v36  ;;  %v3849_v48 = vmul.f32 0.6931472, %v4363_v3  ;;  %3866 = sbr.rel (!%p4439_p5) target bundleno = 1042 (0x412), region = 74 }
 0x407   : > { %3859 = vst [vmem:[%s323_s8 + $0x18] sm:$0xff] %v3855_v37  ;;  %v3854_v42 = vmul.f32 4.3429446, %v3849_v48 }
 0x409   : > { %3858 = vst [vmem:[%s323_s8 + $0x10] sm:$0xff] %v3854_v42 }
 0x40a   : > { %v3905_v61 = vld [vmem:[%s323_s8 + $0x8] sm:$0xff] }
 0x40b   : > { %3906 = vst [vmem:[%s3868_s10 + $0x10] sm:$0xff] %v3905_v61 }
 0x40c   : > { %v3903_v26 = vld [vmem:[%s323_s8] sm:$0xff] }
 0x40d   : > { %3904 = vst [vmem:[%s3868_s10] sm:$0xff] %v3903_v26 }
 0x40e   : > { %v3909_v13 = vld [vmem:[%s323_s8 + $0x18] sm:$0xff] }
 0x40f   : > { %3910 = vst [vmem:[%s3868_s10 + $0x30] sm:$0xff] %v3909_v13 }
 0x410   : > { %v3907_v54 = vld [vmem:[%s323_s8 + $0x10] sm:$0xff] }
 0x411   : > { %3908 = vst [vmem:[%s3868_s10 + $0x20] sm:$0xff] %v3907_v54 }
 0x412 PF: > { %p10_p10 = scmp.ge.s32.totalorder %s4426_s16, 4   ;;  %s7925_s12 = smov %s4382_s13 }
 0x413   : > { %s7926_s13 = smov %s4437_s19  ;;  %s7927_s14 = smov %s4426_s16 }
 0x414   :  { %12 = sbr.rel (!%p10_p10) target bundleno = 2 (0x2), region = 143 }

</bundles_post_ra>
